<compile_context>
chip_gen: v6e
topology: v6e:2x2x1
jax: 0.10.0
libtpu: 0.0.40
codegen_flags: <defaults>
</compile_context>

<pallas_src>
import jax
import jax.numpy as jnp
from jax import lax
from jax.experimental import pallas as pl
from jax.experimental.pallas import tpu as pltpu

EPS = 1e-5          # InstanceNorm3d default eps
NEG_SLOPE = 0.01    # LeakyReLU negative_slope

# 27 tap offsets, (od, oh, ow) in the same lexicographic (kd, kh, kw) order as
# the flattened DHWIO weight layout.  Single source of truth for kernel+wrapper.
_OFFSETS3 = [(od, oh, ow)
             for od in (-1, 0, 1) for oh in (-1, 0, 1) for ow in (-1, 0, 1)]


def _make_fused_convblock_kernel(D, H, W, Cin, Cout):
    """Builds the fused ((conv -> IN -> LeakyReLU) x 2) kernel for one sample."""
    P = D * H * W
    HW = H * W
    MARG = HW + W + 1                                   # >= max |tap offset|
    offs = [od * HW + oh * W + ow for od, oh, ow in _OFFSETS3]

    def kernel(x_ref, masks_ref,
               w0_ref, b0_ref, g0_ref, bt0_ref,
               w1_ref, b1_ref, g1_ref, bt1_ref,
               o_ref,
               xs_ref, col0_ref, hs_ref, col1_ref):
        bf16 = jnp.bfloat16
        f32 = jnp.float32

        def build_im2col(src_ref, col_ref, C):
            # src_ref: (C, MARG + P + MARG) flat activations with zero margins.
            # col_ref: (27*C, P) bf16 im2col slab.
            # Each tap = static lane-axis slice * precomputed 0/1 mask, stored
            # immediately (one tap slab live at a time).
            for t, off in enumerate(offs):
                shifted = src_ref[:, MARG + off:MARG + off + P]
                col_ref[t * C:(t + 1) * C, :] = shifted * masks_ref[t:t + 1, :]

        def conv_in_lrelu(col_ref, w_ref, b_ref, g_ref, bt_ref):
            # Single big-K MXU matmul: (Cout, 27*C) @ (27*C, P), f32 accumulate.
            y = jnp.dot(w_ref[...], col_ref[...], preferred_element_type=f32)
            y = y + b_ref[...]                          # conv bias, (Cout, 1)
            # InstanceNorm3d (biased variance), ONE pass over the data.
            mean = jnp.sum(y, axis=1, keepdims=True) * (1.0 / P)
            ex2 = jnp.sum(y * y, axis=1, keepdims=True) * (1.0 / P)
            var = jnp.maximum(ex2 - mean * mean, 0.0)
            z = (y - mean) * lax.rsqrt(var + EPS)
            z = z * g_ref[...] + bt_ref[...]            # affine
            return jnp.where(z >= 0, z, NEG_SLOPE * z)  # LeakyReLU(0.01)

        def stage(act, src_ref, col_ref, C, w_ref, b_ref, g_ref, bt_ref):
            # Write activations (bf16) into the zero-margined flat buffer;
            # padding is realized by the zero margins + the per-tap masks.
            src_ref[:, :MARG] = jnp.zeros((C, MARG), bf16)
            src_ref[:, MARG + P:] = jnp.zeros((C, MARG), bf16)
            src_ref[:, MARG:MARG + P] = act.astype(bf16)
            build_im2col(src_ref, col_ref, C)
            return conv_in_lrelu(col_ref, w_ref, b_ref, g_ref, bt_ref)

        # Stage 0: Conv_0 -> Norm_0 -> Activation_0.
        h = stage(x_ref[0], xs_ref, col0_ref, Cin,
                  w0_ref, b0_ref, g0_ref, bt0_ref)
        # Stage 1: Conv_1 -> Norm_1 -> Activation_1.  `h` stays in VMEM.
        z = stage(h, hs_ref, col1_ref, Cout,
                  w1_ref, b1_ref, g1_ref, bt1_ref)

        o_ref[0] = z.astype(o_ref.dtype)                # lane-dense (Cout, P)

    return kernel


def _axis_valid(idx, off, n):
    if off < 0:
        return idx >= -off
    if off > 0:
        return idx < n - off
    return jnp.ones(idx.shape, dtype=bool)


def conv_block(x, params):
    """Fused ConvBlock forward.

    x      : (N, Cin, D, H, W) float32 (NCDHW, as in PyTorch).
    params : (w0, b0, g0, bt0, w1, b1, g1, bt1); conv weights in DHWIO layout
             (3, 3, 3, C_in_stage, Cout); b = conv bias, g / bt = InstanceNorm
             affine weight / bias, each (Cout,).
    returns: (N, Cout, D, H, W), dtype of x.
    """
    w0, b0, g0, bt0, w1, b1, g1, bt1 = params
    N, Cin, D, H, W = x.shape
    Cout = w0.shape[-1]
    P = D * H * W
    HW = H * W
    MARG = HW + W + 1
    K0, K1 = 27 * Cin, 27 * Cout
    flatw = P + 2 * MARG

    # Channel-major, spatially-flattened view (free reshape of NCDHW data);
    # no jnp.pad -- padding is fused into the kernel.
    xf = x.reshape(N, Cin, P)

    # Precompute the 27 tap validity masks (0/1, bf16) in the wrapper: they
    # are tiny ((27, P)), static, and keep all integer div/mod out of the
    # kernel.  Same tap ordering as the kernel / weight flattening.
    pos = jnp.arange(P, dtype=jnp.int32)
    d_idx, h_idx, w_idx = pos // HW, (pos // W) % H, pos % W
    masks = jnp.stack([
        _axis_valid(d_idx, od, D)
        & _axis_valid(h_idx, oh, H)
        & _axis_valid(w_idx, ow, W)
        for od, oh, ow in _OFFSETS3
    ]).astype(jnp.bfloat16)                              # (27, P)

    # DHWIO (3,3,3,Ci,Co) -> (Co, 27*Ci), k = tap*Ci + ci; bf16 MXU operands.
    w0m = w0.reshape(K0, Cout).T.astype(jnp.bfloat16)
    w1m = w1.reshape(K1, Cout).T.astype(jnp.bfloat16)

    def col(v):
        return v.reshape(Cout, 1).astype(jnp.float32)

    kernel = _make_fused_convblock_kernel(D, H, W, Cin, Cout)

    # Explicit scoped-VMEM budget: double-buffered I/O blocks + operands +
    # scratch, with headroom (clamped to a range safe on v5e/v6e/v7x).
    itm = x.dtype.itemsize
    need = (2 * (Cin + Cout) * P * itm                    # x / out blocks (x2)
            + 27 * P * 2                                  # masks (bf16)
            + (K0 + K1) * Cout * 2 + 6 * Cout * 4         # weights + bias/affine
            + ((Cin + Cout) * flatw + (K0 + K1) * P) * 2)  # bf16 scratch
    vmem_limit = int(min(max(2 * need + (4 << 20), 16 << 20), 64 << 20))

    def cspec():
        return pl.BlockSpec((Cout, 1), lambda n: (0, 0))

    out = pl.pallas_call(
        kernel,
        out_shape=jax.ShapeDtypeStruct((N, Cout, P), x.dtype),
        grid_spec=pltpu.PrefetchScalarGridSpec(
            num_scalar_prefetch=0,
            grid=(N,),
            in_specs=[
                pl.BlockSpec((1, Cin, P), lambda n: (n, 0, 0)),   # x (flat)
                pl.BlockSpec((27, P), lambda n: (0, 0)),          # tap masks
                pl.BlockSpec((Cout, K0), lambda n: (0, 0)),       # W0
                cspec(), cspec(), cspec(),                        # b0, g0, bt0
                pl.BlockSpec((Cout, K1), lambda n: (0, 0)),       # W1
                cspec(), cspec(), cspec(),                        # b1, g1, bt1
            ],
            out_specs=pl.BlockSpec((1, Cout, P), lambda n: (n, 0, 0)),
            scratch_shapes=[
                pltpu.VMEM((Cin, flatw), jnp.bfloat16),   # stage-0 flat act
                pltpu.VMEM((K0, P), jnp.bfloat16),        # stage-0 im2col
                pltpu.VMEM((Cout, flatw), jnp.bfloat16),  # stage-1 flat act
                pltpu.VMEM((K1, P), jnp.bfloat16),        # stage-1 im2col
            ],
        ),
        compiler_params=pltpu.CompilerParams(
            dimension_semantics=("parallel",),
            vmem_limit_bytes=vmem_limit,
        ),
    )(xf, masks, w0m, col(b0), col(g0), col(bt0),
      w1m, col(b1), col(g1), col(bt1))

    return out.reshape(N, Cout, D, H, W)


# ---------------- pure-JAX reference (for correctness check) ----------------
def _stage_ref(x, w, b, g, bt, matmul_dtype):
    y = lax.conv_general_dilated(
        x.astype(matmul_dtype), w.astype(matmul_dtype),
        window_strides=(1, 1, 1), padding=((1, 1), (1, 1), (1, 1)),
        dimension_numbers=("NCDHW", "DHWIO", "NCDHW"),
        preferred_element_type=jnp.float32)
    y = y + b.reshape(1, -1, 1, 1, 1)
    mean = jnp.mean(y, axis=(2, 3, 4), keepdims=True)
    var = jnp.mean((y - mean) ** 2, axis=(2, 3, 4), keepdims=True)
    y = (y - mean) * lax.rsqrt(var + EPS)
    y = y * g.reshape(1, -1, 1, 1, 1) + bt.reshape(1, -1, 1, 1, 1)
    return jnp.where(y >= 0, y, NEG_SLOPE * y)


def conv_block_ref(x, params, matmul_dtype=jnp.float32):
    w0, b0, g0, bt0, w1, b1, g1, bt1 = params
    h = _stage_ref(x, w0, b0, g0, bt0, matmul_dtype)
    return _stage_ref(h, w1, b1, g1, bt1, matmul_dtype)


if __name__ == "__main__":
    # Small shapes consistent with the module: batch=2, in_channels=4,
    # out_channels=8, spatial 8x8x8 (so P = 512 = 4 * 128 lanes).
    N, Cin, Cout = 2, 4, 8
    D = H = W = 8

    key = jax.random.PRNGKey(0)
    kx, kw0, kb0, kw1, kb1, kg0, kbt0, kg1, kbt1 = jax.random.split(key, 9)

    x = jax.random.normal(kx, (N, Cin, D, H, W), dtype=jnp.float32)

    # Conv weights in DHWIO layout; InstanceNorm affine params near (1, 0).
    w0 = 0.1 * jax.random.normal(kw0, (3, 3, 3, Cin, Cout), jnp.float32)
    b0 = 0.05 * jax.random.normal(kb0, (Cout,), jnp.float32)
    g0 = 1.0 + 0.1 * jax.random.normal(kg0, (Cout,), jnp.float32)
    bt0 = 0.1 * jax.random.normal(kbt0, (Cout,), jnp.float32)

    w1 = 0.1 * jax.random.normal(kw1, (3, 3, 3, Cout, Cout), jnp.float32)
    b1 = 0.05 * jax.random.normal(kb1, (Cout,), jnp.float32)
    g1 = 1.0 + 0.1 * jax.random.normal(kg1, (Cout,), jnp.float32)
    bt1 = 0.1 * jax.random.normal(kbt1, (Cout,), jnp.float32)

    params = (w0, b0, g0, bt0, w1, b1, g1, bt1)

    out = jax.block_until_ready(conv_block(x, params))
    assert out.shape == (N, Cout, D, H, W), out.shape

    # Tight check against a precision-matched reference (same bf16 MXU
    # operands, f32 accumulation) -- validates the kernel's math.
    ref_bf16 = jax.block_until_ready(conv_block_ref(x, params, jnp.bfloat16))
    err_bf16 = float(jnp.max(jnp.abs(out - ref_bf16)))
    assert jnp.allclose(out, ref_bf16, atol=5e-3, rtol=5e-3), err_bf16

    # Sanity bound against the pure-f32 forward: the only deviation is the
    # (review-recommended) bf16 MXU operand cast, typically a few 1e-3.
    ref_f32 = jax.block_until_ready(conv_block_ref(x, params, jnp.float32))
    err_f32 = float(jnp.max(jnp.abs(out - ref_f32)))
    assert err_f32 < 0.1, err_f32

    print("KERNEL_OK")
</pallas_src>

<mosaic_0001>
module attributes {stable_mosaic.version = 11 : i64} {
  func.func @kernel(%arg0: i32, %arg1: memref<1x4x512xf32, #tpu.memory_space<vmem>>, %arg2: memref<27x512xbf16, #tpu.memory_space<vmem>>, %arg3: memref<8x108xbf16, #tpu.memory_space<vmem>>, %arg4: memref<8x1xf32, #tpu.memory_space<vmem>>, %arg5: memref<8x1xf32, #tpu.memory_space<vmem>>, %arg6: memref<8x1xf32, #tpu.memory_space<vmem>>, %arg7: memref<8x216xbf16, #tpu.memory_space<vmem>>, %arg8: memref<8x1xf32, #tpu.memory_space<vmem>>, %arg9: memref<8x1xf32, #tpu.memory_space<vmem>>, %arg10: memref<8x1xf32, #tpu.memory_space<vmem>>, %arg11: memref<1x8x512xf32, #tpu.memory_space<vmem>>, %arg12: memref<4x658xbf16, #tpu.memory_space<vmem>>, %arg13: memref<108x512xbf16, #tpu.memory_space<vmem>>, %arg14: memref<8x658xbf16, #tpu.memory_space<vmem>>, %arg15: memref<216x512xbf16, #tpu.memory_space<vmem>>) attributes {dimension_semantics = [#tpu.dimension_semantics<parallel>], iteration_bounds = array<i64: 2>, scalar_prefetch = 0 : i64, scratch_operands = 4 : i64, tpu.core_type = #tpu.core_type<tc>, window_params = [{transform_indices = @transform_0, window_bounds = array<i64: 1, 4, 512>}, {pipeline_mode = #tpu.pipeline_mode<synchronous>, transform_indices = @transform_1, window_bounds = array<i64: 27, 512>}, {pipeline_mode = #tpu.pipeline_mode<synchronous>, transform_indices = @transform_2, window_bounds = array<i64: 8, 108>}, {pipeline_mode = #tpu.pipeline_mode<synchronous>, transform_indices = @transform_3, window_bounds = array<i64: 8, 1>}, {pipeline_mode = #tpu.pipeline_mode<synchronous>, transform_indices = @transform_4, window_bounds = array<i64: 8, 1>}, {pipeline_mode = #tpu.pipeline_mode<synchronous>, transform_indices = @transform_5, window_bounds = array<i64: 8, 1>}, {pipeline_mode = #tpu.pipeline_mode<synchronous>, transform_indices = @transform_6, window_bounds = array<i64: 8, 216>}, {pipeline_mode = #tpu.pipeline_mode<synchronous>, transform_indices = @transform_7, window_bounds = array<i64: 8, 1>}, {pipeline_mode = #tpu.pipeline_mode<synchronous>, transform_indices = @transform_8, window_bounds = array<i64: 8, 1>}, {pipeline_mode = #tpu.pipeline_mode<synchronous>, transform_indices = @transform_9, window_bounds = array<i64: 8, 1>}, {transform_indices = @transform_10, window_bounds = array<i64: 1, 8, 512>}]} {
    %c0 = arith.constant 0 : index
    %c0_0 = arith.constant 0 : index
    %c0_1 = arith.constant 0 : index
    %0 = vector.load %arg1[%c0, %c0_0, %c0_1] : memref<1x4x512xf32, #tpu.memory_space<vmem>>, vector<1x4x512xf32>
    %1 = vector.shape_cast %0 : vector<1x4x512xf32> to vector<4x512xf32>
    %cst = arith.constant 0.000000e+00 : bf16
    %2 = vector.broadcast %cst : bf16 to vector<4x73xbf16>
    %c0_2 = arith.constant 0 : index
    %c0_3 = arith.constant 0 : index
    %3 = vector.load %arg12[%c0_2, %c0_3] : memref<4x658xbf16, #tpu.memory_space<vmem>>, vector<4x73xbf16>
    tpu.vector_store %arg12[%c0_2, %c0_3], %2 {strides = array<i32>} : memref<4x658xbf16, #tpu.memory_space<vmem>>, vector<4x73xbf16>,
    %cst_4 = arith.constant 0.000000e+00 : bf16
    %4 = vector.broadcast %cst_4 : bf16 to vector<4x73xbf16>
    %c0_5 = arith.constant 0 : index
    %c585 = arith.constant 585 : index
    %5 = vector.load %arg12[%c0_5, %c585] : memref<4x658xbf16, #tpu.memory_space<vmem>>, vector<4x73xbf16>
    tpu.vector_store %arg12[%c0_5, %c585], %4 {strides = array<i32>} : memref<4x658xbf16, #tpu.memory_space<vmem>>, vector<4x73xbf16>,
    %6 = arith.truncf %1 : vector<4x512xf32> to vector<4x512xbf16>
    %c0_6 = arith.constant 0 : index
    %c73 = arith.constant 73 : index
    %7 = vector.load %arg12[%c0_6, %c73] : memref<4x658xbf16, #tpu.memory_space<vmem>>, vector<4x512xbf16>
    tpu.vector_store %arg12[%c0_6, %c73], %6 {strides = array<i32>} : memref<4x658xbf16, #tpu.memory_space<vmem>>, vector<4x512xbf16>,
    %c0_7 = arith.constant 0 : index
    %c0_8 = arith.constant 0 : index
    %8 = vector.load %arg12[%c0_7, %c0_8] : memref<4x658xbf16, #tpu.memory_space<vmem>>, vector<4x512xbf16>
    %c0_9 = arith.constant 0 : index
    %c0_10 = arith.constant 0 : index
    %9 = vector.load %arg2[%c0_9, %c0_10] : memref<27x512xbf16, #tpu.memory_space<vmem>>, vector<1x512xbf16>
    %10 = vector.broadcast %9 : vector<1x512xbf16> to vector<4x512xbf16>
    %11 = arith.mulf %8, %10 : vector<4x512xbf16>
    %c0_11 = arith.constant 0 : index
    %c0_12 = arith.constant 0 : index
    %12 = vector.load %arg13[%c0_11, %c0_12] : memref<108x512xbf16, #tpu.memory_space<vmem>>, vector<4x512xbf16>
    tpu.vector_store %arg13[%c0_11, %c0_12], %11 {strides = array<i32>} : memref<108x512xbf16, #tpu.memory_space<vmem>>, vector<4x512xbf16>,
    %c0_13 = arith.constant 0 : index
    %c1 = arith.constant 1 : index
    %13 = vector.load %arg12[%c0_13, %c1] : memref<4x658xbf16, #tpu.memory_space<vmem>>, vector<4x512xbf16>
    %c1_14 = arith.constant 1 : index
    %c0_15 = arith.constant 0 : index
    %14 = vector.load %arg2[%c1_14, %c0_15] : memref<27x512xbf16, #tpu.memory_space<vmem>>, vector<1x512xbf16>
    %15 = vector.broadcast %14 : vector<1x512xbf16> to vector<4x512xbf16>
    %16 = arith.mulf %13, %15 : vector<4x512xbf16>
    %c4 = arith.constant 4 : index
    %c0_16 = arith.constant 0 : index
    %17 = vector.load %arg13[%c4, %c0_16] : memref<108x512xbf16, #tpu.memory_space<vmem>>, vector<4x512xbf16>
    tpu.vector_store %arg13[%c4, %c0_16], %16 {strides = array<i32>} : memref<108x512xbf16, #tpu.memory_space<vmem>>, vector<4x512xbf16>,
    %c0_17 = arith.constant 0 : index
    %c2 = arith.constant 2 : index
    %18 = vector.load %arg12[%c0_17, %c2] : memref<4x658xbf16, #tpu.memory_space<vmem>>, vector<4x512xbf16>
    %c2_18 = arith.constant 2 : index
    %c0_19 = arith.constant 0 : index
    %19 = vector.load %arg2[%c2_18, %c0_19] : memref<27x512xbf16, #tpu.memory_space<vmem>>, vector<1x512xbf16>
    %20 = vector.broadcast %19 : vector<1x512xbf16> to vector<4x512xbf16>
    %21 = arith.mulf %18, %20 : vector<4x512xbf16>
    %c8 = arith.constant 8 : index
    %c0_20 = arith.constant 0 : index
    %22 = vector.load %arg13[%c8, %c0_20] : memref<108x512xbf16, #tpu.memory_space<vmem>>, vector<4x512xbf16>
    tpu.vector_store %arg13[%c8, %c0_20], %21 {strides = array<i32>} : memref<108x512xbf16, #tpu.memory_space<vmem>>, vector<4x512xbf16>,
    %c0_21 = arith.constant 0 : index
    %c8_22 = arith.constant 8 : index
    %23 = vector.load %arg12[%c0_21, %c8_22] : memref<4x658xbf16, #tpu.memory_space<vmem>>, vector<4x512xbf16>
    %c3 = arith.constant 3 : index
    %c0_23 = arith.constant 0 : index
    %24 = vector.load %arg2[%c3, %c0_23] : memref<27x512xbf16, #tpu.memory_space<vmem>>, vector<1x512xbf16>
    %25 = vector.broadcast %24 : vector<1x512xbf16> to vector<4x512xbf16>
    %26 = arith.mulf %23, %25 : vector<4x512xbf16>
    %c12 = arith.constant 12 : index
    %c0_24 = arith.constant 0 : index
    %27 = vector.load %arg13[%c12, %c0_24] : memref<108x512xbf16, #tpu.memory_space<vmem>>, vector<4x512xbf16>
    tpu.vector_store %arg13[%c12, %c0_24], %26 {strides = array<i32>} : memref<108x512xbf16, #tpu.memory_space<vmem>>, vector<4x512xbf16>,
    %c0_25 = arith.constant 0 : index
    %c9 = arith.constant 9 : index
    %28 = vector.load %arg12[%c0_25, %c9] : memref<4x658xbf16, #tpu.memory_space<vmem>>, vector<4x512xbf16>
    %c4_26 = arith.constant 4 : index
    %c0_27 = arith.constant 0 : index
    %29 = vector.load %arg2[%c4_26, %c0_27] : memref<27x512xbf16, #tpu.memory_space<vmem>>, vector<1x512xbf16>
    %30 = vector.broadcast %29 : vector<1x512xbf16> to vector<4x512xbf16>
    %31 = arith.mulf %28, %30 : vector<4x512xbf16>
    %c16 = arith.constant 16 : index
    %c0_28 = arith.constant 0 : index
    %32 = vector.load %arg13[%c16, %c0_28] : memref<108x512xbf16, #tpu.memory_space<vmem>>, vector<4x512xbf16>
    tpu.vector_store %arg13[%c16, %c0_28], %31 {strides = array<i32>} : memref<108x512xbf16, #tpu.memory_space<vmem>>, vector<4x512xbf16>,
    %c0_29 = arith.constant 0 : index
    %c10 = arith.constant 10 : index
    %33 = vector.load %arg12[%c0_29, %c10] : memref<4x658xbf16, #tpu.memory_space<vmem>>, vector<4x512xbf16>
    %c5 = arith.constant 5 : index
    %c0_30 = arith.constant 0 : index
    %34 = vector.load %arg2[%c5, %c0_30] : memref<27x512xbf16, #tpu.memory_space<vmem>>, vector<1x512xbf16>
    %35 = vector.broadcast %34 : vector<1x512xbf16> to vector<4x512xbf16>
    %36 = arith.mulf %33, %35 : vector<4x512xbf16>
    %c20 = arith.constant 20 : index
    %c0_31 = arith.constant 0 : index
    %37 = vector.load %arg13[%c20, %c0_31] : memref<108x512xbf16, #tpu.memory_space<vmem>>, vector<4x512xbf16>
    tpu.vector_store %arg13[%c20, %c0_31], %36 {strides = array<i32>} : memref<108x512xbf16, #tpu.memory_space<vmem>>, vector<4x512xbf16>,
    %c0_32 = arith.constant 0 : index
    %c16_33 = arith.constant 16 : index
    %38 = vector.load %arg12[%c0_32, %c16_33] : memref<4x658xbf16, #tpu.memory_space<vmem>>, vector<4x512xbf16>
    %c6 = arith.constant 6 : index
    %c0_34 = arith.constant 0 : index
    %39 = vector.load %arg2[%c6, %c0_34] : memref<27x512xbf16, #tpu.memory_space<vmem>>, vector<1x512xbf16>
    %40 = vector.broadcast %39 : vector<1x512xbf16> to vector<4x512xbf16>
    %41 = arith.mulf %38, %40 : vector<4x512xbf16>
    %c24 = arith.constant 24 : index
    %c0_35 = arith.constant 0 : index
    %42 = vector.load %arg13[%c24, %c0_35] : memref<108x512xbf16, #tpu.memory_space<vmem>>, vector<4x512xbf16>
    tpu.vector_store %arg13[%c24, %c0_35], %41 {strides = array<i32>} : memref<108x512xbf16, #tpu.memory_space<vmem>>, vector<4x512xbf16>,
    %c0_36 = arith.constant 0 : index
    %c17 = arith.constant 17 : index
    %43 = vector.load %arg12[%c0_36, %c17] : memref<4x658xbf16, #tpu.memory_space<vmem>>, vector<4x512xbf16>
    %c7 = arith.constant 7 : index
    %c0_37 = arith.constant 0 : index
    %44 = vector.load %arg2[%c7, %c0_37] : memref<27x512xbf16, #tpu.memory_space<vmem>>, vector<1x512xbf16>
    %45 = vector.broadcast %44 : vector<1x512xbf16> to vector<4x512xbf16>
    %46 = arith.mulf %43, %45 : vector<4x512xbf16>
    %c28 = arith.constant 28 : index
    %c0_38 = arith.constant 0 : index
    %47 = vector.load %arg13[%c28, %c0_38] : memref<108x512xbf16, #tpu.memory_space<vmem>>, vector<4x512xbf16>
    tpu.vector_store %arg13[%c28, %c0_38], %46 {strides = array<i32>} : memref<108x512xbf16, #tpu.memory_space<vmem>>, vector<4x512xbf16>,
    %c0_39 = arith.constant 0 : index
    %c18 = arith.constant 18 : index
    %48 = vector.load %arg12[%c0_39, %c18] : memref<4x658xbf16, #tpu.memory_space<vmem>>, vector<4x512xbf16>
    %c8_40 = arith.constant 8 : index
    %c0_41 = arith.constant 0 : index
    %49 = vector.load %arg2[%c8_40, %c0_41] : memref<27x512xbf16, #tpu.memory_space<vmem>>, vector<1x512xbf16>
    %50 = vector.broadcast %49 : vector<1x512xbf16> to vector<4x512xbf16>
    %51 = arith.mulf %48, %50 : vector<4x512xbf16>
    %c32 = arith.constant 32 : index
    %c0_42 = arith.constant 0 : index
    %52 = vector.load %arg13[%c32, %c0_42] : memref<108x512xbf16, #tpu.memory_space<vmem>>, vector<4x512xbf16>
    tpu.vector_store %arg13[%c32, %c0_42], %51 {strides = array<i32>} : memref<108x512xbf16, #tpu.memory_space<vmem>>, vector<4x512xbf16>,
    %c0_43 = arith.constant 0 : index
    %c64 = arith.constant 64 : index
    %53 = vector.load %arg12[%c0_43, %c64] : memref<4x658xbf16, #tpu.memory_space<vmem>>, vector<4x512xbf16>
    %c9_44 = arith.constant 9 : index
    %c0_45 = arith.constant 0 : index
    %54 = vector.load %arg2[%c9_44, %c0_45] : memref<27x512xbf16, #tpu.memory_space<vmem>>, vector<1x512xbf16>
    %55 = vector.broadcast %54 : vector<1x512xbf16> to vector<4x512xbf16>
    %56 = arith.mulf %53, %55 : vector<4x512xbf16>
    %c36 = arith.constant 36 : index
    %c0_46 = arith.constant 0 : index
    %57 = vector.load %arg13[%c36, %c0_46] : memref<108x512xbf16, #tpu.memory_space<vmem>>, vector<4x512xbf16>
    tpu.vector_store %arg13[%c36, %c0_46], %56 {strides = array<i32>} : memref<108x512xbf16, #tpu.memory_space<vmem>>, vector<4x512xbf16>,
    %c0_47 = arith.constant 0 : index
    %c65 = arith.constant 65 : index
    %58 = vector.load %arg12[%c0_47, %c65] : memref<4x658xbf16, #tpu.memory_space<vmem>>, vector<4x512xbf16>
    %c10_48 = arith.constant 10 : index
    %c0_49 = arith.constant 0 : index
    %59 = vector.load %arg2[%c10_48, %c0_49] : memref<27x512xbf16, #tpu.memory_space<vmem>>, vector<1x512xbf16>
    %60 = vector.broadcast %59 : vector<1x512xbf16> to vector<4x512xbf16>
    %61 = arith.mulf %58, %60 : vector<4x512xbf16>
    %c40 = arith.constant 40 : index
    %c0_50 = arith.constant 0 : index
    %62 = vector.load %arg13[%c40, %c0_50] : memref<108x512xbf16, #tpu.memory_space<vmem>>, vector<4x512xbf16>
    tpu.vector_store %arg13[%c40, %c0_50], %61 {strides = array<i32>} : memref<108x512xbf16, #tpu.memory_space<vmem>>, vector<4x512xbf16>,
    %c0_51 = arith.constant 0 : index
    %c66 = arith.constant 66 : index
    %63 = vector.load %arg12[%c0_51, %c66] : memref<4x658xbf16, #tpu.memory_space<vmem>>, vector<4x512xbf16>
    %c11 = arith.constant 11 : index
    %c0_52 = arith.constant 0 : index
    %64 = vector.load %arg2[%c11, %c0_52] : memref<27x512xbf16, #tpu.memory_space<vmem>>, vector<1x512xbf16>
    %65 = vector.broadcast %64 : vector<1x512xbf16> to vector<4x512xbf16>
    %66 = arith.mulf %63, %65 : vector<4x512xbf16>
    %c44 = arith.constant 44 : index
    %c0_53 = arith.constant 0 : index
    %67 = vector.load %arg13[%c44, %c0_53] : memref<108x512xbf16, #tpu.memory_space<vmem>>, vector<4x512xbf16>
    tpu.vector_store %arg13[%c44, %c0_53], %66 {strides = array<i32>} : memref<108x512xbf16, #tpu.memory_space<vmem>>, vector<4x512xbf16>,
    %c0_54 = arith.constant 0 : index
    %c72 = arith.constant 72 : index
    %68 = vector.load %arg12[%c0_54, %c72] : memref<4x658xbf16, #tpu.memory_space<vmem>>, vector<4x512xbf16>
    %c12_55 = arith.constant 12 : index
    %c0_56 = arith.constant 0 : index
    %69 = vector.load %arg2[%c12_55, %c0_56] : memref<27x512xbf16, #tpu.memory_space<vmem>>, vector<1x512xbf16>
    %70 = vector.broadcast %69 : vector<1x512xbf16> to vector<4x512xbf16>
    %71 = arith.mulf %68, %70 : vector<4x512xbf16>
    %c48 = arith.constant 48 : index
    %c0_57 = arith.constant 0 : index
    %72 = vector.load %arg13[%c48, %c0_57] : memref<108x512xbf16, #tpu.memory_space<vmem>>, vector<4x512xbf16>
    tpu.vector_store %arg13[%c48, %c0_57], %71 {strides = array<i32>} : memref<108x512xbf16, #tpu.memory_space<vmem>>, vector<4x512xbf16>,
    %c0_58 = arith.constant 0 : index
    %c73_59 = arith.constant 73 : index
    %73 = vector.load %arg12[%c0_58, %c73_59] : memref<4x658xbf16, #tpu.memory_space<vmem>>, vector<4x512xbf16>
    %c13 = arith.constant 13 : index
    %c0_60 = arith.constant 0 : index
    %74 = vector.load %arg2[%c13, %c0_60] : memref<27x512xbf16, #tpu.memory_space<vmem>>, vector<1x512xbf16>
    %75 = vector.broadcast %74 : vector<1x512xbf16> to vector<4x512xbf16>
    %76 = arith.mulf %73, %75 : vector<4x512xbf16>
    %c52 = arith.constant 52 : index
    %c0_61 = arith.constant 0 : index
    %77 = vector.load %arg13[%c52, %c0_61] : memref<108x512xbf16, #tpu.memory_space<vmem>>, vector<4x512xbf16>
    tpu.vector_store %arg13[%c52, %c0_61], %76 {strides = array<i32>} : memref<108x512xbf16, #tpu.memory_space<vmem>>, vector<4x512xbf16>,
    %c0_62 = arith.constant 0 : index
    %c74 = arith.constant 74 : index
    %78 = vector.load %arg12[%c0_62, %c74] : memref<4x658xbf16, #tpu.memory_space<vmem>>, vector<4x512xbf16>
    %c14 = arith.constant 14 : index
    %c0_63 = arith.constant 0 : index
    %79 = vector.load %arg2[%c14, %c0_63] : memref<27x512xbf16, #tpu.memory_space<vmem>>, vector<1x512xbf16>
    %80 = vector.broadcast %79 : vector<1x512xbf16> to vector<4x512xbf16>
    %81 = arith.mulf %78, %80 : vector<4x512xbf16>
    %c56 = arith.constant 56 : index
    %c0_64 = arith.constant 0 : index
    %82 = vector.load %arg13[%c56, %c0_64] : memref<108x512xbf16, #tpu.memory_space<vmem>>, vector<4x512xbf16>
    tpu.vector_store %arg13[%c56, %c0_64], %81 {strides = array<i32>} : memref<108x512xbf16, #tpu.memory_space<vmem>>, vector<4x512xbf16>,
    %c0_65 = arith.constant 0 : index
    %c80 = arith.constant 80 : index
    %83 = vector.load %arg12[%c0_65, %c80] : memref<4x658xbf16, #tpu.memory_space<vmem>>, vector<4x512xbf16>
    %c15 = arith.constant 15 : index
    %c0_66 = arith.constant 0 : index
    %84 = vector.load %arg2[%c15, %c0_66] : memref<27x512xbf16, #tpu.memory_space<vmem>>, vector<1x512xbf16>
    %85 = vector.broadcast %84 : vector<1x512xbf16> to vector<4x512xbf16>
    %86 = arith.mulf %83, %85 : vector<4x512xbf16>
    %c60 = arith.constant 60 : index
    %c0_67 = arith.constant 0 : index
    %87 = vector.load %arg13[%c60, %c0_67] : memref<108x512xbf16, #tpu.memory_space<vmem>>, vector<4x512xbf16>
    tpu.vector_store %arg13[%c60, %c0_67], %86 {strides = array<i32>} : memref<108x512xbf16, #tpu.memory_space<vmem>>, vector<4x512xbf16>,
    %c0_68 = arith.constant 0 : index
    %c81 = arith.constant 81 : index
    %88 = vector.load %arg12[%c0_68, %c81] : memref<4x658xbf16, #tpu.memory_space<vmem>>, vector<4x512xbf16>
    %c16_69 = arith.constant 16 : index
    %c0_70 = arith.constant 0 : index
    %89 = vector.load %arg2[%c16_69, %c0_70] : memref<27x512xbf16, #tpu.memory_space<vmem>>, vector<1x512xbf16>
    %90 = vector.broadcast %89 : vector<1x512xbf16> to vector<4x512xbf16>
    %91 = arith.mulf %88, %90 : vector<4x512xbf16>
    %c64_71 = arith.constant 64 : index
    %c0_72 = arith.constant 0 : index
    %92 = vector.load %arg13[%c64_71, %c0_72] : memref<108x512xbf16, #tpu.memory_space<vmem>>, vector<4x512xbf16>
    tpu.vector_store %arg13[%c64_71, %c0_72], %91 {strides = array<i32>} : memref<108x512xbf16, #tpu.memory_space<vmem>>, vector<4x512xbf16>,
    %c0_73 = arith.constant 0 : index
    %c82 = arith.constant 82 : index
    %93 = vector.load %arg12[%c0_73, %c82] : memref<4x658xbf16, #tpu.memory_space<vmem>>, vector<4x512xbf16>
    %c17_74 = arith.constant 17 : index
    %c0_75 = arith.constant 0 : index
    %94 = vector.load %arg2[%c17_74, %c0_75] : memref<27x512xbf16, #tpu.memory_space<vmem>>, vector<1x512xbf16>
    %95 = vector.broadcast %94 : vector<1x512xbf16> to vector<4x512xbf16>
    %96 = arith.mulf %93, %95 : vector<4x512xbf16>
    %c68 = arith.constant 68 : index
    %c0_76 = arith.constant 0 : index
    %97 = vector.load %arg13[%c68, %c0_76] : memref<108x512xbf16, #tpu.memory_space<vmem>>, vector<4x512xbf16>
    tpu.vector_store %arg13[%c68, %c0_76], %96 {strides = array<i32>} : memref<108x512xbf16, #tpu.memory_space<vmem>>, vector<4x512xbf16>,
    %c0_77 = arith.constant 0 : index
    %c128 = arith.constant 128 : index
    %98 = vector.load %arg12[%c0_77, %c128] : memref<4x658xbf16, #tpu.memory_space<vmem>>, vector<4x512xbf16>
    %c18_78 = arith.constant 18 : index
    %c0_79 = arith.constant 0 : index
    %99 = vector.load %arg2[%c18_78, %c0_79] : memref<27x512xbf16, #tpu.memory_space<vmem>>, vector<1x512xbf16>
    %100 = vector.broadcast %99 : vector<1x512xbf16> to vector<4x512xbf16>
    %101 = arith.mulf %98, %100 : vector<4x512xbf16>
    %c72_80 = arith.constant 72 : index
    %c0_81 = arith.constant 0 : index
    %102 = vector.load %arg13[%c72_80, %c0_81] : memref<108x512xbf16, #tpu.memory_space<vmem>>, vector<4x512xbf16>
    tpu.vector_store %arg13[%c72_80, %c0_81], %101 {strides = array<i32>} : memref<108x512xbf16, #tpu.memory_space<vmem>>, vector<4x512xbf16>,
    %c0_82 = arith.constant 0 : index
    %c129 = arith.constant 129 : index
    %103 = vector.load %arg12[%c0_82, %c129] : memref<4x658xbf16, #tpu.memory_space<vmem>>, vector<4x512xbf16>
    %c19 = arith.constant 19 : index
    %c0_83 = arith.constant 0 : index
    %104 = vector.load %arg2[%c19, %c0_83] : memref<27x512xbf16, #tpu.memory_space<vmem>>, vector<1x512xbf16>
    %105 = vector.broadcast %104 : vector<1x512xbf16> to vector<4x512xbf16>
    %106 = arith.mulf %103, %105 : vector<4x512xbf16>
    %c76 = arith.constant 76 : index
    %c0_84 = arith.constant 0 : index
    %107 = vector.load %arg13[%c76, %c0_84] : memref<108x512xbf16, #tpu.memory_space<vmem>>, vector<4x512xbf16>
    tpu.vector_store %arg13[%c76, %c0_84], %106 {strides = array<i32>} : memref<108x512xbf16, #tpu.memory_space<vmem>>, vector<4x512xbf16>,
    %c0_85 = arith.constant 0 : index
    %c130 = arith.constant 130 : index
    %108 = vector.load %arg12[%c0_85, %c130] : memref<4x658xbf16, #tpu.memory_space<vmem>>, vector<4x512xbf16>
    %c20_86 = arith.constant 20 : index
    %c0_87 = arith.constant 0 : index
    %109 = vector.load %arg2[%c20_86, %c0_87] : memref<27x512xbf16, #tpu.memory_space<vmem>>, vector<1x512xbf16>
    %110 = vector.broadcast %109 : vector<1x512xbf16> to vector<4x512xbf16>
    %111 = arith.mulf %108, %110 : vector<4x512xbf16>
    %c80_88 = arith.constant 80 : index
    %c0_89 = arith.constant 0 : index
    %112 = vector.load %arg13[%c80_88, %c0_89] : memref<108x512xbf16, #tpu.memory_space<vmem>>, vector<4x512xbf16>
    tpu.vector_store %arg13[%c80_88, %c0_89], %111 {strides = array<i32>} : memref<108x512xbf16, #tpu.memory_space<vmem>>, vector<4x512xbf16>,
    %c0_90 = arith.constant 0 : index
    %c136 = arith.constant 136 : index
    %113 = vector.load %arg12[%c0_90, %c136] : memref<4x658xbf16, #tpu.memory_space<vmem>>, vector<4x512xbf16>
    %c21 = arith.constant 21 : index
    %c0_91 = arith.constant 0 : index
    %114 = vector.load %arg2[%c21, %c0_91] : memref<27x512xbf16, #tpu.memory_space<vmem>>, vector<1x512xbf16>
    %115 = vector.broadcast %114 : vector<1x512xbf16> to vector<4x512xbf16>
    %116 = arith.mulf %113, %115 : vector<4x512xbf16>
    %c84 = arith.constant 84 : index
    %c0_92 = arith.constant 0 : index
    %117 = vector.load %arg13[%c84, %c0_92] : memref<108x512xbf16, #tpu.memory_space<vmem>>, vector<4x512xbf16>
    tpu.vector_store %arg13[%c84, %c0_92], %116 {strides = array<i32>} : memref<108x512xbf16, #tpu.memory_space<vmem>>, vector<4x512xbf16>,
    %c0_93 = arith.constant 0 : index
    %c137 = arith.constant 137 : index
    %118 = vector.load %arg12[%c0_93, %c137] : memref<4x658xbf16, #tpu.memory_space<vmem>>, vector<4x512xbf16>
    %c22 = arith.constant 22 : index
    %c0_94 = arith.constant 0 : index
    %119 = vector.load %arg2[%c22, %c0_94] : memref<27x512xbf16, #tpu.memory_space<vmem>>, vector<1x512xbf16>
    %120 = vector.broadcast %119 : vector<1x512xbf16> to vector<4x512xbf16>
    %121 = arith.mulf %118, %120 : vector<4x512xbf16>
    %c88 = arith.constant 88 : index
    %c0_95 = arith.constant 0 : index
    %122 = vector.load %arg13[%c88, %c0_95] : memref<108x512xbf16, #tpu.memory_space<vmem>>, vector<4x512xbf16>
    tpu.vector_store %arg13[%c88, %c0_95], %121 {strides = array<i32>} : memref<108x512xbf16, #tpu.memory_space<vmem>>, vector<4x512xbf16>,
    %c0_96 = arith.constant 0 : index
    %c138 = arith.constant 138 : index
    %123 = vector.load %arg12[%c0_96, %c138] : memref<4x658xbf16, #tpu.memory_space<vmem>>, vector<4x512xbf16>
    %c23 = arith.constant 23 : index
    %c0_97 = arith.constant 0 : index
    %124 = vector.load %arg2[%c23, %c0_97] : memref<27x512xbf16, #tpu.memory_space<vmem>>, vector<1x512xbf16>
    %125 = vector.broadcast %124 : vector<1x512xbf16> to vector<4x512xbf16>
    %126 = arith.mulf %123, %125 : vector<4x512xbf16>
    %c92 = arith.constant 92 : index
    %c0_98 = arith.constant 0 : index
    %127 = vector.load %arg13[%c92, %c0_98] : memref<108x512xbf16, #tpu.memory_space<vmem>>, vector<4x512xbf16>
    tpu.vector_store %arg13[%c92, %c0_98], %126 {strides = array<i32>} : memref<108x512xbf16, #tpu.memory_space<vmem>>, vector<4x512xbf16>,
    %c0_99 = arith.constant 0 : index
    %c144 = arith.constant 144 : index
    %128 = vector.load %arg12[%c0_99, %c144] : memref<4x658xbf16, #tpu.memory_space<vmem>>, vector<4x512xbf16>
    %c24_100 = arith.constant 24 : index
    %c0_101 = arith.constant 0 : index
    %129 = vector.load %arg2[%c24_100, %c0_101] : memref<27x512xbf16, #tpu.memory_space<vmem>>, vector<1x512xbf16>
    %130 = vector.broadcast %129 : vector<1x512xbf16> to vector<4x512xbf16>
    %131 = arith.mulf %128, %130 : vector<4x512xbf16>
    %c96 = arith.constant 96 : index
    %c0_102 = arith.constant 0 : index
    %132 = vector.load %arg13[%c96, %c0_102] : memref<108x512xbf16, #tpu.memory_space<vmem>>, vector<4x512xbf16>
    tpu.vector_store %arg13[%c96, %c0_102], %131 {strides = array<i32>} : memref<108x512xbf16, #tpu.memory_space<vmem>>, vector<4x512xbf16>,
    %c0_103 = arith.constant 0 : index
    %c145 = arith.constant 145 : index
    %133 = vector.load %arg12[%c0_103, %c145] : memref<4x658xbf16, #tpu.memory_space<vmem>>, vector<4x512xbf16>
    %c25 = arith.constant 25 : index
    %c0_104 = arith.constant 0 : index
    %134 = vector.load %arg2[%c25, %c0_104] : memref<27x512xbf16, #tpu.memory_space<vmem>>, vector<1x512xbf16>
    %135 = vector.broadcast %134 : vector<1x512xbf16> to vector<4x512xbf16>
    %136 = arith.mulf %133, %135 : vector<4x512xbf16>
    %c100 = arith.constant 100 : index
    %c0_105 = arith.constant 0 : index
    %137 = vector.load %arg13[%c100, %c0_105] : memref<108x512xbf16, #tpu.memory_space<vmem>>, vector<4x512xbf16>
    tpu.vector_store %arg13[%c100, %c0_105], %136 {strides = array<i32>} : memref<108x512xbf16, #tpu.memory_space<vmem>>, vector<4x512xbf16>,
    %c0_106 = arith.constant 0 : index
    %c146 = arith.constant 146 : index
    %138 = vector.load %arg12[%c0_106, %c146] : memref<4x658xbf16, #tpu.memory_space<vmem>>, vector<4x512xbf16>
    %c26 = arith.constant 26 : index
    %c0_107 = arith.constant 0 : index
    %139 = vector.load %arg2[%c26, %c0_107] : memref<27x512xbf16, #tpu.memory_space<vmem>>, vector<1x512xbf16>
    %140 = vector.broadcast %139 : vector<1x512xbf16> to vector<4x512xbf16>
    %141 = arith.mulf %138, %140 : vector<4x512xbf16>
    %c104 = arith.constant 104 : index
    %c0_108 = arith.constant 0 : index
    %142 = vector.load %arg13[%c104, %c0_108] : memref<108x512xbf16, #tpu.memory_space<vmem>>, vector<4x512xbf16>
    tpu.vector_store %arg13[%c104, %c0_108], %141 {strides = array<i32>} : memref<108x512xbf16, #tpu.memory_space<vmem>>, vector<4x512xbf16>,
    %c0_109 = arith.constant 0 : index
    %c0_110 = arith.constant 0 : index
    %143 = vector.load %arg3[%c0_109, %c0_110] : memref<8x108xbf16, #tpu.memory_space<vmem>>, vector<8x108xbf16>
    %c0_111 = arith.constant 0 : index
    %c0_112 = arith.constant 0 : index
    %144 = vector.load %arg13[%c0_111, %c0_112] : memref<108x512xbf16, #tpu.memory_space<vmem>>, vector<108x512xbf16>
    %cst_113 = arith.constant dense<0.000000e+00> : vector<8x512xf32>
    %145 = tpu.matmul %143, %144, %cst_113 {dimension_numbers = #tpu.dot_dimension_numbers<[1], [0], [0], [1], [0, 0, 1, 1], [], []>} : vector<8x108xbf16>, vector<108x512xbf16>, vector<8x512xf32> -> vector<8x512xf32>
    %c0_114 = arith.constant 0 : index
    %c0_115 = arith.constant 0 : index
    %146 = vector.load %arg4[%c0_114, %c0_115] : memref<8x1xf32, #tpu.memory_space<vmem>>, vector<8x1xf32>
    %147 = vector.broadcast %146 : vector<8x1xf32> to vector<8x512xf32>
    %148 = arith.addf %145, %147 : vector<8x512xf32>
    %cst_116 = arith.constant dense<0.000000e+00> : vector<8xf32>
    %149 = vector.multi_reduction <add>, %148, %cst_116 [1] : vector<8x512xf32> to vector<8xf32>
    %150 = vector.shape_cast %149 : vector<8xf32> to vector<8x1xf32>
    %cst_117 = arith.constant 0.001953125 : f32
    %151 = vector.broadcast %cst_117 : f32 to vector<8x1xf32>
    %152 = arith.mulf %150, %151 : vector<8x1xf32>
    %153 = arith.mulf %148, %148 : vector<8x512xf32>
    %cst_118 = arith.constant dense<0.000000e+00> : vector<8xf32>
    %154 = vector.multi_reduction <add>, %153, %cst_118 [1] : vector<8x512xf32> to vector<8xf32>
    %155 = vector.shape_cast %154 : vector<8xf32> to vector<8x1xf32>
    %cst_119 = arith.constant 0.001953125 : f32
    %156 = vector.broadcast %cst_119 : f32 to vector<8x1xf32>
    %157 = arith.mulf %155, %156 : vector<8x1xf32>
    %158 = arith.mulf %152, %152 : vector<8x1xf32>
    %159 = arith.subf %157, %158 : vector<8x1xf32>
    %cst_120 = arith.constant 0.000000e+00 : f32
    %160 = vector.broadcast %cst_120 : f32 to vector<8x1xf32>
    %161 = arith.maximumf %159, %160 : vector<8x1xf32>
    %162 = vector.broadcast %152 : vector<8x1xf32> to vector<8x512xf32>
    %163 = arith.subf %148, %162 : vector<8x512xf32>
    %cst_121 = arith.constant 9.99999974E-6 : f32
    %164 = vector.broadcast %cst_121 : f32 to vector<8x1xf32>
    %165 = arith.addf %161, %164 : vector<8x1xf32>
    %166 = math.rsqrt %165 : vector<8x1xf32>
    %167 = vector.broadcast %166 : vector<8x1xf32> to vector<8x512xf32>
    %168 = arith.mulf %163, %167 : vector<8x512xf32>
    %c0_122 = arith.constant 0 : index
    %c0_123 = arith.constant 0 : index
    %169 = vector.load %arg5[%c0_122, %c0_123] : memref<8x1xf32, #tpu.memory_space<vmem>>, vector<8x1xf32>
    %170 = vector.broadcast %169 : vector<8x1xf32> to vector<8x512xf32>
    %171 = arith.mulf %168, %170 : vector<8x512xf32>
    %c0_124 = arith.constant 0 : index
    %c0_125 = arith.constant 0 : index
    %172 = vector.load %arg6[%c0_124, %c0_125] : memref<8x1xf32, #tpu.memory_space<vmem>>, vector<8x1xf32>
    %173 = vector.broadcast %172 : vector<8x1xf32> to vector<8x512xf32>
    %174 = arith.addf %171, %173 : vector<8x512xf32>
    %cst_126 = arith.constant 0.000000e+00 : f32
    %175 = vector.broadcast %cst_126 : f32 to vector<8x512xf32>
    %176 = arith.cmpf oge, %174, %175 : vector<8x512xf32>
    %cst_127 = arith.constant 0.00999999977 : f32
    %177 = vector.broadcast %cst_127 : f32 to vector<8x512xf32>
    %178 = arith.mulf %177, %174 : vector<8x512xf32>
    %179 = arith.select %176, %174, %178 : vector<8x512xi1>, vector<8x512xf32>
    %cst_128 = arith.constant 0.000000e+00 : bf16
    %180 = vector.broadcast %cst_128 : bf16 to vector<8x73xbf16>
    %c0_129 = arith.constant 0 : index
    %c0_130 = arith.constant 0 : index
    %181 = vector.load %arg14[%c0_129, %c0_130] : memref<8x658xbf16, #tpu.memory_space<vmem>>, vector<8x73xbf16>
    tpu.vector_store %arg14[%c0_129, %c0_130], %180 {strides = array<i32>} : memref<8x658xbf16, #tpu.memory_space<vmem>>, vector<8x73xbf16>,
    %cst_131 = arith.constant 0.000000e+00 : bf16
    %182 = vector.broadcast %cst_131 : bf16 to vector<8x73xbf16>
    %c0_132 = arith.constant 0 : index
    %c585_133 = arith.constant 585 : index
    %183 = vector.load %arg14[%c0_132, %c585_133] : memref<8x658xbf16, #tpu.memory_space<vmem>>, vector<8x73xbf16>
    tpu.vector_store %arg14[%c0_132, %c585_133], %182 {strides = array<i32>} : memref<8x658xbf16, #tpu.memory_space<vmem>>, vector<8x73xbf16>,
    %184 = arith.truncf %179 : vector<8x512xf32> to vector<8x512xbf16>
    %c0_134 = arith.constant 0 : index
    %c73_135 = arith.constant 73 : index
    %185 = vector.load %arg14[%c0_134, %c73_135] : memref<8x658xbf16, #tpu.memory_space<vmem>>, vector<8x512xbf16>
    tpu.vector_store %arg14[%c0_134, %c73_135], %184 {strides = array<i32>} : memref<8x658xbf16, #tpu.memory_space<vmem>>, vector<8x512xbf16>,
    %c0_136 = arith.constant 0 : index
    %c0_137 = arith.constant 0 : index
    %186 = vector.load %arg14[%c0_136, %c0_137] : memref<8x658xbf16, #tpu.memory_space<vmem>>, vector<8x512xbf16>
    %c0_138 = arith.constant 0 : index
    %c0_139 = arith.constant 0 : index
    %187 = vector.load %arg2[%c0_138, %c0_139] : memref<27x512xbf16, #tpu.memory_space<vmem>>, vector<1x512xbf16>
    %188 = vector.broadcast %187 : vector<1x512xbf16> to vector<8x512xbf16>
    %189 = arith.mulf %186, %188 : vector<8x512xbf16>
    %c0_140 = arith.constant 0 : index
    %c0_141 = arith.constant 0 : index
    %190 = vector.load %arg15[%c0_140, %c0_141] : memref<216x512xbf16, #tpu.memory_space<vmem>>, vector<8x512xbf16>
    tpu.vector_store %arg15[%c0_140, %c0_141], %189 {strides = array<i32>} : memref<216x512xbf16, #tpu.memory_space<vmem>>, vector<8x512xbf16>,
    %c0_142 = arith.constant 0 : index
    %c1_143 = arith.constant 1 : index
    %191 = vector.load %arg14[%c0_142, %c1_143] : memref<8x658xbf16, #tpu.memory_space<vmem>>, vector<8x512xbf16>
    %c1_144 = arith.constant 1 : index
    %c0_145 = arith.constant 0 : index
    %192 = vector.load %arg2[%c1_144, %c0_145] : memref<27x512xbf16, #tpu.memory_space<vmem>>, vector<1x512xbf16>
    %193 = vector.broadcast %192 : vector<1x512xbf16> to vector<8x512xbf16>
    %194 = arith.mulf %191, %193 : vector<8x512xbf16>
    %c8_146 = arith.constant 8 : index
    %c0_147 = arith.constant 0 : index
    %195 = vector.load %arg15[%c8_146, %c0_147] : memref<216x512xbf16, #tpu.memory_space<vmem>>, vector<8x512xbf16>
    tpu.vector_store %arg15[%c8_146, %c0_147], %194 {strides = array<i32>} : memref<216x512xbf16, #tpu.memory_space<vmem>>, vector<8x512xbf16>,
    %c0_148 = arith.constant 0 : index
    %c2_149 = arith.constant 2 : index
    %196 = vector.load %arg14[%c0_148, %c2_149] : memref<8x658xbf16, #tpu.memory_space<vmem>>, vector<8x512xbf16>
    %c2_150 = arith.constant 2 : index
    %c0_151 = arith.constant 0 : index
    %197 = vector.load %arg2[%c2_150, %c0_151] : memref<27x512xbf16, #tpu.memory_space<vmem>>, vector<1x512xbf16>
    %198 = vector.broadcast %197 : vector<1x512xbf16> to vector<8x512xbf16>
    %199 = arith.mulf %196, %198 : vector<8x512xbf16>
    %c16_152 = arith.constant 16 : index
    %c0_153 = arith.constant 0 : index
    %200 = vector.load %arg15[%c16_152, %c0_153] : memref<216x512xbf16, #tpu.memory_space<vmem>>, vector<8x512xbf16>
    tpu.vector_store %arg15[%c16_152, %c0_153], %199 {strides = array<i32>} : memref<216x512xbf16, #tpu.memory_space<vmem>>, vector<8x512xbf16>,
    %c0_154 = arith.constant 0 : index
    %c8_155 = arith.constant 8 : index
    %201 = vector.load %arg14[%c0_154, %c8_155] : memref<8x658xbf16, #tpu.memory_space<vmem>>, vector<8x512xbf16>
    %c3_156 = arith.constant 3 : index
    %c0_157 = arith.constant 0 : index
    %202 = vector.load %arg2[%c3_156, %c0_157] : memref<27x512xbf16, #tpu.memory_space<vmem>>, vector<1x512xbf16>
    %203 = vector.broadcast %202 : vector<1x512xbf16> to vector<8x512xbf16>
    %204 = arith.mulf %201, %203 : vector<8x512xbf16>
    %c24_158 = arith.constant 24 : index
    %c0_159 = arith.constant 0 : index
    %205 = vector.load %arg15[%c24_158, %c0_159] : memref<216x512xbf16, #tpu.memory_space<vmem>>, vector<8x512xbf16>
    tpu.vector_store %arg15[%c24_158, %c0_159], %204 {strides = array<i32>} : memref<216x512xbf16, #tpu.memory_space<vmem>>, vector<8x512xbf16>,
    %c0_160 = arith.constant 0 : index
    %c9_161 = arith.constant 9 : index
    %206 = vector.load %arg14[%c0_160, %c9_161] : memref<8x658xbf16, #tpu.memory_space<vmem>>, vector<8x512xbf16>
    %c4_162 = arith.constant 4 : index
    %c0_163 = arith.constant 0 : index
    %207 = vector.load %arg2[%c4_162, %c0_163] : memref<27x512xbf16, #tpu.memory_space<vmem>>, vector<1x512xbf16>
    %208 = vector.broadcast %207 : vector<1x512xbf16> to vector<8x512xbf16>
    %209 = arith.mulf %206, %208 : vector<8x512xbf16>
    %c32_164 = arith.constant 32 : index
    %c0_165 = arith.constant 0 : index
    %210 = vector.load %arg15[%c32_164, %c0_165] : memref<216x512xbf16, #tpu.memory_space<vmem>>, vector<8x512xbf16>
    tpu.vector_store %arg15[%c32_164, %c0_165], %209 {strides = array<i32>} : memref<216x512xbf16, #tpu.memory_space<vmem>>, vector<8x512xbf16>,
    %c0_166 = arith.constant 0 : index
    %c10_167 = arith.constant 10 : index
    %211 = vector.load %arg14[%c0_166, %c10_167] : memref<8x658xbf16, #tpu.memory_space<vmem>>, vector<8x512xbf16>
    %c5_168 = arith.constant 5 : index
    %c0_169 = arith.constant 0 : index
    %212 = vector.load %arg2[%c5_168, %c0_169] : memref<27x512xbf16, #tpu.memory_space<vmem>>, vector<1x512xbf16>
    %213 = vector.broadcast %212 : vector<1x512xbf16> to vector<8x512xbf16>
    %214 = arith.mulf %211, %213 : vector<8x512xbf16>
    %c40_170 = arith.constant 40 : index
    %c0_171 = arith.constant 0 : index
    %215 = vector.load %arg15[%c40_170, %c0_171] : memref<216x512xbf16, #tpu.memory_space<vmem>>, vector<8x512xbf16>
    tpu.vector_store %arg15[%c40_170, %c0_171], %214 {strides = array<i32>} : memref<216x512xbf16, #tpu.memory_space<vmem>>, vector<8x512xbf16>,
    %c0_172 = arith.constant 0 : index
    %c16_173 = arith.constant 16 : index
    %216 = vector.load %arg14[%c0_172, %c16_173] : memref<8x658xbf16, #tpu.memory_space<vmem>>, vector<8x512xbf16>
    %c6_174 = arith.constant 6 : index
    %c0_175 = arith.constant 0 : index
    %217 = vector.load %arg2[%c6_174, %c0_175] : memref<27x512xbf16, #tpu.memory_space<vmem>>, vector<1x512xbf16>
    %218 = vector.broadcast %217 : vector<1x512xbf16> to vector<8x512xbf16>
    %219 = arith.mulf %216, %218 : vector<8x512xbf16>
    %c48_176 = arith.constant 48 : index
    %c0_177 = arith.constant 0 : index
    %220 = vector.load %arg15[%c48_176, %c0_177] : memref<216x512xbf16, #tpu.memory_space<vmem>>, vector<8x512xbf16>
    tpu.vector_store %arg15[%c48_176, %c0_177], %219 {strides = array<i32>} : memref<216x512xbf16, #tpu.memory_space<vmem>>, vector<8x512xbf16>,
    %c0_178 = arith.constant 0 : index
    %c17_179 = arith.constant 17 : index
    %221 = vector.load %arg14[%c0_178, %c17_179] : memref<8x658xbf16, #tpu.memory_space<vmem>>, vector<8x512xbf16>
    %c7_180 = arith.constant 7 : index
    %c0_181 = arith.constant 0 : index
    %222 = vector.load %arg2[%c7_180, %c0_181] : memref<27x512xbf16, #tpu.memory_space<vmem>>, vector<1x512xbf16>
    %223 = vector.broadcast %222 : vector<1x512xbf16> to vector<8x512xbf16>
    %224 = arith.mulf %221, %223 : vector<8x512xbf16>
    %c56_182 = arith.constant 56 : index
    %c0_183 = arith.constant 0 : index
    %225 = vector.load %arg15[%c56_182, %c0_183] : memref<216x512xbf16, #tpu.memory_space<vmem>>, vector<8x512xbf16>
    tpu.vector_store %arg15[%c56_182, %c0_183], %224 {strides = array<i32>} : memref<216x512xbf16, #tpu.memory_space<vmem>>, vector<8x512xbf16>,
    %c0_184 = arith.constant 0 : index
    %c18_185 = arith.constant 18 : index
    %226 = vector.load %arg14[%c0_184, %c18_185] : memref<8x658xbf16, #tpu.memory_space<vmem>>, vector<8x512xbf16>
    %c8_186 = arith.constant 8 : index
    %c0_187 = arith.constant 0 : index
    %227 = vector.load %arg2[%c8_186, %c0_187] : memref<27x512xbf16, #tpu.memory_space<vmem>>, vector<1x512xbf16>
    %228 = vector.broadcast %227 : vector<1x512xbf16> to vector<8x512xbf16>
    %229 = arith.mulf %226, %228 : vector<8x512xbf16>
    %c64_188 = arith.constant 64 : index
    %c0_189 = arith.constant 0 : index
    %230 = vector.load %arg15[%c64_188, %c0_189] : memref<216x512xbf16, #tpu.memory_space<vmem>>, vector<8x512xbf16>
    tpu.vector_store %arg15[%c64_188, %c0_189], %229 {strides = array<i32>} : memref<216x512xbf16, #tpu.memory_space<vmem>>, vector<8x512xbf16>,
    %c0_190 = arith.constant 0 : index
    %c64_191 = arith.constant 64 : index
    %231 = vector.load %arg14[%c0_190, %c64_191] : memref<8x658xbf16, #tpu.memory_space<vmem>>, vector<8x512xbf16>
    %c9_192 = arith.constant 9 : index
    %c0_193 = arith.constant 0 : index
    %232 = vector.load %arg2[%c9_192, %c0_193] : memref<27x512xbf16, #tpu.memory_space<vmem>>, vector<1x512xbf16>
    %233 = vector.broadcast %232 : vector<1x512xbf16> to vector<8x512xbf16>
    %234 = arith.mulf %231, %233 : vector<8x512xbf16>
    %c72_194 = arith.constant 72 : index
    %c0_195 = arith.constant 0 : index
    %235 = vector.load %arg15[%c72_194, %c0_195] : memref<216x512xbf16, #tpu.memory_space<vmem>>, vector<8x512xbf16>
    tpu.vector_store %arg15[%c72_194, %c0_195], %234 {strides = array<i32>} : memref<216x512xbf16, #tpu.memory_space<vmem>>, vector<8x512xbf16>,
    %c0_196 = arith.constant 0 : index
    %c65_197 = arith.constant 65 : index
    %236 = vector.load %arg14[%c0_196, %c65_197] : memref<8x658xbf16, #tpu.memory_space<vmem>>, vector<8x512xbf16>
    %c10_198 = arith.constant 10 : index
    %c0_199 = arith.constant 0 : index
    %237 = vector.load %arg2[%c10_198, %c0_199] : memref<27x512xbf16, #tpu.memory_space<vmem>>, vector<1x512xbf16>
    %238 = vector.broadcast %237 : vector<1x512xbf16> to vector<8x512xbf16>
    %239 = arith.mulf %236, %238 : vector<8x512xbf16>
    %c80_200 = arith.constant 80 : index
    %c0_201 = arith.constant 0 : index
    %240 = vector.load %arg15[%c80_200, %c0_201] : memref<216x512xbf16, #tpu.memory_space<vmem>>, vector<8x512xbf16>
    tpu.vector_store %arg15[%c80_200, %c0_201], %239 {strides = array<i32>} : memref<216x512xbf16, #tpu.memory_space<vmem>>, vector<8x512xbf16>,
    %c0_202 = arith.constant 0 : index
    %c66_203 = arith.constant 66 : index
    %241 = vector.load %arg14[%c0_202, %c66_203] : memref<8x658xbf16, #tpu.memory_space<vmem>>, vector<8x512xbf16>
    %c11_204 = arith.constant 11 : index
    %c0_205 = arith.constant 0 : index
    %242 = vector.load %arg2[%c11_204, %c0_205] : memref<27x512xbf16, #tpu.memory_space<vmem>>, vector<1x512xbf16>
    %243 = vector.broadcast %242 : vector<1x512xbf16> to vector<8x512xbf16>
    %244 = arith.mulf %241, %243 : vector<8x512xbf16>
    %c88_206 = arith.constant 88 : index
    %c0_207 = arith.constant 0 : index
    %245 = vector.load %arg15[%c88_206, %c0_207] : memref<216x512xbf16, #tpu.memory_space<vmem>>, vector<8x512xbf16>
    tpu.vector_store %arg15[%c88_206, %c0_207], %244 {strides = array<i32>} : memref<216x512xbf16, #tpu.memory_space<vmem>>, vector<8x512xbf16>,
    %c0_208 = arith.constant 0 : index
    %c72_209 = arith.constant 72 : index
    %246 = vector.load %arg14[%c0_208, %c72_209] : memref<8x658xbf16, #tpu.memory_space<vmem>>, vector<8x512xbf16>
    %c12_210 = arith.constant 12 : index
    %c0_211 = arith.constant 0 : index
    %247 = vector.load %arg2[%c12_210, %c0_211] : memref<27x512xbf16, #tpu.memory_space<vmem>>, vector<1x512xbf16>
    %248 = vector.broadcast %247 : vector<1x512xbf16> to vector<8x512xbf16>
    %249 = arith.mulf %246, %248 : vector<8x512xbf16>
    %c96_212 = arith.constant 96 : index
    %c0_213 = arith.constant 0 : index
    %250 = vector.load %arg15[%c96_212, %c0_213] : memref<216x512xbf16, #tpu.memory_space<vmem>>, vector<8x512xbf16>
    tpu.vector_store %arg15[%c96_212, %c0_213], %249 {strides = array<i32>} : memref<216x512xbf16, #tpu.memory_space<vmem>>, vector<8x512xbf16>,
    %c0_214 = arith.constant 0 : index
    %c73_215 = arith.constant 73 : index
    %251 = vector.load %arg14[%c0_214, %c73_215] : memref<8x658xbf16, #tpu.memory_space<vmem>>, vector<8x512xbf16>
    %c13_216 = arith.constant 13 : index
    %c0_217 = arith.constant 0 : index
    %252 = vector.load %arg2[%c13_216, %c0_217] : memref<27x512xbf16, #tpu.memory_space<vmem>>, vector<1x512xbf16>
    %253 = vector.broadcast %252 : vector<1x512xbf16> to vector<8x512xbf16>
    %254 = arith.mulf %251, %253 : vector<8x512xbf16>
    %c104_218 = arith.constant 104 : index
    %c0_219 = arith.constant 0 : index
    %255 = vector.load %arg15[%c104_218, %c0_219] : memref<216x512xbf16, #tpu.memory_space<vmem>>, vector<8x512xbf16>
    tpu.vector_store %arg15[%c104_218, %c0_219], %254 {strides = array<i32>} : memref<216x512xbf16, #tpu.memory_space<vmem>>, vector<8x512xbf16>,
    %c0_220 = arith.constant 0 : index
    %c74_221 = arith.constant 74 : index
    %256 = vector.load %arg14[%c0_220, %c74_221] : memref<8x658xbf16, #tpu.memory_space<vmem>>, vector<8x512xbf16>
    %c14_222 = arith.constant 14 : index
    %c0_223 = arith.constant 0 : index
    %257 = vector.load %arg2[%c14_222, %c0_223] : memref<27x512xbf16, #tpu.memory_space<vmem>>, vector<1x512xbf16>
    %258 = vector.broadcast %257 : vector<1x512xbf16> to vector<8x512xbf16>
    %259 = arith.mulf %256, %258 : vector<8x512xbf16>
    %c112 = arith.constant 112 : index
    %c0_224 = arith.constant 0 : index
    %260 = vector.load %arg15[%c112, %c0_224] : memref<216x512xbf16, #tpu.memory_space<vmem>>, vector<8x512xbf16>
    tpu.vector_store %arg15[%c112, %c0_224], %259 {strides = array<i32>} : memref<216x512xbf16, #tpu.memory_space<vmem>>, vector<8x512xbf16>,
    %c0_225 = arith.constant 0 : index
    %c80_226 = arith.constant 80 : index
    %261 = vector.load %arg14[%c0_225, %c80_226] : memref<8x658xbf16, #tpu.memory_space<vmem>>, vector<8x512xbf16>
    %c15_227 = arith.constant 15 : index
    %c0_228 = arith.constant 0 : index
    %262 = vector.load %arg2[%c15_227, %c0_228] : memref<27x512xbf16, #tpu.memory_space<vmem>>, vector<1x512xbf16>
    %263 = vector.broadcast %262 : vector<1x512xbf16> to vector<8x512xbf16>
    %264 = arith.mulf %261, %263 : vector<8x512xbf16>
    %c120 = arith.constant 120 : index
    %c0_229 = arith.constant 0 : index
    %265 = vector.load %arg15[%c120, %c0_229] : memref<216x512xbf16, #tpu.memory_space<vmem>>, vector<8x512xbf16>
    tpu.vector_store %arg15[%c120, %c0_229], %264 {strides = array<i32>} : memref<216x512xbf16, #tpu.memory_space<vmem>>, vector<8x512xbf16>,
    %c0_230 = arith.constant 0 : index
    %c81_231 = arith.constant 81 : index
    %266 = vector.load %arg14[%c0_230, %c81_231] : memref<8x658xbf16, #tpu.memory_space<vmem>>, vector<8x512xbf16>
    %c16_232 = arith.constant 16 : index
    %c0_233 = arith.constant 0 : index
    %267 = vector.load %arg2[%c16_232, %c0_233] : memref<27x512xbf16, #tpu.memory_space<vmem>>, vector<1x512xbf16>
    %268 = vector.broadcast %267 : vector<1x512xbf16> to vector<8x512xbf16>
    %269 = arith.mulf %266, %268 : vector<8x512xbf16>
    %c128_234 = arith.constant 128 : index
    %c0_235 = arith.constant 0 : index
    %270 = vector.load %arg15[%c128_234, %c0_235] : memref<216x512xbf16, #tpu.memory_space<vmem>>, vector<8x512xbf16>
    tpu.vector_store %arg15[%c128_234, %c0_235], %269 {strides = array<i32>} : memref<216x512xbf16, #tpu.memory_space<vmem>>, vector<8x512xbf16>,
    %c0_236 = arith.constant 0 : index
    %c82_237 = arith.constant 82 : index
    %271 = vector.load %arg14[%c0_236, %c82_237] : memref<8x658xbf16, #tpu.memory_space<vmem>>, vector<8x512xbf16>
    %c17_238 = arith.constant 17 : index
    %c0_239 = arith.constant 0 : index
    %272 = vector.load %arg2[%c17_238, %c0_239] : memref<27x512xbf16, #tpu.memory_space<vmem>>, vector<1x512xbf16>
    %273 = vector.broadcast %272 : vector<1x512xbf16> to vector<8x512xbf16>
    %274 = arith.mulf %271, %273 : vector<8x512xbf16>
    %c136_240 = arith.constant 136 : index
    %c0_241 = arith.constant 0 : index
    %275 = vector.load %arg15[%c136_240, %c0_241] : memref<216x512xbf16, #tpu.memory_space<vmem>>, vector<8x512xbf16>
    tpu.vector_store %arg15[%c136_240, %c0_241], %274 {strides = array<i32>} : memref<216x512xbf16, #tpu.memory_space<vmem>>, vector<8x512xbf16>,
    %c0_242 = arith.constant 0 : index
    %c128_243 = arith.constant 128 : index
    %276 = vector.load %arg14[%c0_242, %c128_243] : memref<8x658xbf16, #tpu.memory_space<vmem>>, vector<8x512xbf16>
    %c18_244 = arith.constant 18 : index
    %c0_245 = arith.constant 0 : index
    %277 = vector.load %arg2[%c18_244, %c0_245] : memref<27x512xbf16, #tpu.memory_space<vmem>>, vector<1x512xbf16>
    %278 = vector.broadcast %277 : vector<1x512xbf16> to vector<8x512xbf16>
    %279 = arith.mulf %276, %278 : vector<8x512xbf16>
    %c144_246 = arith.constant 144 : index
    %c0_247 = arith.constant 0 : index
    %280 = vector.load %arg15[%c144_246, %c0_247] : memref<216x512xbf16, #tpu.memory_space<vmem>>, vector<8x512xbf16>
    tpu.vector_store %arg15[%c144_246, %c0_247], %279 {strides = array<i32>} : memref<216x512xbf16, #tpu.memory_space<vmem>>, vector<8x512xbf16>,
    %c0_248 = arith.constant 0 : index
    %c129_249 = arith.constant 129 : index
    %281 = vector.load %arg14[%c0_248, %c129_249] : memref<8x658xbf16, #tpu.memory_space<vmem>>, vector<8x512xbf16>
    %c19_250 = arith.constant 19 : index
    %c0_251 = arith.constant 0 : index
    %282 = vector.load %arg2[%c19_250, %c0_251] : memref<27x512xbf16, #tpu.memory_space<vmem>>, vector<1x512xbf16>
    %283 = vector.broadcast %282 : vector<1x512xbf16> to vector<8x512xbf16>
    %284 = arith.mulf %281, %283 : vector<8x512xbf16>
    %c152 = arith.constant 152 : index
    %c0_252 = arith.constant 0 : index
    %285 = vector.load %arg15[%c152, %c0_252] : memref<216x512xbf16, #tpu.memory_space<vmem>>, vector<8x512xbf16>
    tpu.vector_store %arg15[%c152, %c0_252], %284 {strides = array<i32>} : memref<216x512xbf16, #tpu.memory_space<vmem>>, vector<8x512xbf16>,
    %c0_253 = arith.constant 0 : index
    %c130_254 = arith.constant 130 : index
    %286 = vector.load %arg14[%c0_253, %c130_254] : memref<8x658xbf16, #tpu.memory_space<vmem>>, vector<8x512xbf16>
    %c20_255 = arith.constant 20 : index
    %c0_256 = arith.constant 0 : index
    %287 = vector.load %arg2[%c20_255, %c0_256] : memref<27x512xbf16, #tpu.memory_space<vmem>>, vector<1x512xbf16>
    %288 = vector.broadcast %287 : vector<1x512xbf16> to vector<8x512xbf16>
    %289 = arith.mulf %286, %288 : vector<8x512xbf16>
    %c160 = arith.constant 160 : index
    %c0_257 = arith.constant 0 : index
    %290 = vector.load %arg15[%c160, %c0_257] : memref<216x512xbf16, #tpu.memory_space<vmem>>, vector<8x512xbf16>
    tpu.vector_store %arg15[%c160, %c0_257], %289 {strides = array<i32>} : memref<216x512xbf16, #tpu.memory_space<vmem>>, vector<8x512xbf16>,
    %c0_258 = arith.constant 0 : index
    %c136_259 = arith.constant 136 : index
    %291 = vector.load %arg14[%c0_258, %c136_259] : memref<8x658xbf16, #tpu.memory_space<vmem>>, vector<8x512xbf16>
    %c21_260 = arith.constant 21 : index
    %c0_261 = arith.constant 0 : index
    %292 = vector.load %arg2[%c21_260, %c0_261] : memref<27x512xbf16, #tpu.memory_space<vmem>>, vector<1x512xbf16>
    %293 = vector.broadcast %292 : vector<1x512xbf16> to vector<8x512xbf16>
    %294 = arith.mulf %291, %293 : vector<8x512xbf16>
    %c168 = arith.constant 168 : index
    %c0_262 = arith.constant 0 : index
    %295 = vector.load %arg15[%c168, %c0_262] : memref<216x512xbf16, #tpu.memory_space<vmem>>, vector<8x512xbf16>
    tpu.vector_store %arg15[%c168, %c0_262], %294 {strides = array<i32>} : memref<216x512xbf16, #tpu.memory_space<vmem>>, vector<8x512xbf16>,
    %c0_263 = arith.constant 0 : index
    %c137_264 = arith.constant 137 : index
    %296 = vector.load %arg14[%c0_263, %c137_264] : memref<8x658xbf16, #tpu.memory_space<vmem>>, vector<8x512xbf16>
    %c22_265 = arith.constant 22 : index
    %c0_266 = arith.constant 0 : index
    %297 = vector.load %arg2[%c22_265, %c0_266] : memref<27x512xbf16, #tpu.memory_space<vmem>>, vector<1x512xbf16>
    %298 = vector.broadcast %297 : vector<1x512xbf16> to vector<8x512xbf16>
    %299 = arith.mulf %296, %298 : vector<8x512xbf16>
    %c176 = arith.constant 176 : index
    %c0_267 = arith.constant 0 : index
    %300 = vector.load %arg15[%c176, %c0_267] : memref<216x512xbf16, #tpu.memory_space<vmem>>, vector<8x512xbf16>
    tpu.vector_store %arg15[%c176, %c0_267], %299 {strides = array<i32>} : memref<216x512xbf16, #tpu.memory_space<vmem>>, vector<8x512xbf16>,
    %c0_268 = arith.constant 0 : index
    %c138_269 = arith.constant 138 : index
    %301 = vector.load %arg14[%c0_268, %c138_269] : memref<8x658xbf16, #tpu.memory_space<vmem>>, vector<8x512xbf16>
    %c23_270 = arith.constant 23 : index
    %c0_271 = arith.constant 0 : index
    %302 = vector.load %arg2[%c23_270, %c0_271] : memref<27x512xbf16, #tpu.memory_space<vmem>>, vector<1x512xbf16>
    %303 = vector.broadcast %302 : vector<1x512xbf16> to vector<8x512xbf16>
    %304 = arith.mulf %301, %303 : vector<8x512xbf16>
    %c184 = arith.constant 184 : index
    %c0_272 = arith.constant 0 : index
    %305 = vector.load %arg15[%c184, %c0_272] : memref<216x512xbf16, #tpu.memory_space<vmem>>, vector<8x512xbf16>
    tpu.vector_store %arg15[%c184, %c0_272], %304 {strides = array<i32>} : memref<216x512xbf16, #tpu.memory_space<vmem>>, vector<8x512xbf16>,
    %c0_273 = arith.constant 0 : index
    %c144_274 = arith.constant 144 : index
    %306 = vector.load %arg14[%c0_273, %c144_274] : memref<8x658xbf16, #tpu.memory_space<vmem>>, vector<8x512xbf16>
    %c24_275 = arith.constant 24 : index
    %c0_276 = arith.constant 0 : index
    %307 = vector.load %arg2[%c24_275, %c0_276] : memref<27x512xbf16, #tpu.memory_space<vmem>>, vector<1x512xbf16>
    %308 = vector.broadcast %307 : vector<1x512xbf16> to vector<8x512xbf16>
    %309 = arith.mulf %306, %308 : vector<8x512xbf16>
    %c192 = arith.constant 192 : index
    %c0_277 = arith.constant 0 : index
    %310 = vector.load %arg15[%c192, %c0_277] : memref<216x512xbf16, #tpu.memory_space<vmem>>, vector<8x512xbf16>
    tpu.vector_store %arg15[%c192, %c0_277], %309 {strides = array<i32>} : memref<216x512xbf16, #tpu.memory_space<vmem>>, vector<8x512xbf16>,
    %c0_278 = arith.constant 0 : index
    %c145_279 = arith.constant 145 : index
    %311 = vector.load %arg14[%c0_278, %c145_279] : memref<8x658xbf16, #tpu.memory_space<vmem>>, vector<8x512xbf16>
    %c25_280 = arith.constant 25 : index
    %c0_281 = arith.constant 0 : index
    %312 = vector.load %arg2[%c25_280, %c0_281] : memref<27x512xbf16, #tpu.memory_space<vmem>>, vector<1x512xbf16>
    %313 = vector.broadcast %312 : vector<1x512xbf16> to vector<8x512xbf16>
    %314 = arith.mulf %311, %313 : vector<8x512xbf16>
    %c200 = arith.constant 200 : index
    %c0_282 = arith.constant 0 : index
    %315 = vector.load %arg15[%c200, %c0_282] : memref<216x512xbf16, #tpu.memory_space<vmem>>, vector<8x512xbf16>
    tpu.vector_store %arg15[%c200, %c0_282], %314 {strides = array<i32>} : memref<216x512xbf16, #tpu.memory_space<vmem>>, vector<8x512xbf16>,
    %c0_283 = arith.constant 0 : index
    %c146_284 = arith.constant 146 : index
    %316 = vector.load %arg14[%c0_283, %c146_284] : memref<8x658xbf16, #tpu.memory_space<vmem>>, vector<8x512xbf16>
    %c26_285 = arith.constant 26 : index
    %c0_286 = arith.constant 0 : index
    %317 = vector.load %arg2[%c26_285, %c0_286] : memref<27x512xbf16, #tpu.memory_space<vmem>>, vector<1x512xbf16>
    %318 = vector.broadcast %317 : vector<1x512xbf16> to vector<8x512xbf16>
    %319 = arith.mulf %316, %318 : vector<8x512xbf16>
    %c208 = arith.constant 208 : index
    %c0_287 = arith.constant 0 : index
    %320 = vector.load %arg15[%c208, %c0_287] : memref<216x512xbf16, #tpu.memory_space<vmem>>, vector<8x512xbf16>
    tpu.vector_store %arg15[%c208, %c0_287], %319 {strides = array<i32>} : memref<216x512xbf16, #tpu.memory_space<vmem>>, vector<8x512xbf16>,
    %c0_288 = arith.constant 0 : index
    %c0_289 = arith.constant 0 : index
    %321 = vector.load %arg7[%c0_288, %c0_289] : memref<8x216xbf16, #tpu.memory_space<vmem>>, vector<8x216xbf16>
    %c0_290 = arith.constant 0 : index
    %c0_291 = arith.constant 0 : index
    %322 = vector.load %arg15[%c0_290, %c0_291] : memref<216x512xbf16, #tpu.memory_space<vmem>>, vector<216x512xbf16>
    %cst_292 = arith.constant dense<0.000000e+00> : vector<8x512xf32>
    %323 = tpu.matmul %321, %322, %cst_292 {dimension_numbers = #tpu.dot_dimension_numbers<[1], [0], [0], [1], [0, 0, 1, 1], [], []>} : vector<8x216xbf16>, vector<216x512xbf16>, vector<8x512xf32> -> vector<8x512xf32>
    %c0_293 = arith.constant 0 : index
    %c0_294 = arith.constant 0 : index
    %324 = vector.load %arg8[%c0_293, %c0_294] : memref<8x1xf32, #tpu.memory_space<vmem>>, vector<8x1xf32>
    %325 = vector.broadcast %324 : vector<8x1xf32> to vector<8x512xf32>
    %326 = arith.addf %323, %325 : vector<8x512xf32>
    %cst_295 = arith.constant dense<0.000000e+00> : vector<8xf32>
    %327 = vector.multi_reduction <add>, %326, %cst_295 [1] : vector<8x512xf32> to vector<8xf32>
    %328 = vector.shape_cast %327 : vector<8xf32> to vector<8x1xf32>
    %cst_296 = arith.constant 0.001953125 : f32
    %329 = vector.broadcast %cst_296 : f32 to vector<8x1xf32>
    %330 = arith.mulf %328, %329 : vector<8x1xf32>
    %331 = arith.mulf %326, %326 : vector<8x512xf32>
    %cst_297 = arith.constant dense<0.000000e+00> : vector<8xf32>
    %332 = vector.multi_reduction <add>, %331, %cst_297 [1] : vector<8x512xf32> to vector<8xf32>
    %333 = vector.shape_cast %332 : vector<8xf32> to vector<8x1xf32>
    %cst_298 = arith.constant 0.001953125 : f32
    %334 = vector.broadcast %cst_298 : f32 to vector<8x1xf32>
    %335 = arith.mulf %333, %334 : vector<8x1xf32>
    %336 = arith.mulf %330, %330 : vector<8x1xf32>
    %337 = arith.subf %335, %336 : vector<8x1xf32>
    %cst_299 = arith.constant 0.000000e+00 : f32
    %338 = vector.broadcast %cst_299 : f32 to vector<8x1xf32>
    %339 = arith.maximumf %337, %338 : vector<8x1xf32>
    %340 = vector.broadcast %330 : vector<8x1xf32> to vector<8x512xf32>
    %341 = arith.subf %326, %340 : vector<8x512xf32>
    %cst_300 = arith.constant 9.99999974E-6 : f32
    %342 = vector.broadcast %cst_300 : f32 to vector<8x1xf32>
    %343 = arith.addf %339, %342 : vector<8x1xf32>
    %344 = math.rsqrt %343 : vector<8x1xf32>
    %345 = vector.broadcast %344 : vector<8x1xf32> to vector<8x512xf32>
    %346 = arith.mulf %341, %345 : vector<8x512xf32>
    %c0_301 = arith.constant 0 : index
    %c0_302 = arith.constant 0 : index
    %347 = vector.load %arg9[%c0_301, %c0_302] : memref<8x1xf32, #tpu.memory_space<vmem>>, vector<8x1xf32>
    %348 = vector.broadcast %347 : vector<8x1xf32> to vector<8x512xf32>
    %349 = arith.mulf %346, %348 : vector<8x512xf32>
    %c0_303 = arith.constant 0 : index
    %c0_304 = arith.constant 0 : index
    %350 = vector.load %arg10[%c0_303, %c0_304] : memref<8x1xf32, #tpu.memory_space<vmem>>, vector<8x1xf32>
    %351 = vector.broadcast %350 : vector<8x1xf32> to vector<8x512xf32>
    %352 = arith.addf %349, %351 : vector<8x512xf32>
    %cst_305 = arith.constant 0.000000e+00 : f32
    %353 = vector.broadcast %cst_305 : f32 to vector<8x512xf32>
    %354 = arith.cmpf oge, %352, %353 : vector<8x512xf32>
    %cst_306 = arith.constant 0.00999999977 : f32
    %355 = vector.broadcast %cst_306 : f32 to vector<8x512xf32>
    %356 = arith.mulf %355, %352 : vector<8x512xf32>
    %357 = arith.select %354, %352, %356 : vector<8x512xi1>, vector<8x512xf32>
    %c0_307 = arith.constant 0 : index
    %c0_308 = arith.constant 0 : index
    %c0_309 = arith.constant 0 : index
    %358 = vector.load %arg11[%c0_307, %c0_308, %c0_309] : memref<1x8x512xf32, #tpu.memory_space<vmem>>, vector<1x8x512xf32>
    %359 = vector.shape_cast %358 : vector<1x8x512xf32> to vector<8x512xf32>
    %360 = vector.shape_cast %357 : vector<8x512xf32> to vector<1x8x512xf32>
    tpu.vector_store %arg11[%c0_307, %c0_308, %c0_309], %360 {strides = array<i32>} : memref<1x8x512xf32, #tpu.memory_space<vmem>>, vector<1x8x512xf32>,
    return
  }
  func.func @transform_0(%arg0: i32) -> (i32, i32, i32) {
    %c0_i32 = arith.constant 0 : i32
    %c0_i32_0 = arith.constant 0 : i32
    %c0_i32_1 = arith.constant 0 : i32
    return %arg0, %c0_i32, %c0_i32_0 : i32, i32, i32
  }
  func.func @transform_1(%arg0: i32) -> (i32, i32) {
    %c0_i32 = arith.constant 0 : i32
    %c0_i32_0 = arith.constant 0 : i32
    %c0_i32_1 = arith.constant 0 : i32
    return %c0_i32, %c0_i32_0 : i32, i32
  }
  func.func @transform_2(%arg0: i32) -> (i32, i32) {
    %c0_i32 = arith.constant 0 : i32
    %c0_i32_0 = arith.constant 0 : i32
    %c0_i32_1 = arith.constant 0 : i32
    return %c0_i32, %c0_i32_0 : i32, i32
  }
  func.func @transform_3(%arg0: i32) -> (i32, i32) {
    %c0_i32 = arith.constant 0 : i32
    %c0_i32_0 = arith.constant 0 : i32
    %c0_i32_1 = arith.constant 0 : i32
    return %c0_i32, %c0_i32_0 : i32, i32
  }
  func.func @transform_4(%arg0: i32) -> (i32, i32) {
    %c0_i32 = arith.constant 0 : i32
    %c0_i32_0 = arith.constant 0 : i32
    %c0_i32_1 = arith.constant 0 : i32
    return %c0_i32, %c0_i32_0 : i32, i32
  }
  func.func @transform_5(%arg0: i32) -> (i32, i32) {
    %c0_i32 = arith.constant 0 : i32
    %c0_i32_0 = arith.constant 0 : i32
    %c0_i32_1 = arith.constant 0 : i32
    return %c0_i32, %c0_i32_0 : i32, i32
  }
  func.func @transform_6(%arg0: i32) -> (i32, i32) {
    %c0_i32 = arith.constant 0 : i32
    %c0_i32_0 = arith.constant 0 : i32
    %c0_i32_1 = arith.constant 0 : i32
    return %c0_i32, %c0_i32_0 : i32, i32
  }
  func.func @transform_7(%arg0: i32) -> (i32, i32) {
    %c0_i32 = arith.constant 0 : i32
    %c0_i32_0 = arith.constant 0 : i32
    %c0_i32_1 = arith.constant 0 : i32
    return %c0_i32, %c0_i32_0 : i32, i32
  }
  func.func @transform_8(%arg0: i32) -> (i32, i32) {
    %c0_i32 = arith.constant 0 : i32
    %c0_i32_0 = arith.constant 0 : i32
    %c0_i32_1 = arith.constant 0 : i32
    return %c0_i32, %c0_i32_0 : i32, i32
  }
  func.func @transform_9(%arg0: i32) -> (i32, i32) {
    %c0_i32 = arith.constant 0 : i32
    %c0_i32_0 = arith.constant 0 : i32
    %c0_i32_1 = arith.constant 0 : i32
    return %c0_i32, %c0_i32_0 : i32, i32
  }
  func.func @transform_10(%arg0: i32) -> (i32, i32, i32) {
    %c0_i32 = arith.constant 0 : i32
    %c0_i32_0 = arith.constant 0 : i32
    %c0_i32_1 = arith.constant 0 : i32
    return %arg0, %c0_i32, %c0_i32_0 : i32, i32, i32
  }
}

</mosaic_0001>

<bundles_post_ra>
// kernel: tpu_custom_call.1
= control target key start
LH: loop header
LB: loop body
LE: loop exit
PB: predicated region body
PF: predicated region fallthrough
CT: control target
= control target key end

     0   :  { %s9796_s0 = inlined_call_operand.vmem [shape: f32[2,4,512], index: 0, kind: input, shape index: {}]   ;;  %s9797_s1 = inlined_call_operand.hbm [shape: bf16[27,512], index: 1, kind: input, shape index: {}]   ;;  %s9798_s2 = inlined_call_operand.vmem [shape: bf16[8,108], index: 2, kind: input, shape index: {}]   ;;  %s9799_s3 = inlined_call_operand.vmem [shape: f32[8,1], index: 3, kind: input, shape index: {}]   ;;  %s9800_s4 = inlined_call_operand.vmem [shape: f32[8,1], index: 4, kind: input, shape index: {}]   ;;  %s9801_s5 = inlined_call_operand.vmem [shape: f32[8,1], index: 5, kind: input, shape index: {}]   ;;  %s9802_s6 = inlined_call_operand.vmem [shape: bf16[8,216], index: 6, kind: input, shape index: {}]   ;;  %s9803_s7 = inlined_call_operand.vmem [shape: f32[8,1], index: 7, kind: input, shape index: {}]   ;;  %s9804_s8 = inlined_call_operand.vmem [shape: f32[8,1], index: 8, kind: input, shape index: {}]   ;;  %s9805_s9 = inlined_call_operand.vmem [shape: f32[8,1], index: 9, kind: input, shape index: {}]   ;;  %s9806_s10 = inlined_call_operand.hbm [shape: f32[2,8,512], index: 10, kind: output, shape index: {}]  }
   0x1   :  { %9937 = sst [smem:[#allocation24_spill]] %s9796_s0 }
   0x2   :  { %9938 = sst [smem:[#allocation25_spill]] %s9797_s1 }
   0x3   :  { %9939 = sst [smem:[#allocation26_spill]] %s9799_s3 }
   0x4   :  { %9940 = sst [smem:[#allocation27_spill]] %s9800_s4 }
   0x5   :  { %9941 = sst [smem:[#allocation28_spill]] %s9801_s5 }
   0x6   :  { %15 = vsyncpa [#allocation7], 0 }
   0x7   :  { %16 = vsyncpa [#allocation8], 0 }
   0x8   :  { %18 = vsyncpa [#allocation8 + $0x1], 0  ;;  %s7747_s13 = smov 0   ;;  %s7749_s14 = smov 0  }
   0x9   :  { %s7751_s15 = smov 0   ;;  %s7753_s16 = smov 0  }
   0xa LB: > { %9942 = sst [smem:[#allocation12_spill]] %s7639_s13  ;;  %s7768_s17 = sadd.s32 4294967295, %s7651_s16   ;;  %s7651_s16 = sphi %s7753_s16, %s10124_s16   ;;  %s7647_s15 = sphi %s7751_s15, %s10129_s15   ;;  %s7643_s14 = sphi %s7749_s14, %s10128_s14   ;;  %s7639_s13 = sphi %s7747_s13, %s10127_s13  }
   0xb   : > { %9943 = sst [smem:[#allocation13_spill]] %s7647_s15  ;;  %s6817_s18 = sadd.s32 4294967294, %s7651_s16  }
   0xc   : > { %s7772_s19 = sadd.s32 1, %s7651_s16   ;;  %s246_s20 = sadd.s32 1, %s7647_s15 }
   0xd   : > { %9944 = sst [smem:[#allocation14_spill]] %s7772_s19  ;;  %s243_s21 = ssub.s32 %s7651_s16, %s7772_s19 }
   0xe   : > { %p256_p0 = scmp.ne.s32.totalorder %s7647_s15, %s7643_s14  ;;  %p244_p1 = scmp.eq.s32.totalorder %s243_s21, 0 }
   0xf   : > { %p257_p2 = scmp.eq.s32.totalorder %s7768_s17, 1  ;;  %p262_p3 = scmp.ne.s32.totalorder %s7643_s14, %s7639_s13 }
  0x10   : > { %p263_p4 = scmp.eq.s32.totalorder %s6817_s18, 1  ;;  %p6818_p7 = scmp.ge.s32.totalorder %s7651_s16, 1 }
  0x11   : > { %s7783_s22 = scalar_select %p244_p1, %s7647_s15, %s246_s20  }
  0x12   : > { %p7785_p5 = por %p257_p2, %p256_p0  ;;  %p7789_p6 = por %p263_p4, %p262_p3 }
  0x13   : > { %9945 = sst [smem:[#allocation15_spill]] %s7783_s22  ;;  %p270_p8 = scmp.lt.s32.totalorder %s7651_s16, 3 }
  0x14   : > { %s9947_s24 = scalar_select %p7789_p6, 1, 0 }
  0x15   : > { %p7221_p9 = scmp.eq.s32.totalorder %s7768_s17, 0  ;;  %p7796_p10 = pnand %p6818_p7, %p270_p8 }
  0x16   : > { %9948 = sst [smem:[#allocation16_spill]] %s9947_s24  ;;  %s7653_s26 = smov [#allocation6]  }
  0x17   : > { %s282_s27 = sshll.u32 %s7653_s26, 4  ;;  %p7213_p11 = pneg %p7796_p10  ;;  %s283_s27 = int_to_ptr.vmem [resolvable:$true] %s282_s27 }
  0x18   : > { %s7572_s28 = scalar_lea.vmem %s283_s27, 1024  ;;  %p7580_p3 = scmp.lt.s32.totalorder %s283_s27, %s283_s27 }
  0x19   : > { %p7214_p12 = pnand %p7221_p9, %p7213_p11  ;;  %p7573_p0 = scmp.ne.s32.totalorder %s283_s27, %s7572_s28 }
  0x1a   : > { %p7581_p4 = scmp.lt.s32.totalorder %s7572_s28, %s7572_s28 }
  0x1b   : > { %p7563_p13 = pneg %p7214_p12 }
  0x1c   : > { %p7582_p6 = por %p7581_p4, %p7580_p3 }
  0x1d   : > { %p7575_p1 = pnand %p7573_p0, %p7563_p13 }
  0x1f   : > { %p7576_p2 = pneg %p7575_p1 }
  0x21   : > { %p7583_p7 = pnand %p7582_p6, %p7576_p2 }
  0x23   : > { %7586 = shalt.err (!%p7583_p7)
}
  0x24   : > { %s7654_s29 = smov 256   ;;  %s7655_s30 = smov 16  }
  0x25   : > { %s9950_s1 = sld [smem:[#allocation25_spill]] }
  0x27   : > { %330 = sbr.rel (%p7796_p10) target bundleno = 1655 (0x677), region = 60 }
  0x2b   : > { %7216 = dma.hbm_to_vmem [thread:$0]  (!%p7214_p12), %s9950_s1, 1024, %s283_s27, [#allocation7], %s7654_s29, %s7654_s29, %s7655_s30  }
  0x2c   : > { %7630 = dma.done.wait (%p7221_p9), [#allocation7], 1024  }
  0x2d   : > { %7632 = vsyncadd (%p7221_p9), [#allocation7], 4294966272  ;;  %p368_p8 = scmp.lt.s32.totalorder %s7768_s17, 1  ;;  %v401_v0 = vlaneseq  ;;  %v7656_v1 = vmov 1983009808   ;;  %s9951_s0 = sld [smem:[#allocation24_spill]] }
  0x2e   : > { %v399_v2 = vunpack.c.l.s4 %v7656_v1  ;;  %v3384_v10 = vld [vmem:[#allocation6 + $0x30] sm:$0x22]  ;;  %v3385_v15 = vld [vmem:[#allocation6 + $0x38] sm:$0x22]  ;;  %v3155_v18 = vld [vmem:[#allocation6 + $0x30] sm:$0x11] }
  0x2f   : > { %s369_s18 = scalar_select %p368_p8, %s7768_s17, 1  ;;  %v402_v3 = vshrl.u32 %v401_v0, 7  ;;  %v6936_v16 = vcombine.low %v3384_v10, %v3384_v10  ;;  %v6937_v17 = vcombine.high %v3384_v10, %v3384_v10  ;;  %v3156_v19 = vld [vmem:[#allocation6 + $0x38] sm:$0x11]  ;;  %v6938_v20 = vcombine.low %v3385_v15, %v3385_v15  ;;  %v1798_v36 = vld [vmem:[#allocation6 + $0x10] sm:$0x44] }
  0x30   : > { %v400_v4 = vunpack.c.0.s8 %v399_v2  ;;  %v6939_v21 = vcombine.high %v3385_v15, %v3385_v15  ;;  %v6928_v22 = vcombine.low %v3155_v18, %v3155_v18  ;;  %v6929_v23 = vcombine.high %v3155_v18, %v3155_v18  ;;  %v1799_v45 = vld [vmem:[#allocation6 + $0x18] sm:$0x44]  ;;  %v2697_v50 = vld [vmem:[#allocation6 + $0x20] sm:$0x44]  ;;  %s9811_s27 = smov 73   ;;  %s9813_s28 = smov 18  }
  0x31   : > { %s7203_s20 = sshll.u32 %s369_s18, 4  ;;  %v7818_v5 = vsub.s32 1, %v402_v3  ;;  %v7820_v6 = vsub.s32 0, %v402_v3  ;;  %v7824_v11 = vsub.s32 2, %v402_v3  ;;  %v7826_v12 = vsub.s32 3, %v402_v3  ;;  %s9831_s29 = smov 16  }
  0x32   : > { %v7822_v9 = vsub.s32 %v400_v4, %v402_v3  ;;  %v3397_v26 = vpack.i.b16 %v6936_v16, %v6936_v16  ;;  %v3404_v27 = vpack.i.b16 %v6937_v17, %v6937_v17  ;;  %v3411_v28 = vpack.i.b16 %v6938_v20, %v6938_v20  ;;  %v2698_v62 = vld [vmem:[#allocation6 + $0x28] sm:$0x44]  ;;  %s9815_s30 = smov 72   ;;  %s9823_s11 = smov 2  }
  0x33   : > { %s372_s25 = scalar_lea.vmem %s9951_s0, %s7203_s20  ;;  %9952 = vst [vmem:[#allocation17_spill] sm:$0xff] %v7818_v5  ;;  %9953 = vst [vmem:[#allocation18_spill] sm:$0xff] %v7820_v6  ;;  %v3418_v29 = vpack.i.b16 %v6939_v21, %v6939_v21  ;;  %v6930_v30 = vcombine.low %v3156_v19, %v3156_v19  ;;  %v6931_v31 = vcombine.high %v3156_v19, %v3156_v19  ;;  %s9829_s12 = smov 17   ;;  %vm376_vm0 = vcmask 590848  }
  0x34   : > { %v374_v7 = vld [vmem:[%s372_s25] sm:$0xff]  ;;  %v375_v8 = vld [vmem:[%s372_s25 + $0x8] sm:$0xff]  ;;  %v3402_v34 = vrot.slane %v3397_v26, %v7818_v5  ;;  %v3409_v35 = vrot.slane %v3404_v27, %v7818_v5  ;;  %v3416_v37 = vrot.slane %v3411_v28, %v7818_v5  ;;  %v3168_v39 = vpack.i.b16 %v6928_v22, %v6928_v22  ;;  %s9827_s18 = smov 9   ;;  %s9821_s20 = smov 8  }
  0x35   : > { %v384_v13 = vcombine.high %v374_v7, %v374_v7  ;;  %v385_v14 = vcombine.high %v375_v8, %v375_v8  ;;  %v3423_v38 = vrot.slane %v3418_v29, %v7818_v5  ;;  %v3175_v40 = vpack.i.b16 %v6929_v23, %v6929_v23  ;;  %v3268_v22 = vld [vmem:[#allocation6 + $0x38] sm:$0x11]  ;;  %s9807_s21 = smov 81   ;;  %s9825_s26 = smov 10  }
  0x36   : > { %v3428_v42 = vcombine.low %v3402_v34, %v3409_v35  ;;  %v3182_v43 = vpack.i.b16 %v6930_v30, %v6930_v30  ;;  %v3189_v44 = vpack.i.b16 %v6931_v31, %v6931_v31  ;;  %v3173_v47 = vrot.slane %v3168_v39, %v7820_v6  ;;  %v2926_v31 = vld [vmem:[#allocation6 + $0x20] sm:$0x88]  ;;  %s9819_s25 = smov 1   ;;  %s9965_s3 = sld [smem:[#allocation26_spill]] }
  0x37   : > { %v6826_v24 = vpack.c.bf16 %v384_v13, %v374_v7  ;;  %v6827_v25 = vpack.c.bf16 %v385_v14, %v375_v8  ;;  %v3429_v46 = vcombine.low %v3416_v37, %v3423_v38  ;;  %v3180_v48 = vrot.slane %v3175_v40, %v7820_v6  ;;  %v3267_v13 = vld [vmem:[#allocation6 + $0x30] sm:$0x11]  ;;  %v2927_v40 = vld [vmem:[#allocation6 + $0x28] sm:$0x88]  ;;  %s9966_s4 = sld [smem:[#allocation27_spill]]  ;;  %s9968_s0 = smov 74  }
  0x38   : > { %v6878_v49 = vcombine.low %v1798_v36, %v1798_v36  ;;  %v3436_v51 = vrot.slane %v3428_v42, %v7822_v9  ;;  %v3187_v52 = vrot.slane %v3182_v43, %v7820_v6  ;;  %v3194_v53 = vrot.slane %v3189_v44, %v7820_v6  ;;  %s9967_s5 = sld [smem:[#allocation28_spill]]  ;;  %s9969_s1 = smov 80  }
  0x39   : > { %v404_v32 = vrot.slane %v6826_v24, %v7822_v9  ;;  %v411_v33 = vrot.slane %v6827_v25, %v7822_v9  ;;  %v6879_v54 = vcombine.high %v1798_v36, %v1798_v36  ;;  %v3443_v55 = vrot.slane %v3429_v46, %v7822_v9  ;;  %s9970_s15 = smov 72   ;;  %s9971_s19 = smov 73  }
  0x3a   : > { %v3199_v56 = vcombine.low %v3173_v47, %v3180_v48  ;;  %v6880_v57 = vcombine.low %v1799_v45, %v1799_v45  ;;  %v6881_v58 = vcombine.high %v1799_v45, %v1799_v45  ;;  %v3200_v59 = vcombine.low %v3187_v52, %v3194_v53  ;;  %s9972_s22 = smov 65   ;;  %s9973_s24 = smov 66  }
  0x3b   : > { %v412_v41 = vcombine.low %v404_v32, %v411_v33  ;;  %v1811_v60 = vpack.i.b16 %v6878_v49, %v6878_v49  ;;  %v1818_v61 = vpack.i.b16 %v6879_v54, %v6879_v54  ;;  %v6912_v63 = vcombine.low %v2697_v50, %v2697_v50  ;;  %s9996_s13 = smov 81  }
  0x3c   : > { %v3444_v0 = vcombine.low %v3436_v51, %v3443_v55  ;;  %v3207_v1 = vrot.slane %v3199_v56, %v7822_v9  ;;  %v1825_v2 = vpack.i.b16 %v6880_v57, %v6880_v57  ;;  %v1832_v3 = vpack.i.b16 %v6881_v58, %v6881_v58  ;;  %v2809_v57 = vld [vmem:[#allocation6 + $0x20] sm:$0x44] }
  0x3d   : > { %413 = vrot.lane.b32.xlu0 %v412_v41, %s9811_s27  ;;  %v3214_v4 = vrot.slane %v3200_v59, %v7822_v9  ;;  %v1816_v7 = vrot.slane %v1811_v60, %v7824_v11  ;;  %v1823_v8 = vrot.slane %v1818_v61, %v7824_v11  ;;  %v6913_v10 = vcombine.high %v2697_v50, %v2697_v50 }
  0x3e   : > { %3445 = vrot.lane.b32.xlu1 %v3444_v0, %s9813_s28  ;;  %v1830_v14 = vrot.slane %v1825_v2, %v7824_v11  ;;  %v1837_v15 = vrot.slane %v1832_v3, %v7824_v11  ;;  %v6914_v16 = vcombine.low %v2698_v62, %v2698_v62  ;;  %v6915_v17 = vcombine.high %v2698_v62, %v2698_v62  ;;  %v2810_v2 = vld [vmem:[#allocation6 + $0x28] sm:$0x44] }
  0x3f   : > { %v3215_v18 = vcombine.low %v3207_v1, %v3214_v4  ;;  %v1842_v19 = vcombine.low %v1816_v7, %v1823_v8  ;;  %v2710_v20 = vpack.i.b16 %v6912_v63, %v6912_v63  ;;  %v2717_v21 = vpack.i.b16 %v6913_v10, %v6913_v10  ;;  %v2263_v10 = vld [vmem:[#allocation6 + $0x20] sm:$0x11] }
  0x40   : > { %v1843_v23 = vcombine.low %v1830_v14, %v1837_v15  ;;  %v2724_v24 = vpack.i.b16 %v6914_v16, %v6914_v16  ;;  %v2731_v25 = vpack.i.b16 %v6915_v17, %v6915_v17  ;;  %v6932_v26 = vcombine.low %v3267_v13, %v3267_v13 }
  0x41   : > { %3216 = vrot.lane.b32.xlu0 %v3215_v18, %s9831_s29  ;;  %v1850_v27 = vrot.slane %v1842_v19, %v7822_v9  ;;  %v2715_v28 = vrot.slane %v2710_v20, %v7824_v11  ;;  %v2722_v29 = vrot.slane %v2717_v21, %v7824_v11  ;;  %v6933_v30 = vcombine.high %v3267_v13, %v3267_v13 }
  0x42   : > { %v1857_v32 = vrot.slane %v1843_v23, %v7822_v9  ;;  %v2729_v33 = vrot.slane %v2724_v24, %v7824_v11  ;;  %v2736_v34 = vrot.slane %v2731_v25, %v7824_v11  ;;  %v6934_v35 = vcombine.low %v3268_v22, %v3268_v22  ;;  %v2264_v24 = vld [vmem:[#allocation6 + $0x28] sm:$0x11] }
  0x43   : > { %v2741_v36 = vcombine.low %v2715_v28, %v2722_v29  ;;  %v6935_v37 = vcombine.high %v3268_v22, %v3268_v22  ;;  %v3280_v38 = vshrl.u32 %v6932_v26, 16  ;;  %v3288_v39 = vshrl.u32 %v6933_v30, 16 }
  0x44   : > { %v1858_v41 = vcombine.low %v1850_v27, %v1857_v32  ;;  %v2742_v42 = vcombine.low %v2729_v33, %v2736_v34  ;;  %v3296_v43 = vshrl.u32 %v6934_v35, 16  ;;  %v6920_v44 = vcombine.low %v2926_v31, %v2926_v31 }
  0x45   : > { %v2749_v45 = vrot.slane %v2741_v36, %v7822_v9  ;;  %v3281_v46 = vpack.i.b16 %v3280_v38, %v3280_v38  ;;  %v3289_v47 = vpack.i.b16 %v3288_v39, %v3288_v39  ;;  %v3304_v48 = vshrl.u32 %v6935_v37, 16  ;;  %v3038_v38 = vld [vmem:[#allocation6 + $0x20] sm:$0x88] }
  0x46   : > { %1859 = vrot.lane.b32.xlu1 %v1858_v41, %s9815_s30  ;;  %v2756_v49 = vrot.slane %v2742_v42, %v7822_v9  ;;  %v3297_v50 = vpack.i.b16 %v3296_v43, %v3296_v43  ;;  %v6921_v51 = vcombine.high %v2926_v31, %v2926_v31  ;;  %v6922_v52 = vcombine.low %v2927_v40, %v2927_v40  ;;  %s9817_s30 = smov 65  }
  0x47   : > { %v3286_v53 = vrot.slane %v3281_v46, %v7820_v6  ;;  %v3294_v54 = vrot.slane %v3289_v47, %v7820_v6  ;;  %v3305_v55 = vpack.i.b16 %v3304_v48, %v3304_v48  ;;  %v6923_v56 = vcombine.high %v2927_v40, %v2927_v40  ;;  %v3039_v47 = vld [vmem:[#allocation6 + $0x28] sm:$0x88] }
  0x48   : > { %v2757_v58 = vcombine.low %v2749_v45, %v2756_v49  ;;  %v3302_v59 = vrot.slane %v3297_v50, %v7820_v6  ;;  %v2939_v60 = vpack.i.b16 %v6920_v44, %v6920_v44  ;;  %v2946_v61 = vpack.i.b16 %v6921_v51, %v6921_v51 }
  0x49   : > { %v3310_v62 = vrot.slane %v3305_v55, %v7820_v6  ;;  %v3315_v63 = vcombine.low %v3286_v53, %v3294_v54  ;;  %v2953_v0 = vpack.i.b16 %v6922_v52, %v6922_v52  ;;  %v2960_v1 = vpack.i.b16 %v6923_v56, %v6923_v56  ;;  %v2580_v56 = vld [vmem:[#allocation6 + $0x20] sm:$0x22] }
  0x4a   : > { %2758 = vrot.lane.b32.xlu0 %v2757_v58, %s9823_s11  ;;  %v2944_v3 = vrot.slane %v2939_v60, %v7826_v12  ;;  %v2951_v4 = vrot.slane %v2946_v61, %v7826_v12  ;;  %v6916_v7 = vcombine.low %v2809_v57, %v2809_v57  ;;  %v6917_v8 = vcombine.high %v2809_v57, %v2809_v57 }
  0x4b   : > { %v3316_v13 = vcombine.low %v3302_v59, %v3310_v62  ;;  %v3323_v14 = vrot.slane %v3315_v63, %v7822_v9  ;;  %v2958_v15 = vrot.slane %v2953_v0, %v7826_v12  ;;  %v2965_v16 = vrot.slane %v2960_v1, %v7826_v12 }
  0x4c   : > { %v2970_v17 = vcombine.low %v2944_v3, %v2951_v4  ;;  %v6918_v18 = vcombine.low %v2810_v2, %v2810_v2  ;;  %v6919_v19 = vcombine.high %v2810_v2, %v2810_v2  ;;  %v2822_v20 = vshrl.u32 %v6916_v7, 16  ;;  %v2581_v4 = vld [vmem:[#allocation6 + $0x28] sm:$0x22] }
  0x4d   : > { %v3330_v21 = vrot.slane %v3316_v13, %v7822_v9  ;;  %v2971_v22 = vcombine.low %v2958_v15, %v2965_v16  ;;  %v2830_v23 = vshrl.u32 %v6917_v8, 16  ;;  %v6894_v25 = vcombine.low %v2263_v10, %v2263_v10 }
  0x4e   : > { %v2978_v26 = vrot.slane %v2970_v17, %v7822_v9  ;;  %v2823_v27 = vpack.i.b16 %v2822_v20, %v2822_v20  ;;  %v2838_v28 = vshrl.u32 %v6918_v18, 16  ;;  %v2846_v29 = vshrl.u32 %v6919_v19, 16 }
  0x4f   : > { %v3331_v30 = vcombine.low %v3323_v14, %v3330_v21  ;;  %v2985_v31 = vrot.slane %v2971_v22, %v7822_v9  ;;  %v2831_v32 = vpack.i.b16 %v2830_v23, %v2830_v23  ;;  %v6895_v33 = vcombine.high %v2263_v10, %v2263_v10  ;;  %v2377_v23 = vld [vmem:[#allocation6 + $0x20] sm:$0x11] }
  0x50   : > { %v2828_v34 = vrot.slane %v2823_v27, %v7824_v11  ;;  %v2839_v35 = vpack.i.b16 %v2838_v28, %v2838_v28  ;;  %v2847_v36 = vpack.i.b16 %v2846_v29, %v2846_v29  ;;  %v6896_v37 = vcombine.low %v2264_v24, %v2264_v24 }
  0x51   : > { %3332 = vrot.lane.b32.xlu1 %v3331_v30, %s9829_s12  ;;  %v2986_v39 = vcombine.low %v2978_v26, %v2985_v31  ;;  %v2836_v40 = vrot.slane %v2831_v32, %v7824_v11  ;;  %v6897_v41 = vcombine.high %v2264_v24, %v2264_v24  ;;  %v2276_v42 = vpack.i.b16 %v6894_v25, %v6894_v25  ;;  %v2378_v32 = vld [vmem:[#allocation6 + $0x28] sm:$0x11] }
  0x52   : > { %v2844_v43 = vrot.slane %v2839_v35, %v7824_v11  ;;  %v2852_v44 = vrot.slane %v2847_v36, %v7824_v11  ;;  %v2283_v45 = vpack.i.b16 %v6895_v33, %v6895_v33  ;;  %v2290_v46 = vpack.i.b16 %v6896_v37, %v6896_v37 }
  0x53   : > { %2987 = vrot.lane.b32.xlu0 %v2986_v39, %s9827_s18  ;;  %v2857_v48 = vcombine.low %v2828_v34, %v2836_v40  ;;  %v2281_v49 = vrot.slane %v2276_v42, %v7820_v6  ;;  %v2297_v50 = vpack.i.b16 %v6897_v41, %v6897_v41  ;;  %v6924_v51 = vcombine.low %v3038_v38, %v3038_v38 }
  0x54   : > { %v2858_v52 = vcombine.low %v2844_v43, %v2852_v44  ;;  %v2288_v53 = vrot.slane %v2283_v45, %v7820_v6  ;;  %v2295_v54 = vrot.slane %v2290_v46, %v7820_v6  ;;  %v6925_v55 = vcombine.high %v3038_v38, %v3038_v38  ;;  %v1912_v45 = vld [vmem:[#allocation6 + $0x10] sm:$0x44] }
  0x55   : > { %v2865_v57 = vrot.slane %v2857_v48, %v7822_v9  ;;  %v2302_v58 = vrot.slane %v2297_v50, %v7820_v6  ;;  %v6926_v59 = vcombine.low %v3039_v47, %v3039_v47  ;;  %v6927_v60 = vcombine.high %v3039_v47, %v3039_v47 }
  0x56   : > { %v2872_v61 = vrot.slane %v2858_v52, %v7822_v9  ;;  %v2307_v62 = vcombine.low %v2281_v49, %v2288_v53  ;;  %v3051_v63 = vshrl.u32 %v6924_v51, 16  ;;  %v3059_v0 = vshrl.u32 %v6925_v55, 16 }
  0x57   : > { %v2308_v1 = vcombine.low %v2295_v54, %v2302_v58  ;;  %v3067_v2 = vshrl.u32 %v6926_v59, 16  ;;  %v3075_v3 = vshrl.u32 %v6927_v60, 16  ;;  %v6908_v7 = vcombine.low %v2580_v56, %v2580_v56  ;;  %v1913_v54 = vld [vmem:[#allocation6 + $0x18] sm:$0x44] }
  0x58   : > { %v2873_v8 = vcombine.low %v2865_v57, %v2872_v61  ;;  %v2315_v10 = vrot.slane %v2307_v62, %v7822_v9  ;;  %v3052_v13 = vpack.i.b16 %v3051_v63, %v3051_v63  ;;  %v3060_v14 = vpack.i.b16 %v3059_v0, %v3059_v0 }
  0x59   : > { %v2322_v15 = vrot.slane %v2308_v1, %v7822_v9  ;;  %v3068_v16 = vpack.i.b16 %v3067_v2, %v3067_v2  ;;  %v3076_v17 = vpack.i.b16 %v3075_v3, %v3075_v3  ;;  %v6909_v18 = vcombine.high %v2580_v56, %v2580_v56  ;;  %v2030_v3 = vld [vmem:[#allocation6 + $0x10] sm:$0x88] }
  0x5a   : > { %2874 = vrot.lane.b32.xlu1 %v2873_v8, %s9821_s20  ;;  %v3057_v19 = vrot.slane %v3052_v13, %v7826_v12  ;;  %v3065_v20 = vrot.slane %v3060_v14, %v7826_v12  ;;  %v6910_v21 = vcombine.low %v2581_v4, %v2581_v4  ;;  %v6911_v22 = vcombine.high %v2581_v4, %v2581_v4 }
  0x5b   : > { %v2323_v24 = vcombine.low %v2315_v10, %v2322_v15  ;;  %v3073_v25 = vrot.slane %v3068_v16, %v7826_v12  ;;  %v3081_v26 = vrot.slane %v3076_v17, %v7826_v12  ;;  %v2593_v27 = vshrl.u32 %v6908_v7, 16  ;;  %v2031_v17 = vld [vmem:[#allocation6 + $0x18] sm:$0x88] }
  0x5c   : > { %v3086_v28 = vcombine.low %v3057_v19, %v3065_v20  ;;  %v2601_v29 = vshrl.u32 %v6909_v18, 16  ;;  %v2609_v30 = vshrl.u32 %v6910_v21, 16  ;;  %v2617_v31 = vshrl.u32 %v6911_v22, 16 }
  0x5d   : > { %2324 = vrot.lane.b32.xlu0 %v2323_v24, %s9807_s21  ;;  %v3087_v33 = vcombine.low %v3073_v25, %v3081_v26  ;;  %v2594_v34 = vpack.i.b16 %v2593_v27, %v2593_v27  ;;  %v6898_v35 = vcombine.low %v2377_v23, %v2377_v23  ;;  %v6899_v36 = vcombine.high %v2377_v23, %v2377_v23  ;;  %s9809_s21 = smov 82  }
  0x5e   : > { %v3094_v37 = vrot.slane %v3086_v28, %v7822_v9  ;;  %v2602_v38 = vpack.i.b16 %v2601_v29, %v2601_v29  ;;  %v2610_v39 = vpack.i.b16 %v2609_v30, %v2609_v30  ;;  %v2618_v40 = vpack.i.b16 %v2617_v31, %v2617_v31  ;;  %v2144_v30 = vld [vmem:[#allocation6 + $0x10] sm:$0x88] }
  0x5f   : > { %v3101_v41 = vrot.slane %v3087_v33, %v7822_v9  ;;  %v2599_v42 = vrot.slane %v2594_v34, %v7818_v5  ;;  %v6900_v43 = vcombine.low %v2378_v32, %v2378_v32  ;;  %v6901_v44 = vcombine.high %v2378_v32, %v2378_v32 }
  0x60   : > { %v2607_v46 = vrot.slane %v2602_v38, %v7818_v5  ;;  %v2615_v47 = vrot.slane %v2610_v39, %v7818_v5  ;;  %v2623_v48 = vrot.slane %v2618_v40, %v7818_v5  ;;  %v2390_v49 = vshrl.u32 %v6898_v35, 16  ;;  %v2145_v39 = vld [vmem:[#allocation6 + $0x18] sm:$0x88] }
  0x61   : > { %v3102_v50 = vcombine.low %v3094_v37, %v3101_v41  ;;  %v2398_v51 = vshrl.u32 %v6899_v36, 16  ;;  %v2406_v52 = vshrl.u32 %v6900_v43, 16  ;;  %v2414_v53 = vshrl.u32 %v6901_v44, 16 }
  0x62   : > { %v2628_v55 = vcombine.low %v2599_v42, %v2607_v46  ;;  %v2629_v56 = vcombine.low %v2615_v47, %v2623_v48  ;;  %v2391_v57 = vpack.i.b16 %v2390_v49, %v2390_v49  ;;  %v6882_v58 = vcombine.low %v1912_v45, %v1912_v45  ;;  %v1333_v48 = vld [vmem:[#allocation6 + $0x10] sm:$0x11] }
  0x63   : > { %3103 = vrot.lane.b32.xlu1 %v3102_v50, %s9825_s26  ;;  %v2399_v59 = vpack.i.b16 %v2398_v51, %v2398_v51  ;;  %v2407_v60 = vpack.i.b16 %v2406_v52, %v2406_v52  ;;  %v2415_v61 = vpack.i.b16 %v2414_v53, %v2414_v53  ;;  %v6883_v62 = vcombine.high %v1912_v45, %v1912_v45 }
  0x64   : > { %v2636_v63 = vrot.slane %v2628_v55, %v7822_v9  ;;  %v2643_v0 = vrot.slane %v2629_v56, %v7822_v9  ;;  %v2396_v1 = vrot.slane %v2391_v57, %v7820_v6  ;;  %v6884_v2 = vcombine.low %v1913_v54, %v1913_v54 }
  0x65   : > { %v2404_v4 = vrot.slane %v2399_v59, %v7820_v6  ;;  %v2412_v7 = vrot.slane %v2407_v60, %v7820_v6  ;;  %v2420_v8 = vrot.slane %v2415_v61, %v7820_v6  ;;  %v6885_v10 = vcombine.high %v1913_v54, %v1913_v54  ;;  %v1334_v60 = vld [vmem:[#allocation6 + $0x18] sm:$0x11] }
  0x66   : > { %v2644_v13 = vcombine.low %v2636_v63, %v2643_v0  ;;  %v1925_v14 = vshrl.u32 %v6882_v58, 16  ;;  %v1933_v15 = vshrl.u32 %v6883_v62, 16  ;;  %v1941_v16 = vshrl.u32 %v6884_v2, 16 }
  0x67   : > { %v2425_v18 = vcombine.low %v2396_v1, %v2404_v4  ;;  %v2426_v19 = vcombine.low %v2412_v7, %v2420_v8  ;;  %v1949_v20 = vshrl.u32 %v6885_v10, 16  ;;  %v6886_v21 = vcombine.low %v2030_v3, %v2030_v3 }
  0x68   : > { %2645 = vrot.lane.b32.xlu0 %v2644_v13, %s9819_s25  ;;  %v1926_v22 = vpack.i.b16 %v1925_v14, %v1925_v14  ;;  %v1934_v23 = vpack.i.b16 %v1933_v15, %v1933_v15  ;;  %v1942_v24 = vpack.i.b16 %v1941_v16, %v1941_v16  ;;  %v6887_v25 = vcombine.high %v2030_v3, %v2030_v3  ;;  %v1447_v15 = vld [vmem:[#allocation6 + $0x10] sm:$0x11] }
  0x69   : > { %v2433_v26 = vrot.slane %v2425_v18, %v7822_v9  ;;  %v2440_v27 = vrot.slane %v2426_v19, %v7822_v9  ;;  %v1950_v28 = vpack.i.b16 %v1949_v20, %v1949_v20  ;;  %v6888_v29 = vcombine.low %v2031_v17, %v2031_v17 }
  0x6a   : > { %v1931_v31 = vrot.slane %v1926_v22, %v7824_v11  ;;  %v1939_v32 = vrot.slane %v1934_v23, %v7824_v11  ;;  %v1947_v33 = vrot.slane %v1942_v24, %v7824_v11  ;;  %v6889_v34 = vcombine.high %v2031_v17, %v2031_v17  ;;  %v1448_v24 = vld [vmem:[#allocation6 + $0x18] sm:$0x11] }
  0x6b   : > { %v2441_v35 = vcombine.low %v2433_v26, %v2440_v27  ;;  %v1955_v36 = vrot.slane %v1950_v28, %v7824_v11  ;;  %v2043_v37 = vpack.i.b16 %v6886_v21, %v6886_v21  ;;  %v2050_v38 = vpack.i.b16 %v6887_v25, %v6887_v25 }
  0x6c   : > { %v1960_v40 = vcombine.low %v1931_v31, %v1939_v32  ;;  %v2057_v41 = vpack.i.b16 %v6888_v29, %v6888_v29  ;;  %v2064_v42 = vpack.i.b16 %v6889_v34, %v6889_v34  ;;  %v6890_v43 = vcombine.low %v2144_v30, %v2144_v30 }
  0x6d   : > { %2442 = vrot.lane.b32.xlu1 %v2441_v35, %s9809_s21  ;;  %v1961_v44 = vcombine.low %v1947_v33, %v1955_v36  ;;  %v2048_v45 = vrot.slane %v2043_v37, %v7826_v12  ;;  %v2055_v46 = vrot.slane %v2050_v38, %v7826_v12  ;;  %v6891_v47 = vcombine.high %v2144_v30, %v2144_v30  ;;  %s9837_s21 = smov 74   ;;  %v1565_v33 = vld [vmem:[#allocation6 + $0x10] sm:$0x22] }
  0x6e   : > { %v1968_v49 = vrot.slane %v1960_v40, %v7822_v9  ;;  %v2062_v50 = vrot.slane %v2057_v41, %v7826_v12  ;;  %v2069_v51 = vrot.slane %v2064_v42, %v7826_v12  ;;  %v6892_v52 = vcombine.low %v2145_v39, %v2145_v39 }
  0x6f   : > { %v1975_v53 = vrot.slane %v1961_v44, %v7822_v9  ;;  %v2074_v54 = vcombine.low %v2048_v45, %v2055_v46  ;;  %v6893_v55 = vcombine.high %v2145_v39, %v2145_v39  ;;  %v2157_v56 = vshrl.u32 %v6890_v43, 16  ;;  %v1566_v45 = vld [vmem:[#allocation6 + $0x18] sm:$0x22] }
  0x70   : > { %v2075_v57 = vcombine.low %v2062_v50, %v2069_v51  ;;  %v2165_v58 = vshrl.u32 %v6891_v47, 16  ;;  %v2173_v59 = vshrl.u32 %v6892_v52, 16  ;;  %v6862_v61 = vcombine.low %v1333_v48, %v1333_v48 }
  0x71   : > { %v1976_v62 = vcombine.low %v1968_v49, %v1975_v53  ;;  %v2082_v63 = vrot.slane %v2074_v54, %v7822_v9  ;;  %v2158_v0 = vpack.i.b16 %v2157_v56, %v2157_v56  ;;  %v2181_v1 = vshrl.u32 %v6893_v55, 16  ;;  %v1679_v55 = vld [vmem:[#allocation6 + $0x10] sm:$0x22] }
  0x72   : > { %v2089_v2 = vrot.slane %v2075_v57, %v7822_v9  ;;  %v2166_v3 = vpack.i.b16 %v2165_v58, %v2165_v58  ;;  %v2174_v4 = vpack.i.b16 %v2173_v59, %v2173_v59  ;;  %v6863_v7 = vcombine.high %v1333_v48, %v1333_v48 }
  0x73   : > { %1977 = vrot.lane.b32.xlu0 %v1976_v62, %s9811_s27  ;;  %v2163_v8 = vrot.slane %v2158_v0, %v7826_v12  ;;  %v2182_v10 = vpack.i.b16 %v2181_v1, %v2181_v1  ;;  %v6864_v13 = vcombine.low %v1334_v60, %v1334_v60  ;;  %v6865_v14 = vcombine.high %v1334_v60, %v1334_v60  ;;  %s9835_s27 = smov 80   ;;  %v1680_v0 = vld [vmem:[#allocation6 + $0x18] sm:$0x22] }
  0x74   : > { %v2090_v16 = vcombine.low %v2082_v63, %v2089_v2  ;;  %v2171_v17 = vrot.slane %v2166_v3, %v7826_v12  ;;  %v2179_v18 = vrot.slane %v2174_v4, %v7826_v12  ;;  %v1346_v19 = vpack.i.b16 %v6862_v61, %v6862_v61 }
  0x75   : > { %v2187_v20 = vrot.slane %v2182_v10, %v7826_v12  ;;  %v1353_v21 = vpack.i.b16 %v6863_v7, %v6863_v7  ;;  %v1360_v22 = vpack.i.b16 %v6864_v13, %v6864_v13  ;;  %v1367_v23 = vpack.i.b16 %v6865_v14, %v6865_v14  ;;  %v867_v14 = vld [vmem:[#allocation6] sm:$0x44] }
  0x76   : > { %2091 = vrot.lane.b32.xlu1 %v2090_v16, %s9837_s21  ;;  %v2192_v25 = vcombine.low %v2163_v8, %v2171_v17  ;;  %v1351_v26 = vrot.slane %v1346_v19, %v7820_v6  ;;  %v6866_v27 = vcombine.low %v1447_v15, %v1447_v15  ;;  %v6867_v28 = vcombine.high %v1447_v15, %v1447_v15  ;;  %s9862_s21 = smov 127  }
  0x77   : > { %v2193_v29 = vcombine.low %v2179_v18, %v2187_v20  ;;  %v1358_v30 = vrot.slane %v1353_v21, %v7820_v6  ;;  %v1365_v31 = vrot.slane %v1360_v22, %v7820_v6  ;;  %v1372_v32 = vrot.slane %v1367_v23, %v7820_v6 }
  0x78   : > { %v2200_v34 = vrot.slane %v2192_v25, %v7822_v9  ;;  %v6868_v35 = vcombine.low %v1448_v24, %v1448_v24  ;;  %v6869_v36 = vcombine.high %v1448_v24, %v1448_v24  ;;  %v1460_v37 = vshrl.u32 %v6866_v27, 16 }
  0x79   : > { %v2207_v38 = vrot.slane %v2193_v29, %v7822_v9  ;;  %v1377_v39 = vcombine.low %v1351_v26, %v1358_v30  ;;  %v1378_v40 = vcombine.low %v1365_v31, %v1372_v32  ;;  %v1468_v41 = vshrl.u32 %v6867_v28, 16  ;;  %v868_v26 = vld [vmem:[#allocation6 + $0x8] sm:$0x44] }
  0x7a   : > { %v1461_v42 = vpack.i.b16 %v1460_v37, %v1460_v37  ;;  %v1476_v43 = vshrl.u32 %v6868_v35, 16  ;;  %v1484_v44 = vshrl.u32 %v6869_v36, 16  ;;  %v6870_v46 = vcombine.low %v1565_v33, %v1565_v33 }
  0x7b   : > { %v2208_v47 = vcombine.low %v2200_v34, %v2207_v38  ;;  %v1385_v48 = vrot.slane %v1377_v39, %v7822_v9  ;;  %v1392_v49 = vrot.slane %v1378_v40, %v7822_v9  ;;  %v1469_v50 = vpack.i.b16 %v1468_v41, %v1468_v41  ;;  %v981_v40 = vld [vmem:[#allocation6] sm:$0x44] }
  0x7c   : > { %v1466_v51 = vrot.slane %v1461_v42, %v7820_v6  ;;  %v1477_v52 = vpack.i.b16 %v1476_v43, %v1476_v43  ;;  %v1485_v53 = vpack.i.b16 %v1484_v44, %v1484_v44  ;;  %v6871_v54 = vcombine.high %v1565_v33, %v1565_v33 }
  0x7d   : > { %2209 = vrot.lane.b32.xlu0 %v2208_v47, %s9835_s27  ;;  %v1393_v56 = vcombine.low %v1385_v48, %v1392_v49  ;;  %v1474_v57 = vrot.slane %v1469_v50, %v7820_v6  ;;  %v6872_v58 = vcombine.low %v1566_v45, %v1566_v45  ;;  %v6873_v59 = vcombine.high %v1566_v45, %v1566_v45  ;;  %v982_v49 = vld [vmem:[#allocation6 + $0x8] sm:$0x44]  ;;  %s9846_s27 = smov 56  }
  0x7e   : > { %v1482_v60 = vrot.slane %v1477_v52, %v7820_v6  ;;  %v1490_v61 = vrot.slane %v1485_v53, %v7820_v6  ;;  %v1578_v62 = vpack.i.b16 %v6870_v46, %v6870_v46  ;;  %v1585_v63 = vpack.i.b16 %v6871_v54, %v6871_v54 }
  0x7f   : > { %1394 = vrot.lane.b32.xlu1 %v1393_v56, %s9813_s28  ;;  %v1495_v1 = vcombine.low %v1466_v51, %v1474_v57  ;;  %v1592_v2 = vpack.i.b16 %v6872_v58, %v6872_v58  ;;  %v1599_v3 = vpack.i.b16 %v6873_v59, %v6873_v59  ;;  %v6874_v4 = vcombine.low %v1679_v55, %v1679_v55  ;;  %s9841_s28 = smov 64   ;;  %v1100_v58 = vld [vmem:[#allocation6] sm:$0x88] }
  0x80   : > { %v1496_v7 = vcombine.low %v1482_v60, %v1490_v61  ;;  %v1583_v8 = vrot.slane %v1578_v62, %v7818_v5  ;;  %v1590_v10 = vrot.slane %v1585_v63, %v7818_v5  ;;  %v6875_v13 = vcombine.high %v1679_v55, %v1679_v55 }
  0x81   : > { %v1503_v15 = vrot.slane %v1495_v1, %v7822_v9  ;;  %v1597_v16 = vrot.slane %v1592_v2, %v7818_v5  ;;  %v1604_v17 = vrot.slane %v1599_v3, %v7818_v5  ;;  %v6876_v18 = vcombine.low %v1680_v0, %v1680_v0 }
  0x82   : > { %v1510_v19 = vrot.slane %v1496_v7, %v7822_v9  ;;  %v1609_v20 = vcombine.low %v1583_v8, %v1590_v10  ;;  %v6877_v21 = vcombine.high %v1680_v0, %v1680_v0  ;;  %v1692_v22 = vshrl.u32 %v6874_v4, 16  ;;  %v1101_v8 = vld [vmem:[#allocation6 + $0x8] sm:$0x88] }
  0x83   : > { %v1610_v23 = vcombine.low %v1597_v16, %v1604_v17  ;;  %v1700_v24 = vshrl.u32 %v6875_v13, 16  ;;  %v1708_v25 = vshrl.u32 %v6876_v18, 16  ;;  %v6846_v27 = vcombine.low %v867_v14, %v867_v14 }
  0x84   : > { %v1511_v28 = vcombine.low %v1503_v15, %v1510_v19  ;;  %v1617_v29 = vrot.slane %v1609_v20, %v7822_v9  ;;  %v1693_v30 = vpack.i.b16 %v1692_v22, %v1692_v22  ;;  %v1716_v31 = vshrl.u32 %v6877_v21, 16  ;;  %v1214_v21 = vld [vmem:[#allocation6] sm:$0x88] }
  0x85   : > { %v1624_v32 = vrot.slane %v1610_v23, %v7822_v9  ;;  %v1701_v33 = vpack.i.b16 %v1700_v24, %v1700_v24  ;;  %v1709_v34 = vpack.i.b16 %v1708_v25, %v1708_v25  ;;  %v6847_v35 = vcombine.high %v867_v14, %v867_v14 }
  0x86   : > { %1512 = vrot.lane.b32.xlu0 %v1511_v28, %s9841_s28  ;;  %v1698_v36 = vrot.slane %v1693_v30, %v7818_v5  ;;  %v1717_v37 = vpack.i.b16 %v1716_v31, %v1716_v31  ;;  %v6848_v38 = vcombine.low %v868_v26, %v868_v26  ;;  %v6849_v39 = vcombine.high %v868_v26, %v868_v26  ;;  %v1215_v30 = vld [vmem:[#allocation6 + $0x8] sm:$0x88] }
  0x87   : > { %v1625_v41 = vcombine.low %v1617_v29, %v1624_v32  ;;  %v1706_v42 = vrot.slane %v1701_v33, %v7818_v5  ;;  %v1714_v43 = vrot.slane %v1709_v34, %v7818_v5  ;;  %v880_v44 = vpack.i.b16 %v6846_v27, %v6846_v27 }
  0x88   : > { %v1722_v45 = vrot.slane %v1717_v37, %v7818_v5  ;;  %v887_v46 = vpack.i.b16 %v6847_v35, %v6847_v35  ;;  %v894_v47 = vpack.i.b16 %v6848_v38, %v6848_v38  ;;  %v901_v48 = vpack.i.b16 %v6849_v39, %v6849_v39  ;;  %v514_v39 = vld [vmem:[#allocation6] sm:$0x11] }
  0x89   : > { %1626 = vrot.lane.b32.xlu1 %v1625_v41, %s9817_s30  ;;  %v1727_v50 = vcombine.low %v1698_v36, %v1706_v42  ;;  %v885_v51 = vrot.slane %v880_v44, %v7824_v11  ;;  %v6850_v52 = vcombine.low %v981_v40, %v981_v40  ;;  %v6851_v53 = vcombine.high %v981_v40, %v981_v40  ;;  %s9833_s30 = smov 66  }
  0x8a   : > { %v1728_v54 = vcombine.low %v1714_v43, %v1722_v45  ;;  %v892_v55 = vrot.slane %v887_v46, %v7824_v11  ;;  %v899_v56 = vrot.slane %v894_v47, %v7824_v11  ;;  %v906_v57 = vrot.slane %v901_v48, %v7824_v11 }
  0x8b   : > { %v1735_v59 = vrot.slane %v1727_v50, %v7822_v9  ;;  %v6852_v60 = vcombine.low %v982_v49, %v982_v49  ;;  %v6853_v61 = vcombine.high %v982_v49, %v982_v49  ;;  %v994_v62 = vshrl.u32 %v6850_v52, 16 }
  0x8c   : > { %v1742_v63 = vrot.slane %v1728_v54, %v7822_v9  ;;  %v911_v0 = vcombine.low %v885_v51, %v892_v55  ;;  %v912_v1 = vcombine.low %v899_v56, %v906_v57  ;;  %v1002_v2 = vshrl.u32 %v6851_v53, 16  ;;  %v515_v51 = vld [vmem:[#allocation6 + $0x8] sm:$0x11] }
  0x8d   : > { %v995_v3 = vpack.i.b16 %v994_v62, %v994_v62  ;;  %v1010_v4 = vshrl.u32 %v6852_v60, 16  ;;  %v1018_v7 = vshrl.u32 %v6853_v61, 16  ;;  %v6854_v10 = vcombine.low %v1100_v58, %v1100_v58 }
  0x8e   : > { %v1743_v13 = vcombine.low %v1735_v59, %v1742_v63  ;;  %v919_v14 = vrot.slane %v911_v0, %v7822_v9  ;;  %v926_v15 = vrot.slane %v912_v1, %v7822_v9  ;;  %v1003_v16 = vpack.i.b16 %v1002_v2, %v1002_v2  ;;  %v634_v1 = vld [vmem:[#allocation6] sm:$0x22] }
  0x8f   : > { %v1000_v17 = vrot.slane %v995_v3, %v7824_v11  ;;  %v1011_v18 = vpack.i.b16 %v1010_v4, %v1010_v4  ;;  %v1019_v19 = vpack.i.b16 %v1018_v7, %v1018_v7  ;;  %v6855_v20 = vcombine.high %v1100_v58, %v1100_v58 }
  0x90   : > { %1744 = vrot.lane.b32.xlu0 %v1743_v13, %s9833_s30  ;;  %v927_v22 = vcombine.low %v919_v14, %v926_v15  ;;  %v1008_v23 = vrot.slane %v1003_v16, %v7824_v11  ;;  %v6856_v24 = vcombine.low %v1101_v8, %v1101_v8  ;;  %v6857_v25 = vcombine.high %v1101_v8, %v1101_v8  ;;  %v635_v15 = vld [vmem:[#allocation6 + $0x8] sm:$0x22]  ;;  %s9876_s30 = smov 118  }
  0x91   : > { %v1016_v26 = vrot.slane %v1011_v18, %v7824_v11  ;;  %v1024_v27 = vrot.slane %v1019_v19, %v7824_v11  ;;  %v1113_v28 = vpack.i.b16 %v6854_v10, %v6854_v10  ;;  %v1120_v29 = vpack.i.b16 %v6855_v20, %v6855_v20 }
  0x92   : > { %928 = vrot.lane.b32.xlu1 %v927_v22, %s9827_s18  ;;  %v1029_v31 = vcombine.low %v1000_v17, %v1008_v23  ;;  %v1127_v32 = vpack.i.b16 %v6856_v24, %v6856_v24  ;;  %v1134_v33 = vpack.i.b16 %v6857_v25, %v6857_v25  ;;  %v6858_v34 = vcombine.low %v1214_v21, %v1214_v21  ;;  %s9874_s18 = smov 111  }
  0x93   : > { %v1030_v35 = vcombine.low %v1016_v26, %v1024_v27  ;;  %v1118_v36 = vrot.slane %v1113_v28, %v7826_v12  ;;  %v1125_v37 = vrot.slane %v1120_v29, %v7826_v12  ;;  %v6859_v38 = vcombine.high %v1214_v21, %v1214_v21  ;;  %v748_v28 = vld [vmem:[#allocation6] sm:$0x22] }
  0x94   : > { %v1037_v40 = vrot.slane %v1029_v31, %v7822_v9  ;;  %v1132_v41 = vrot.slane %v1127_v32, %v7826_v12  ;;  %v1139_v42 = vrot.slane %v1134_v33, %v7826_v12  ;;  %v6860_v43 = vcombine.low %v1215_v30, %v1215_v30 }
  0x95   : > { %v1044_v44 = vrot.slane %v1030_v35, %v7822_v9  ;;  %v1144_v45 = vcombine.low %v1118_v36, %v1125_v37  ;;  %v6861_v46 = vcombine.high %v1215_v30, %v1215_v30  ;;  %v1227_v47 = vshrl.u32 %v6858_v34, 16  ;;  %v749_v37 = vld [vmem:[#allocation6 + $0x8] sm:$0x22] }
  0x96   : > { %v1145_v48 = vcombine.low %v1132_v41, %v1139_v42  ;;  %v1235_v49 = vshrl.u32 %v6859_v38, 16  ;;  %v1243_v50 = vshrl.u32 %v6860_v43, 16  ;;  %v6834_v52 = vcombine.low %v514_v39, %v514_v39 }
  0x97   : > { %v1045_v53 = vcombine.low %v1037_v40, %v1044_v44  ;;  %v1152_v54 = vrot.slane %v1144_v45, %v7822_v9  ;;  %v1228_v55 = vpack.i.b16 %v1227_v47, %v1227_v47  ;;  %v1251_v56 = vshrl.u32 %v6861_v46, 16 }
  0x98   : > { %v1159_v57 = vrot.slane %v1145_v48, %v7822_v9  ;;  %v1236_v58 = vpack.i.b16 %v1235_v49, %v1235_v49  ;;  %v1244_v59 = vpack.i.b16 %v1243_v50, %v1243_v50  ;;  %v6835_v60 = vcombine.high %v514_v39, %v514_v39 }
  0x99   : > { %1046 = vrot.lane.b32.xlu0 %v1045_v53, %s9825_s26  ;;  %v1233_v61 = vrot.slane %v1228_v55, %v7826_v12  ;;  %v1252_v62 = vpack.i.b16 %v1251_v56, %v1251_v56  ;;  %v6836_v63 = vcombine.low %v515_v51, %v515_v51  ;;  %v6837_v0 = vcombine.high %v515_v51, %v515_v51  ;;  %s9864_s26 = smov 119  }
  0x9a   : > { %v1160_v2 = vcombine.low %v1152_v54, %v1159_v57  ;;  %v1241_v3 = vrot.slane %v1236_v58, %v7826_v12  ;;  %v1249_v4 = vrot.slane %v1244_v59, %v7826_v12  ;;  %v527_v7 = vshrl.u32 %v6834_v52, 16 }
  0x9b   : > { %v1257_v8 = vrot.slane %v1252_v62, %v7826_v12  ;;  %v535_v10 = vshrl.u32 %v6835_v60, 16  ;;  %v543_v13 = vshrl.u32 %v6836_v63, 16  ;;  %v551_v14 = vshrl.u32 %v6837_v0, 16 }
  0x9c   : > { %1161 = vrot.lane.b32.xlu1 %v1160_v2, %s9831_s29  ;;  %v1262_v16 = vcombine.low %v1233_v61, %v1241_v3  ;;  %v528_v17 = vpack.i.b16 %v527_v7, %v527_v7  ;;  %v6838_v18 = vcombine.low %v634_v1, %v634_v1  ;;  %v6839_v19 = vcombine.high %v634_v1, %v634_v1  ;;  %s9858_s29 = smov 47  }
  0x9d   : > { %v1263_v20 = vcombine.low %v1249_v4, %v1257_v8  ;;  %v536_v21 = vpack.i.b16 %v535_v10, %v535_v10  ;;  %v544_v22 = vpack.i.b16 %v543_v13, %v543_v13  ;;  %v552_v23 = vpack.i.b16 %v551_v14, %v551_v14 }
  0x9e   : > { %v1270_v24 = vrot.slane %v1262_v16, %v7822_v9  ;;  %v533_v25 = vrot.slane %v528_v17, %v7820_v6  ;;  %v6840_v26 = vcombine.low %v635_v15, %v635_v15  ;;  %v6841_v27 = vcombine.high %v635_v15, %v635_v15  ;;  %v2495_v16 = vld [vmem:[#allocation6 + $0x20] sm:$0x22] }
  0x9f   : > { %v1277_v29 = vrot.slane %v1263_v20, %v7822_v9  ;;  %v541_v30 = vrot.slane %v536_v21, %v7820_v6  ;;  %v549_v31 = vrot.slane %v544_v22, %v7820_v6  ;;  %v557_v32 = vrot.slane %v552_v23, %v7820_v6  ;;  %v429_v20 = vld [vmem:[#allocation6] sm:$0x11] }
  0xa0   : > { %v647_v33 = vpack.i.b16 %v6838_v18, %v6838_v18  ;;  %v654_v34 = vpack.i.b16 %v6839_v19, %v6839_v19  ;;  %v661_v35 = vpack.i.b16 %v6840_v26, %v6840_v26  ;;  %v668_v36 = vpack.i.b16 %v6841_v27, %v6841_v27  ;;  %v2496_v19 = vld [vmem:[#allocation6 + $0x28] sm:$0x22]  ;;  %v430_v27 = vld [vmem:[#allocation6 + $0x8] sm:$0x11] }
  0xa1   : > { %v1278_v38 = vcombine.low %v1270_v24, %v1277_v29  ;;  %v562_v39 = vcombine.low %v533_v25, %v541_v30  ;;  %v563_v40 = vcombine.low %v549_v31, %v557_v32  ;;  %v6842_v41 = vcombine.low %v748_v28, %v748_v28 }
  0xa2   : > { %v652_v42 = vrot.slane %v647_v33, %v7818_v5  ;;  %v659_v43 = vrot.slane %v654_v34, %v7818_v5  ;;  %v666_v44 = vrot.slane %v661_v35, %v7818_v5  ;;  %v673_v45 = vrot.slane %v668_v36, %v7818_v5 }
  0xa3   : > { %1279 = vrot.lane.b32.xlu0 %v1278_v38, %s9829_s12  ;;  %v570_v46 = vrot.slane %v562_v39, %v7822_v9  ;;  %v577_v47 = vrot.slane %v563_v40, %v7822_v9  ;;  %v6843_v48 = vcombine.high %v748_v28, %v748_v28  ;;  %v6844_v49 = vcombine.low %v749_v37, %v749_v37  ;;  %s9839_s12 = smov 120  }
  0xa4   : > { %v678_v50 = vcombine.low %v652_v42, %v659_v43  ;;  %v679_v51 = vcombine.low %v666_v44, %v673_v45  ;;  %v6845_v52 = vcombine.high %v749_v37, %v749_v37  ;;  %v761_v53 = vshrl.u32 %v6842_v41, 16 }
  0xa5   : > { %v578_v54 = vcombine.low %v570_v46, %v577_v47  ;;  %v769_v55 = vshrl.u32 %v6843_v48, 16  ;;  %v777_v56 = vshrl.u32 %v6844_v49, 16  ;;  %vm378_vm1 = vcmask 1041992  }
  0xa6   : > { %v686_v57 = vrot.slane %v678_v50, %v7822_v9  ;;  %v693_v58 = vrot.slane %v679_v51, %v7822_v9  ;;  %v762_v59 = vpack.i.b16 %v761_v53, %v761_v53  ;;  %v785_v60 = vshrl.u32 %v6845_v52, 16 }
  0xa7   : > { %579 = vrot.lane.b32.xlu1 %v578_v54, %s9819_s25  ;;  %v770_v61 = vpack.i.b16 %v769_v55, %v769_v55  ;;  %v778_v62 = vpack.i.b16 %v777_v56, %v777_v56  ;;  %v9883_v2 = vmov 0   ;;  %vm379_vm2 = vcmask 142338   ;;  %s9852_s25 = smov 112  }
  0xa8   : > { %v694_v63 = vcombine.low %v686_v57, %v693_v58  ;;  %v767_v0 = vrot.slane %v762_v59, %v7818_v5  ;;  %v786_v1 = vpack.i.b16 %v785_v60, %v785_v60  ;;  %377 = vst.msk [vmem:[#allocation2] sm:$0x3] %vm376_vm0, %v9883_v2  ;;  %3714 = vmatprep.mubr.bf16.mxu0 %v9883_v2  ;;  %vm380_vm3 = vmor %vm379_vm2, %vm378_vm1  ;;  %vm420_vm4 = vcmask 1043458  }
  0xa9   : > { %3755 = vmatprep.mubr.bf16.mxu1 %v9883_v2  ;;  %v775_v3 = vrot.slane %v770_v61, %v7818_v5  ;;  %v783_v4 = vrot.slane %v778_v62, %v7818_v5  ;;  %7294 = vset.pattern.permute.xlu1 %v9883_v2  ;;  %381 = vst.msk [vmem:[#allocation2 + $0x8] sm:$0xf] %vm380_vm3, %v9883_v2  ;;  %vm421_vm5 = vmor %vm420_vm4, %vm378_vm1  ;;  %vm422_vm6 = vcmask 1045508   ;;  %vm424_vm7 = vcmask 1047558  }
  0xaa   : > { %7295 = vset.pattern.permute.xlu0 %v9883_v2  ;;  %v791_v7 = vrot.slane %v786_v1, %v7818_v5  ;;  %vm9893_vm8 = vcmask 596992   ;;  %vm423_vm9 = vmor %vm422_vm6, %vm421_vm5  ;;  %v6902_v23 = vcombine.low %v2495_v16, %v2495_v16  ;;  %v6903_v24 = vcombine.high %v2495_v16, %v2495_v16 }
  0xab   : > { %695 = vrot.lane.b32.xlu0 %v694_v63, %s9823_s11  ;;  %v796_v8 = vcombine.low %v767_v0, %v775_v3  ;;  %vm425_vm10 = vmor %vm424_vm7, %vm423_vm9  ;;  %v6904_v25 = vcombine.low %v2496_v19, %v2496_v19  ;;  %v6905_v26 = vcombine.high %v2496_v19, %v2496_v19  ;;  %v6828_v28 = vcombine.low %v429_v20, %v429_v20  ;;  %s9856_s11 = smov 126  }
  0xac   : > { %v797_v13 = vcombine.low %v783_v4, %v791_v7  ;;  %v2508_v29 = vpack.i.b16 %v6902_v23, %v6902_v23  ;;  %v2515_v30 = vpack.i.b16 %v6903_v24, %v6903_v24  ;;  %v6829_v31 = vcombine.high %v429_v20, %v429_v20 }
  0xad   : > { %v804_v15 = vrot.slane %v796_v8, %v7822_v9  ;;  %v2522_v35 = vpack.i.b16 %v6904_v25, %v6904_v25  ;;  %v2529_v36 = vpack.i.b16 %v6905_v26, %v6905_v26  ;;  %v6830_v41 = vcombine.low %v430_v27, %v430_v27 }
  0xae   : > { %v811_v17 = vrot.slane %v797_v13, %v7822_v9  ;;  %v2513_v39 = vrot.slane %v2508_v29, %v7818_v5  ;;  %v2520_v40 = vrot.slane %v2515_v30, %v7818_v5  ;;  %v442_v44 = vpack.i.b16 %v6828_v28, %v6828_v28 }
  0xaf   : > { %v414_v10 = vpop.permute.xlu0 %413  ;;  %v2527_v42 = vrot.slane %v2522_v35, %v7818_v5  ;;  %v2534_v43 = vrot.slane %v2529_v36, %v7818_v5  ;;  %v6831_v47 = vcombine.high %v430_v27, %v430_v27  ;;  %v449_v48 = vpack.i.b16 %v6829_v31, %v6829_v31 }
  0xb0   : > { %v415_v14 = vrot.slane %v414_v10, 6  ;;  %v812_v21 = vcombine.low %v804_v15, %v811_v17  ;;  %v8016_v22 = vpop.permute.xlu1 %3445  ;;  %v3154_v33 = vld [vmem:[#allocation2 + $0xa] sm:$0x3]  ;;  %v2539_v46 = vcombine.low %v2513_v39, %v2520_v40  ;;  %v447_v51 = vrot.slane %v442_v44, %v7820_v6 }
  0xb1   : > { %v3447_v32 = vrot.slane %v8016_v22, 6  ;;  %v3383_v37 = vld [vmem:[#allocation2 + $0xa] sm:$0x3]  ;;  %v2540_v50 = vcombine.low %v2527_v42, %v2534_v43  ;;  %v454_v54 = vrot.slane %v449_v48, %v7820_v6  ;;  %v456_v55 = vpack.i.b16 %v6830_v41, %v6830_v41 }
  0xb2   : > { %v417_v18 = vsel %vm9893_vm8, %v415_v14, %v414_v10  ;;  %427 = vst.msk [vmem:[#allocation2 + $0x8] sm:$0x3] %vm376_vm0, %v415_v14  ;;  %813 = vrot.lane.b32.xlu1 %v812_v21, %s9821_s20  ;;  %v2547_v53 = vrot.slane %v2539_v46, %v7822_v9  ;;  %v463_v58 = vpack.i.b16 %v6831_v47, %v6831_v47  ;;  %v2696_v60 = vld [vmem:[#allocation2 + $0xa] sm:$0x3]  ;;  %s9866_s20 = smov 110   ;;  %vm9871_vm11 = vcmask 138240  }
  0xb3   : > { %426 = vst.msk [vmem:[#allocation2] sm:$0xff] %vm425_vm10, %v417_v18  ;;  %v8020_v34 = vpop.permute.xlu0 %3216  ;;  %v3452_v49 = vmul.bf16 %v3447_v32, %v3383_v37  ;;  %v2554_v56 = vrot.slane %v2540_v50, %v7822_v9  ;;  %v461_v57 = vrot.slane %v456_v55, %v7820_v6  ;;  %v473_v59 = vcombine.low %v447_v51, %v454_v54  ;;  %v3266_v20 = vld [vmem:[#allocation2 + $0xa] sm:$0x3] }
  0xb4   : > { %v3218_v38 = vrot.slane %v8020_v34, 6  ;;  %v468_v0 = vrot.slane %v463_v58, %v7820_v6  ;;  %v2925_v24 = vld [vmem:[#allocation2 + $0xa] sm:$0x3]  ;;  %vm9894_vm12 = vcmask 64512   ;;  %vm9896_vm13 = vcmask 80896  }
  0xb5   : > { %v3476_v62 = vrot.slane %v3452_v49, %v7822_v9  ;;  %v2555_v63 = vcombine.low %v2547_v53, %v2554_v56  ;;  %v481_v10 = vrot.slane %v473_v59, %v7822_v9  ;;  %v2808_v35 = vld [vmem:[#allocation2 + $0xa] sm:$0x3]  ;;  %vm9872_vm14 = vcmask 130048  }
  0xb6   : > { %v3223_v45 = vmul.bf16 %v3218_v38, %v3154_v33  ;;  %v474_v8 = vcombine.low %v461_v57, %v468_v0  ;;  %v3037_v48 = vld [vmem:[#allocation2 + $0xa] sm:$0x3]  ;;  %vm9890_vm15 = vcmask 662528   ;;  %vm9886_vm0 = vcmask 588800  }
  0xb7   : > { %v2579_v53 = vld [vmem:[#allocation2 + $0xa] sm:$0x3]  ;;  %vm9873_vm1 = vcmask 146432   ;;  %vm9895_vm2 = vcmask 15360   ;;  %vm9889_vm3 = vcmask 605184   ;;  %vm9897_vm4 = vcmask 72704  }
  0xb8   : > { %v3247_v52 = vrot.slane %v3223_v45, %v7822_v9  ;;  %v8044_v3 = vpop.permute.xlu1 %1859  ;;  %v488_v15 = vrot.slane %v474_v8, %v7822_v9  ;;  %vm9845_vm5 = vcmask 670720   ;;  %vm1515_vm6 = vcmask 523264  }
  0xb9   : > { %v2262_v42 = vld [vmem:[#allocation2 + $0x8] sm:$0x3]  ;;  %v1861_v50 = vrot.slane %v8044_v3, 6  ;;  %vm9868_vm7 = vcmask 7168   ;;  %vm9878_vm9 = vcmask 539648   ;;  %vm9887_vm10 = vcmask 654336  }
  0xba   : > { %3252 = vrot.lane.b32.xlu0 %v3247_v52, %s9852_s25  ;;  %v8042_v1 = vld [vmem:[#allocation2 + $0x2] sm:$0xff]  ;;  %v489_v17 = vcombine.low %v481_v10, %v488_v15 }
  0xbb   : > { %v2557_v7 = vmul.bf16 %v2555_v63, %v8042_v1  ;;  %v8054_v18 = vld [vmem:[#allocation2] sm:$0xff]  ;;  %v1797_v52 = vld [vmem:[#allocation2 + $0x8] sm:$0x3] }
  0xbc   : > { %v8038_v61 = vpop.permute.xlu0 %2758  ;;  %v491_v23 = vmul.bf16 %v489_v17, %v8054_v18  ;;  %v1867_v57 = vmul.bf16 %v1861_v50, %v1797_v52 }
  0xbd   : > { %v2760_v4 = vrot.slane %v8038_v61, 6  ;;  %6906 = vst.sshfl [vmem:[#allocation3 + $0x90] sm:$0xf pattern:$0x76325410] %v2557_v7  ;;  %v2559_v14 = vcombine.high %v2557_v7, %v2557_v7 }
  0xbe   : > { %3481 = vrot.lane.b32.xlu0 %v3476_v62, %s9866_s20  ;;  %6832 = vst.sshfl [vmem:[#allocation3] sm:$0xf pattern:$0x76325410] %v491_v23  ;;  %v493_v28 = vcombine.high %v491_v23, %v491_v23  ;;  %v1891_v63 = vrot.slane %v1867_v57, %v7822_v9 }
  0xbf   : > { %v2765_v13 = vmul.bf16 %v2760_v4, %v2696_v60  ;;  %6907 = vst.sshfl [vmem:[#allocation3 + $0x98] sm:$0xf pattern:$0x76325410] %v2559_v14 }
  0xc0   : > { %6833 = vst.sshfl [vmem:[#allocation3 + $0x8] sm:$0xf pattern:$0x76325410] %v493_v28 }
  0xc1   : > { %v2789_v16 = vrot.slane %v2765_v13, %v7822_v9 }
  0xc3   : > { %v3333_v19 = vpop.permute.xlu1 %3332  ;;  %2794 = vrot.lane.b32.xlu1 %v2789_v16, %s9856_s11 }
  0xc4   : > { %v3334_v21 = vrot.slane %v3333_v19, 6 }
  0xc5   : > { %v8058_v25 = vpop.permute.xlu0 %2987 }
  0xc6   : > { %v3339_v26 = vmul.bf16 %v3334_v21, %v3266_v20  ;;  %v2989_v27 = vrot.slane %v8058_v25, 6  ;;  %v3335_v60 = vsel %vm9871_vm11, %v3334_v21, %v3333_v19  ;;  %v3219_v21 = vsel %vm9872_vm14, %v3218_v38, %v8020_v34 }
  0xc7   : > { %v8082_v0 = vmul.bf16 %v3335_v60, %v8042_v1  ;;  %v1863_v38 = vsel %vm9886_vm0, %v1861_v50, %v8044_v3  ;;  %vm2253_vm0 = vcmask 392192  }
  0xc8   : > { %v2994_v29 = vmul.bf16 %v2989_v27, %v2925_v24  ;;  %v3357_v31 = vcombine.low %v3339_v26, %v3339_v26  ;;  %v2029_v24 = vld [vmem:[#allocation2 + $0x8] sm:$0x3] }
  0xc9   : > { %v3356_v14 = vrot.slane %v8082_v0, %v7822_v9 }
  0xca   : > { %v3018_v30 = vrot.slane %v2994_v29, %v7822_v9  ;;  %v3364_v37 = vrot.slane %v3357_v31, %v7822_v9  ;;  %v8111_v29 = vmul.bf16 %v3219_v21, %v8042_v1 }
  0xcc   : > { %v2875_v33 = vpop.permute.xlu1 %2874  ;;  %3023 = vrot.lane.b32.xlu1 %v3018_v30, %s9864_s26  ;;  %v3233_v3 = vrot.slane %v8111_v29, %v7822_v9 }
  0xcd   : > { %v2876_v36 = vrot.slane %v2875_v33, 6 }
  0xcf   : > { %v2881_v39 = vmul.bf16 %v2876_v36, %v2808_v35  ;;  %v2325_v40 = vpop.permute.xlu0 %2324  ;;  %v2877_v8 = vsel %vm9894_vm12, %v2876_v36, %v2875_v33  ;;  %v3448_v33 = vsel %vm9873_vm1, %v3447_v32, %v8016_v22  ;;  %v8131_v36 = vmul.bf16 %v1863_v38, %v8054_v18 }
  0xd0   : > { %v2326_v41 = vrot.slane %v2325_v40, 6  ;;  %3369 = vrot.lane.b32.xlu1 %v3364_v37, %s9874_s18  ;;  %v8091_v13 = vmul.bf16 %v2877_v8, %v8042_v1  ;;  %v8128_v35 = vmul.bf16 %v3448_v33, %v8042_v1 }
  0xd1   : > { %v2899_v43 = vcombine.low %v2881_v39, %v2881_v39  ;;  %v2761_v39 = vsel %vm9895_vm2, %v2760_v4, %v8038_v61  ;;  %v1877_v61 = vrot.slane %v8131_v36, %v7822_v9  ;;  %v2990_v4 = vsel %vm9897_vm4, %v2989_v27, %v8058_v25 }
  0xd2   : > { %v2332_v44 = vmul.bf16 %v2326_v41, %v2262_v42  ;;  %v2898_v20 = vrot.slane %v8091_v13, %v7822_v9  ;;  %v2328_v23 = vsel %vm9890_vm15, %v2326_v41, %v2325_v40  ;;  %v8145_v32 = vmul.bf16 %v2761_v39, %v8042_v1 }
  0xd3   : > { %v2906_v45 = vrot.slane %v2899_v43, %v7822_v9  ;;  %v8114_v30 = vmul.bf16 %v2328_v23, %v8054_v18  ;;  %v3462_v42 = vrot.slane %v8128_v35, %v7822_v9  ;;  %vm9898_vm15 = vcmask 375808  }
  0xd4   : > { %v2356_v46 = vrot.slane %v2332_v44, %v7822_v9 }
  0xd5   : > { %v3104_v47 = vpop.permute.xlu1 %3103  ;;  %2911 = vrot.lane.b32.xlu0 %v2906_v45, %s9839_s12  ;;  %v2342_v37 = vrot.slane %v8114_v30, %v7822_v9  ;;  %v8164_v45 = vmul.bf16 %v2990_v4, %v8042_v1 }
  0xd6   : > { %v3105_v49 = vrot.slane %v3104_v47, 6  ;;  %2361 = vrot.lane.b32.xlu1 %v2356_v46, %s9858_s29 }
  0xd8   : > { %v3110_v51 = vmul.bf16 %v3105_v49, %v3037_v48  ;;  %v3106_v15 = vsel %vm9896_vm13, %v3105_v49, %v3104_v47  ;;  %v2775_v47 = vrot.slane %v8145_v32, %v7822_v9 }
  0xd9   : > { %v8098_v17 = vmul.bf16 %v3106_v15, %v8042_v1 }
  0xda   : > { %v8072_v54 = vpop.permute.xlu0 %2645  ;;  %v3128_v55 = vcombine.low %v3110_v51, %v3110_v51  ;;  %v3004_v51 = vrot.slane %v8164_v45, %v7822_v9 }
  0xdb   : > { %v2647_v56 = vrot.slane %v8072_v54, 6  ;;  %v3127_v34 = vrot.slane %v8098_v17, %v7822_v9 }
  0xdc   : > { %v3135_v58 = vrot.slane %v3128_v55, %v7822_v9 }
  0xdd   : > { %v2652_v59 = vmul.bf16 %v2647_v56, %v2579_v53  ;;  %v2648_v52 = vsel %vm9868_vm7, %v2647_v56, %v8072_v54 }
  0xde   : > { %3140 = vrot.lane.b32.xlu0 %v3135_v58, %s9876_s30  ;;  %v8199_v57 = vmul.bf16 %v2648_v52, %v8042_v1 }
  0xdf   : > { %v2670_v62 = vcombine.low %v2652_v59, %v2652_v59  ;;  %v8086_v10 = vpop.permute.xlu1 %2442 }
  0xe0   : > { %v2444_v43 = vrot.slane %v8086_v10, 6 }
  0xe1   : > { %v2677_v7 = vrot.slane %v2670_v62, %v7822_v9  ;;  %v1911_v62 = vld [vmem:[#allocation2 + $0x8] sm:$0x3] }
  0xe2   : > { %1896 = vrot.lane.b32.xlu0 %v1891_v63, %s9846_s27  ;;  %v2446_v27 = vsel %vm9845_vm5, %v2444_v43, %v8086_v10  ;;  %vm9885_vm5 = vcmask 531456  }
  0xe3   : > { %2682 = vrot.lane.b32.xlu1 %v2677_v7, %s9862_s21  ;;  %v8185_v50 = vmul.bf16 %v2446_v27, %v8054_v18 }
  0xe5   : > { %v8108_v28 = vpop.permute.xlu0 %1977  ;;  %v2467_v59 = vrot.slane %v8185_v50, %v7822_v9 }
  0xe6   : > { %v1979_v53 = vrot.slane %v8108_v28, 6 }
  0xe7   : > { %3367 = vrot.lane.b32.xlu1 %v3356_v14, %s9874_s18  ;;  %v2669_v14 = vrot.slane %v8199_v57, %v7822_v9 }
  0xe8   : > { %v2092_v16 = vpop.permute.xlu1 %2091  ;;  %v1980_v54 = vsel %vm9893_vm8, %v1979_v53, %v8108_v28  ;;  %v1984_v1 = vmul.bf16 %v1979_v53, %v1911_v62  ;;  %v3342_v53 = vcombine.low %v8082_v0, %v8082_v0  ;;  %v3113_v62 = vcombine.low %v8098_v17, %v8098_v17 }
  0xe9   : > { %v2093_v19 = vrot.slane %v2092_v16, 6  ;;  %v8212_v7 = vmul.bf16 %v1980_v54, %v8054_v18  ;;  %v2884_v54 = vcombine.low %v8091_v13, %v8091_v13  ;;  %vm9906_vm8 = vcmask 1031168  }
  0xeb   : > { %v2099_v26 = vmul.bf16 %v2093_v19, %v2029_v24  ;;  %2909 = vrot.lane.b32.xlu1 %v2898_v20, %s9839_s12  ;;  %s9843_s12 = smov 54   ;;  %v2095_v40 = vsel %vm9889_vm3, %v2093_v19, %v2092_v16  ;;  %v2143_v20 = vld [vmem:[#allocation2 + $0x8] sm:$0x3]  ;;  %vm9913_vm3 = vcmask 900096  }
  0xec   : > { %v8148_v41 = vmul.bf16 %v2095_v40, %v8054_v18 }
  0xed   : > { %v2123_v31 = vrot.slane %v2099_v26, %v7822_v9  ;;  %v2002_v26 = vcombine.low %v1984_v1, %v1984_v1  ;;  %v3120_v1 = vrot.slane %v3113_v62, %v7822_v9 }
  0xee   : > { %v2109_v25 = vrot.slane %v8148_v41, %v7822_v9 }
  0xef   : > { %2128 = vrot.lane.b32.xlu0 %v2123_v31, %s9843_s12  ;;  %3138 = vrot.lane.b32.xlu1 %v3127_v34, %s9876_s30  ;;  %v2210_v22 = vpop.permute.xlu0 %2209  ;;  %v2001_v31 = vrot.slane %v8212_v7, %v7822_v9  ;;  %v2009_v33 = vrot.slane %v2002_v26, %v7822_v9  ;;  %v2102_v26 = vcombine.high %v8148_v41, %v8148_v41 }
  0xf0   : > { %v2211_v56 = vrot.slane %v2210_v22, 6 }
  0xf1   : > { %v8201_v58 = vpop.permute.xlu1 %1394 }
  0xf2   : > { %v2213_v15 = vsel %vm9887_vm10, %v2211_v56, %v2210_v22  ;;  %v1396_v16 = vrot.slane %v8201_v58, 6  ;;  %v2217_v23 = vmul.bf16 %v2211_v56, %v2143_v20  ;;  %v2376_v22 = vld [vmem:[#allocation2 + $0x8] sm:$0x3]  ;;  %v2891_v56 = vrot.slane %v2884_v54, %v7822_v9 }
  0xf3   : > { %3248 = vrot.lane.b32.xlu0 %v3233_v3, %s9852_s25  ;;  %2357 = vrot.lane.b32.xlu1 %v2342_v37, %s9858_s29  ;;  %v8231_v28 = vmul.bf16 %v2213_v15, %v8054_v18  ;;  %v2450_v4 = vmul.bf16 %v2444_v43, %v2376_v22  ;;  %vm9912_vm10 = vcmask 916480  }
  0xf4   : > { %v1398_v34 = vsel %vm9873_vm1, %v1396_v16, %v8201_v58  ;;  %v2235_v3 = vcombine.low %v2217_v23, %v2217_v23  ;;  %vm9901_vm1 = vcmask 965632  }
  0xf5   : > { %v8244_v37 = vmul.bf16 %v1398_v34, %v8054_v18  ;;  %v2234_v39 = vrot.slane %v8231_v28, %v7822_v9  ;;  %v2468_v10 = vcombine.low %v2450_v4, %v2450_v4  ;;  %v2220_v20 = vcombine.low %v8231_v28, %v8231_v28 }
  0xf7   : > { %3477 = vrot.lane.b32.xlu0 %v3462_v42, %s9866_s20  ;;  %1892 = vrot.lane.b32.xlu1 %v1877_v61, %s9846_s27  ;;  %s9850_s27 = smov 55   ;;  %v2242_v42 = vrot.slane %v2235_v3, %v7822_v9  ;;  %v3226_v61 = vcombine.high %v8111_v29, %v8111_v29  ;;  %v2475_v52 = vrot.slane %v2468_v10, %v7822_v9 }
  0xf8   : > { %v8161_v44 = vpop.permute.xlu0 %1512  ;;  %v1405_v28 = vcombine.high %v8244_v37, %v8244_v37 }
  0xf9   : > { %v1514_v46 = vrot.slane %v8161_v44, 6  ;;  %v3240_v27 = vrot.slane %v3226_v61, %v7822_v9 }
  0xfb   : > { %v1516_v48 = vsel %vm1515_vm6, %v1514_v46, %v8161_v44  ;;  %2790 = vrot.lane.b32.xlu0 %v2775_v47, %s9856_s11  ;;  %2124 = vrot.lane.b32.xlu1 %v2109_v25, %s9843_s12  ;;  %v8225_v21 = vpop.permute.xlu1 %1626  ;;  %s9848_s12 = smov 62   ;;  %v1412_v25 = vrot.slane %v8244_v37, %v7822_v9 }
  0xfc   : > { %v8182_v49 = vmul.bf16 %v1516_v48, %v8054_v18  ;;  %v1628_v38 = vrot.slane %v8225_v21, 6  ;;  %v3455_v48 = vcombine.high %v8128_v35, %v8128_v35 }
  0xfe   : > { %v1537_v55 = vrot.slane %v8182_v49, %v7822_v9  ;;  %v1630_v40 = vsel %vm9885_vm5, %v1628_v38, %v8225_v21  ;;  %v3469_v43 = vrot.slane %v3455_v48, %v7822_v9  ;;  %v1523_v41 = vcombine.low %v8182_v49, %v8182_v49 }
  0xff   : > { %3019 = vrot.lane.b32.xlu0 %v3004_v51, %s9864_s26  ;;  %v8260_v47 = vmul.bf16 %v1630_v40, %v8054_v18  ;;  %v2768_v51 = vcombine.high %v8145_v32, %v8145_v32  ;;  %v2453_v32 = vcombine.low %v8185_v50, %v8185_v50  ;;  %v1419_v40 = vrot.slane %v1405_v28, %v7822_v9 }
 0x100   : > { %1548 = vrot.lane.b32.xlu1 %v1537_v55, %s9841_s28  ;;  %s9854_s28 = smov 46   ;;  %v2997_v55 = vcombine.high %v8164_v45, %v8164_v45  ;;  %v2655_v45 = vcombine.low %v8199_v57, %v8199_v57  ;;  %v1870_v57 = vcombine.high %v8131_v36, %v8131_v36  ;;  %v1530_v61 = vrot.slane %v1523_v41, %v7822_v9 }
 0x101   : > { %v1644_v29 = vrot.slane %v8260_v47, %v7822_v9  ;;  %v2782_v35 = vrot.slane %v2768_v51, %v7822_v9  ;;  %v2460_v13 = vrot.slane %v2453_v32, %v7822_v9  ;;  %v1637_v22 = vcombine.high %v8260_v47, %v8260_v47 }
 0x102   : > { %v8207_v60 = vpop.permute.xlu0 %1744  ;;  %v3011_v0 = vrot.slane %v2997_v55, %v7822_v9  ;;  %v2662_v17 = vrot.slane %v2655_v45, %v7822_v9  ;;  %vm2020_vm5 = vcmask 449536  }
 0x103   : > { %v1746_v63 = vrot.slane %v8207_v60, 6  ;;  %2478 = vrot.lane.b32.xlu0 %v2467_v59, %s9854_s28  ;;  %v3349_v59 = vrot.slane %v3342_v53, %v7822_v9  ;;  %v1651_v47 = vrot.slane %v1637_v22, %v7822_v9 }
 0x104   : > { %v8304_v50 = vpop.permute.xlu1 %928 }
 0x105   : > { %v1748_v8 = vsel %vm9878_vm9, %v1746_v63, %v8207_v60  ;;  %v930_v23 = vrot.slane %v8304_v50, 6  ;;  %vm9902_vm9 = vcmask 1039360  }
 0x106   : > { %v8223_v19 = vmul.bf16 %v1748_v8, %v8054_v18  ;;  %v2335_v8 = vcombine.high %v8114_v30, %v8114_v30 }
 0x107   : > { %2680 = vrot.lane.b32.xlu0 %v2669_v14, %s9862_s21  ;;  %v1987_v14 = vcombine.low %v8212_v7, %v8212_v7  ;;  %v1884_v7 = vrot.slane %v1870_v57, %v7822_v9  ;;  %v932_v34 = vsel %vm9897_vm4, %v930_v23, %v8304_v50  ;;  %vm1902_vm4 = vcmask 457728  }
 0x108   : > { %v1769_v24 = vrot.slane %v8223_v19, %v7822_v9  ;;  %v2349_v15 = vrot.slane %v2335_v8, %v7822_v9  ;;  %v935_v37 = vmul.bf16 %v932_v34, %v8054_v18  ;;  %v1755_v49 = vcombine.low %v8223_v19, %v8223_v19 }
 0x109   : > { %v1994_v30 = vrot.slane %v1987_v14, %v7822_v9 }
 0x10a   : > { %1780 = vrot.lane.b32.xlu1 %v1769_v24, %s9848_s12  ;;  %s9860_s12 = smov 48   ;;  %v1762_v10 = vrot.slane %v1755_v49, %v7822_v9  ;;  %v946_v53 = vrot.slane %v935_v37, %v7822_v9 }
 0x10b   : > { %2012 = vrot.lane.b32.xlu0 %v2001_v31, %s9850_s27  ;;  %v8325_v36 = vpop.permute.xlu0 %1046  ;;  %v2227_v31 = vrot.slane %v2220_v20, %v7822_v9  ;;  %v1332_v20 = vld [vmem:[#allocation2 + $0x8] sm:$0x3] }
 0x10c   : > { %v1048_v3 = vrot.slane %v8325_v36, 6 }
 0x10e   : > { %2014 = vrot.lane.b32.xlu1 %v2009_v33, %s9850_s27  ;;  %s9869_s27 = smov 63   ;;  %v8319_v24 = vpop.permute.xlu1 %1161  ;;  %v2116_v33 = vrot.slane %v2102_v26, %v7822_v9  ;;  %v1050_v4 = vsel %vm9896_vm13, %v1048_v3, %v8325_v36  ;;  %v1402_v26 = vmul.bf16 %v1396_v16, %v1332_v20  ;;  %v866_v36 = vld [vmem:[#allocation2 + $0x8] sm:$0x3]  ;;  %vm9899_vm13 = vcmask 384000  }
 0x10f   : > { %2245 = vrot.lane.b32.xlu0 %v2234_v39, %s9860_s12  ;;  %v1053_v48 = vmul.bf16 %v1050_v4, %v8054_v18 }
 0x110   : > { %v1426_v22 = vrot.slane %v1402_v26, %v7822_v9 }
 0x111   : > { %v1071_v54 = vrot.slane %v1053_v48, %v7822_v9 }
 0x112   : > { %2247 = vrot.lane.b32.xlu1 %v2242_v42, %s9860_s12  ;;  %v1163_v42 = vrot.slane %v8319_v24, 6 }
 0x113   : > { %1427 = vrot.lane.b32.xlu0 %v1412_v25, %s9866_s20 }
 0x114   : > { %v1165_v19 = vsel %vm9872_vm14, %v1163_v42, %v8319_v24  ;;  %vm9903_vm14 = vcmask 982016  }
 0x115   : > { %v8356_v25 = vpop.permute.xlu0 %1279  ;;  %v1168_v51 = vmul.bf16 %v1165_v19, %v8054_v18 }
 0x116   : > { %3250 = vrot.lane.b32.xlu1 %v3240_v27, %s9852_s25  ;;  %s9954_s25 = smov 120   ;;  %v939_v27 = vcombine.high %v935_v37, %v935_v37 }
 0x117   : > { %1659 = vrot.lane.b32.xlu0 %v1644_v29, %s9869_s27 }
 0x119   : > { %v8340_v39 = vpop.permute.xlu1 %579 }
 0x11a   : > { %3479 = vrot.lane.b32.xlu1 %v3469_v43, %s9866_s20  ;;  %v1281_v43 = vrot.slane %v8356_v25, 6  ;;  %v581_v57 = vrot.slane %v8340_v39, 6 }
 0x11b   : > { %2480 = vrot.lane.b32.xlu0 %v2475_v52, %s9854_s28  ;;  %v953_v52 = vrot.slane %v939_v27, %v7822_v9 }
 0x11e   : > { %2792 = vrot.lane.b32.xlu1 %v2782_v35, %s9856_s11  ;;  %s9956_s11 = smov 56   ;;  %v1057_v35 = vcombine.low %v1053_v48, %v1053_v48 }
 0x11f   : > { %3365 = vrot.lane.b32.xlu0 %v3349_v59, %s9874_s18  ;;  %v1283_v59 = vsel %vm9871_vm11, %v1281_v43, %v8356_v25  ;;  %vm9911_vm11 = vcmask 908288  }
 0x120   : > { %v1286_v32 = vmul.bf16 %v1283_v59, %v8054_v18  ;;  %v1064_v62 = vrot.slane %v1057_v35, %v7822_v9  ;;  %v980_v59 = vld [vmem:[#allocation2 + $0x8] sm:$0x3] }
 0x122   : > { %3021 = vrot.lane.b32.xlu1 %v3011_v0, %s9864_s26  ;;  %v1172_v0 = vcombine.high %v1168_v51, %v1168_v51  ;;  %v1304_v44 = vrot.slane %v1286_v32, %v7822_v9 }
 0x123   : > { %2907 = vrot.lane.b32.xlu0 %v2891_v56, %s9954_s25  ;;  %v8384_v56 = vpop.permute.xlu0 %695 }
 0x124   : > { %v8365_v29 = vpop.permute.xlu1 %813  ;;  %v1186_v8 = vrot.slane %v1172_v0, %v7822_v9 }
 0x126   : > { %2476 = vrot.lane.b32.xlu1 %v2460_v13, %s9854_s28  ;;  %s9955_s28 = smov 55   ;;  %v1446_v13 = vld [vmem:[#allocation2 + $0x8] sm:$0x3] }
 0x127   : > { %3136 = vrot.lane.b32.xlu0 %v3120_v1, %s9876_s30  ;;  %v1520_v1 = vmul.bf16 %v1514_v46, %v1446_v13 }
 0x129   : > { %v1538_v46 = vcombine.low %v1520_v1, %v1520_v1 }
 0x12a   : > { %2678 = vrot.lane.b32.xlu1 %v2662_v17, %s9862_s21  ;;  %s9959_s21 = smov 62   ;;  %v1179_v17 = vrot.slane %v1168_v51, %v7822_v9 }
 0x12b   : > { %2359 = vrot.lane.b32.xlu0 %v2349_v15, %s9858_s29  ;;  %s9957_s29 = smov 54   ;;  %v1290_v15 = vcombine.low %v1286_v32, %v1286_v32  ;;  %v1545_v58 = vrot.slane %v1538_v46, %v7822_v9 }
 0x12c   : > { %v8395_v14 = vpop.permute.xlu0 %3252 }
 0x12d   : > { %v1297_v28 = vrot.slane %v1290_v15, %v7822_v9 }
 0x12e   : > { %2010 = vrot.lane.b32.xlu1 %v1994_v30, %s9955_s28  ;;  %v1678_v30 = vld [vmem:[#allocation2 + $0x8] sm:$0x3] }
 0x12f   : > { %1894 = vrot.lane.b32.xlu0 %v1884_v7, %s9956_s11  ;;  %v1752_v7 = vmul.bf16 %v1746_v63, %v1678_v30  ;;  %v1564_v63 = vld [vmem:[#allocation2 + $0x8] sm:$0x3] }
 0x130   : > { %v8413_v60 = vpop.permute.xlu0 %3481  ;;  %v1634_v41 = vmul.bf16 %v1628_v38, %v1564_v63 }
 0x131   : > { %v1770_v16 = vcombine.low %v1752_v7, %v1752_v7  ;;  %v936_v7 = vmul.bf16 %v930_v23, %v866_v36 }
 0x132   : > { %2243 = vrot.lane.b32.xlu1 %v2227_v31, %s9860_s12  ;;  %s9958_s12 = smov 64   ;;  %v697_v31 = vrot.slane %v8384_v56, 6 }
 0x133   : > { %2126 = vrot.lane.b32.xlu0 %v2116_v33, %s9957_s29  ;;  %v583_v33 = vsel %vm9868_vm7, %v581_v57, %v8340_v39  ;;  %v1777_v38 = vrot.slane %v1770_v16, %v7822_v9  ;;  %vm622_vm7 = vcmask 1043456  }
 0x134   : > { %v586_v37 = vmul.bf16 %v583_v33, %v8054_v18 }
 0x135   : > { %v8374_v55 = vpop.permute.xlu1 %2794 }
 0x136   : > { %1429 = vrot.lane.b32.xlu1 %v1419_v40, %s9866_s20  ;;  %v699_v40 = vsel %vm9895_vm2, %v697_v31, %v8384_v56  ;;  %v590_v27 = vcombine.low %v586_v37, %v586_v37  ;;  %v604_v19 = vrot.slane %v586_v37, %v7822_v9  ;;  %v960_v37 = vrot.slane %v936_v7, %v7822_v9 }
 0x137   : > { %1546 = vrot.lane.b32.xlu0 %v1530_v61, %s9958_s12  ;;  %v815_v61 = vrot.slane %v8365_v29, 6  ;;  %v702_v21 = vmul.bf16 %v699_v40, %v8054_v18  ;;  %vm3669_vm2 = vcmask 1045504  }
 0x139   : > { %v817_v48 = vsel %vm9894_vm12, %v815_v61, %v8365_v29  ;;  %v713_v32 = vrot.slane %v702_v21, %v7822_v9  ;;  %vm9907_vm12 = vcmask 973824  }
 0x13a   : > { %1661 = vrot.lane.b32.xlu1 %v1651_v47, %s9869_s27  ;;  %v1658_v47 = vrot.slane %v1634_v41, %v7822_v9  ;;  %v820_v51 = vmul.bf16 %v817_v48, %v8054_v18 }
 0x13b   : > { %1778 = vrot.lane.b32.xlu0 %v1762_v10, %s9959_s21  ;;  %v706_v10 = vcombine.high %v702_v21, %v702_v21 }
 0x13c   : > { %v824_v18 = vcombine.low %v820_v51, %v820_v51  ;;  %v838_v15 = vrot.slane %v820_v51, %v7822_v9 }
 0x13d   : > { %v720_v0 = vrot.slane %v706_v10, %v7822_v9 }
 0x13e   : > { %963 = vrot.lane.b32.xlu1 %v953_v52, %s9864_s26  ;;  %v8389_v45 = vpop.permute.xlu1 %3023  ;;  %v597_v52 = vrot.slane %v590_v27, %v7822_v9  ;;  %v831_v46 = vrot.slane %v824_v18, %v7822_v9 }
 0x13f   : > { %961 = vrot.lane.b32.xlu0 %v946_v53, %s9864_s26  ;;  %s9960_s26 = smov 112   ;;  %v3027_v18 = vrot.slane %v8389_v45, 4 }
 0x142   : > { %1082 = vrot.lane.b32.xlu1 %v1071_v54, %s9876_s30  ;;  %v3370_v34 = vpop.permute.xlu1 %3369  ;;  %v1054_v54 = vmul.bf16 %v1048_v3, %v980_v59 }
 0x143   : > { %1080 = vrot.lane.b32.xlu0 %v1064_v62, %s9876_s30  ;;  %v3373_v13 = vrot.slane %v3370_v34, 4  ;;  %v513_v34 = vld [vmem:[#allocation2 + $0x8] sm:$0x3] }
 0x144   : > { %v1072_v20 = vcombine.low %v1054_v54, %v1054_v54  ;;  %v3256_v54 = vrot.slane %v8395_v14, 4 }
 0x146   : > { %1196 = vrot.lane.b32.xlu1 %v1186_v8, %s9960_s26  ;;  %v1213_v8 = vld [vmem:[#allocation2 + $0x8] sm:$0x3]  ;;  %v1079_v50 = vrot.slane %v1072_v20, %v7822_v9 }
 0x147   : > { %1194 = vrot.lane.b32.xlu0 %v1179_v17, %s9960_s26  ;;  %v2912_v49 = vpop.permute.xlu0 %2911  ;;  %v1287_v3 = vmul.bf16 %v1281_v43, %v1213_v8  ;;  %v1099_v43 = vld [vmem:[#allocation2 + $0x8] sm:$0x3] }
 0x148   : > { %v8427_v4 = vpop.permute.xlu1 %2361  ;;  %v1169_v63 = vmul.bf16 %v1163_v42, %v1099_v43  ;;  %v633_v42 = vld [vmem:[#allocation2 + $0x8] sm:$0x3]  ;;  %v3523_v43 = vld [vmem:[%s9965_s3] sm:$0xff]  ;;  %s9991_s3 = smov 2  }
 0x149   : > { %v1305_v33 = vcombine.low %v1287_v3, %v1287_v3  ;;  %v703_v39 = vmul.bf16 %v697_v31, %v633_v42 }
 0x14a   : > { %1315 = vrot.lane.b32.xlu1 %v1304_v44, %s9874_s18 }
 0x14b   : > { %1313 = vrot.lane.b32.xlu0 %v1297_v28, %s9874_s18  ;;  %v2915_v28 = vrot.slane %v2912_v49, 4  ;;  %s9963_s18 = smov 119   ;;  %v1312_v49 = vrot.slane %v1305_v33, %v7822_v9  ;;  %v727_v31 = vrot.slane %v703_v39, %v7822_v9 }
 0x14e   : > { %1550 = vrot.lane.b32.xlu1 %v1545_v58, %s9958_s12  ;;  %v587_v58 = vmul.bf16 %v581_v57, %v513_v34  ;;  %v747_v57 = vld [vmem:[#allocation2 + $0x8] sm:$0x3]  ;;  %v5095_v34 = vld [vmem:[#allocation6 + $0x10] sm:$0x88] }
 0x14f   : > { %1431 = vrot.lane.b32.xlu0 %v1426_v22, %s9866_s20  ;;  %s9961_s20 = smov 127   ;;  %v7059_v33 = vcombine.high %v5095_v34, %v5095_v34 }
 0x150   : > { %v3141_v53 = vpop.permute.xlu0 %3140 }
 0x151   : > { %v3144_v22 = vrot.slane %v3141_v53, 4 }
 0x152   : > { %1782 = vrot.lane.b32.xlu1 %v1777_v38, %s9959_s21  ;;  %v605_v38 = vcombine.low %v587_v58, %v587_v58  ;;  %v5096_v58 = vld [vmem:[#allocation6 + $0x18] sm:$0x88] }
 0x153   : > { %1663 = vrot.lane.b32.xlu0 %v1658_v47, %s9869_s27  ;;  %s9962_s27 = smov 126   ;;  %v821_v47 = vmul.bf16 %v815_v61, %v747_v57  ;;  %v7060_v42 = vcombine.low %v5096_v58, %v5096_v58  ;;  %v7061_v39 = vcombine.high %v5096_v58, %v5096_v58  ;;  %v4915_v58 = vld [vmem:[#allocation6 + $0x10] sm:$0x44] }
 0x154   : > { %v8454_v17 = vpop.permute.xlu0 %1896  ;;  %v612_v29 = vrot.slane %v605_v38, %v7822_v9 }
 0x155   : > { %v8441_v35 = vpop.permute.xlu1 %2682  ;;  %v839_v10 = vcombine.low %v821_v47, %v821_v47 }
 0x156   : > { %615 = vrot.lane.b32.xlu1 %v604_v19, %s9961_s20  ;;  %v1193_v19 = vrot.slane %v1169_v63, %v7822_v9  ;;  %v2686_v8 = vrot.slane %v8441_v35, 4  ;;  %v3793_v63 = vld [vmem:[%s9966_s4] sm:$0xff]  ;;  %s9993_s4 = smov 8  }
 0x157   : > { %613 = vrot.lane.b32.xlu0 %v597_v52, %s9961_s20  ;;  %v846_v53 = vrot.slane %v839_v10, %v7822_v9  ;;  %v5129_v10 = vpack.i.b16 %v7061_v39, %v7061_v39  ;;  %v4916_v9 = vld [vmem:[#allocation6 + $0x18] sm:$0x44] }
 0x159   : > { %v8449_v62 = vpop.permute.xlu1 %3367 }
 0x15a   : > { %730 = vrot.lane.b32.xlu1 %v720_v0, %s9962_s27  ;;  %v3372_v1 = vrot.slane %v8449_v62, 4  ;;  %v2798_v0 = vrot.slane %v8374_v55, 4 }
 0x15b   : > { %728 = vrot.lane.b32.xlu0 %v713_v32, %s9962_s27  ;;  %v3485_v32 = vrot.slane %v8413_v60, 4 }
 0x15c   : > { %v3376_v30 = vsel %vm622_vm7, %v3372_v1, %v3373_v13 }
 0x15d   : > { %v3377_v44 = vsel %vm9911_vm11, %v8449_v62, %v3376_v30  ;;  %v8467_v26 = vpop.permute.xlu1 %2909 }
 0x15e   : > { %849 = vrot.lane.b32.xlu1 %v838_v15, %s9954_s25  ;;  %3381 = vst [vmem:[#allocation3 + $0xc8] sm:$0xcc] %v3377_v44  ;;  %v2914_v25 = vrot.slane %v8467_v26, 4 }
 0x15f   : > { %847 = vrot.lane.b32.xlu0 %v831_v46, %s9954_s25 }
 0x160   : > { %v2918_v23 = vsel %vm622_vm7, %v2914_v25, %v2915_v28 }
 0x161   : > { %v8480_v16 = vpop.permute.xlu0 %2128  ;;  %v2919_v41 = vsel %vm9903_vm14, %v8467_v26, %v2918_v23  ;;  %v8485_v40 = vpop.permute.xlu1 %3138  ;;  %v7058_v23 = vcombine.low %v5095_v34, %v5095_v34 }
 0x162   : > { %1084 = vrot.lane.b32.xlu1 %v1079_v50, %s9876_s30  ;;  %2923 = vst [vmem:[#allocation3 + $0xa8] sm:$0xcc] %v2919_v41  ;;  %v9892_v24 = vrot.slane %v8485_v40, 4  ;;  %s9964_s30 = smov 111   ;;  %v5183_v41 = vld [vmem:[#allocation6 + $0x10] sm:$0x88] }
 0x163   : > { %965 = vrot.lane.b32.xlu0 %v960_v37, %s9963_s18  ;;  %v7064_v57 = vcombine.low %v5183_v41, %v5183_v41  ;;  %v5108_v47 = vpack.i.b16 %v7058_v23, %v7058_v23  ;;  %v5134_v23 = vrot.slane %v5129_v10, %v7826_v12 }
 0x164   : > { %v3147_v21 = vsel %vm622_vm7, %v9892_v24, %v3144_v22  ;;  %v3803_v22 = vld [vmem:[%s9967_s5] sm:$0xff]  ;;  %v4823_v24 = vld [vmem:[#allocation6 + $0x10] sm:$0x22]  ;;  %s9994_s5 = smov 1  }
 0x165   : > { %v8498_v27 = vpop.permute.xlu0 %3248  ;;  %v3148_v48 = vsel %vm9901_vm1, %v8485_v40, %v3147_v21  ;;  %v8503_v56 = vpop.permute.xlu1 %2357  ;;  %v5184_v21 = vld [vmem:[#allocation6 + $0x18] sm:$0x88] }
 0x166   : > { %1317 = vrot.lane.b32.xlu1 %v1312_v49, %s9964_s30  ;;  %3152 = vst [vmem:[#allocation3 + $0xb8] sm:$0xcc] %v3148_v48  ;;  %v3254_v15 = vrot.slane %v8498_v27, 4  ;;  %v7065_v49 = vcombine.high %v5183_v41, %v5183_v41  ;;  %v5115_v48 = vpack.i.b16 %v7059_v33, %v7059_v33 }
 0x167   : > { %1198 = vrot.lane.b32.xlu0 %v1193_v19, %s9960_s26  ;;  %v7066_v19 = vcombine.low %v5184_v21, %v5184_v21 }
 0x168   : > { %v5120_v34 = vrot.slane %v5115_v48, %v7826_v12 }
 0x169   : > { %v8508_v51 = vpop.permute.xlu0 %3477  ;;  %v8511_v61 = vpop.permute.xlu1 %1892  ;;  %v5212_v2 = vshrl.u32 %v7066_v19, 16  ;;  %v7046_v19 = vcombine.low %v4915_v58, %v4915_v58 }
 0x16a   : > { %732 = vrot.lane.b32.xlu1 %v727_v31, %s9962_s27  ;;  %v3483_v30 = vrot.slane %v8508_v51, 4  ;;  %v5122_v31 = vpack.i.b16 %v7060_v42, %v7060_v42 }
 0x16b   : > { %617 = vrot.lane.b32.xlu0 %v612_v29, %s9961_s20  ;;  %v5196_v29 = vshrl.u32 %v7064_v57, 16 }
 0x16c   : > { %v5127_v41 = vrot.slane %v5122_v31, %v7826_v12 }
 0x16d   : > { %v8515_v52 = vpop.permute.xlu0 %2790  ;;  %v8518_v59 = vpop.permute.xlu1 %2124  ;;  %v5197_v33 = vpack.i.b16 %v5196_v29, %v5196_v29  ;;  %v7047_v29 = vcombine.high %v4915_v58, %v4915_v58 }
 0x16e   : > { %v2796_v46 = vrot.slane %v8515_v52, 4  ;;  %3526 = vperm.xlu1 %7294, %v3523_v43   ;;  %v5113_v43 = vrot.slane %v5108_v47, %v7826_v12  ;;  %v7063_v47 = vcombine.low %v5127_v41, %v5134_v23  ;;  %v5004_v23 = vld [vmem:[#allocation6 + $0x18] sm:$0x44] }
 0x16f   : > { %851 = vrot.lane.b32.xlu0 %v846_v53, %s9954_s25  ;;  %v5204_v53 = vshrl.u32 %v7065_v49, 16  ;;  %v5202_v48 = vrot.slane %v5197_v33, %v7826_v12 }
 0x170   : > { %v7062_v57 = vcombine.low %v5113_v43, %v5120_v34 }
 0x171   : > { %v8529_v3 = vpop.permute.xlu0 %3019  ;;  %v5205_v42 = vpack.i.b16 %v5204_v53, %v5204_v53  ;;  %v5003_v53 = vld [vmem:[#allocation6 + $0x10] sm:$0x44] }
 0x172   : > { %v8535_v44 = vpop.permute.xlu1 %1548  ;;  %v3025_v35 = vrot.slane %v8529_v3, 4  ;;  %3806 = vperm.xlu1 %7294, %v3803_v22   ;;  %v5213_v22 = vpack.i.b16 %v5212_v2, %v5212_v2  ;;  %v7052_v36 = vcombine.low %v5003_v53, %v5003_v53 }
 0x173   : > { %3796 = vperm.xlu0 %7295, %v3793_v63   ;;  %v7067_v63 = vcombine.high %v5184_v21, %v5184_v21  ;;  %v5210_v21 = vrot.slane %v5205_v42, %v7826_v12 }
 0x174   : > { %v8569_v10 = vrot.slane %v5213_v22, %v7826_v12  ;;  %v7048_v22 = vcombine.low %v4916_v9, %v4916_v9 }
 0x175   : > { %v8547_v37 = vpop.permute.xlu0 %2478  ;;  %v5220_v49 = vshrl.u32 %v7067_v63, 16  ;;  %v7068_v41 = vcombine.low %v5202_v48, %v5210_v21 }
 0x176   : > { %v2483_v38 = vrot.slane %v8547_v37, 4  ;;  %5145 = vrot.lane.b32.xlu1 %v7062_v57, %s9968_s0  ;;  %v4935_v57 = vpack.i.b16 %v7047_v29, %v7047_v29  ;;  %v4942_v21 = vpack.i.b16 %v7048_v22, %v7048_v22  ;;  %v5016_v29 = vshrl.u32 %v7052_v36, 16 }
 0x177   : > { %v5221_v2 = vpack.i.b16 %v5220_v49, %v5220_v49  ;;  %v7049_v49 = vcombine.high %v4916_v9, %v4916_v9 }
 0x178   : > { %v4940_v48 = vrot.slane %v4935_v57, %v7824_v11 }
 0x179   : > { %v8555_v50 = vpop.permute.xlu0 %2680  ;;  %v5226_v42 = vrot.slane %v5221_v2, %v7826_v12  ;;  %v4949_v2 = vpack.i.b16 %v7049_v49, %v7049_v49 }
 0x17a   : > { %v9888_v39 = vrot.slane %v8555_v50, 4  ;;  %5147 = vrot.lane.b32.xlu1 %v7063_v47, %s9968_s0  ;;  %v7055_v47 = vcombine.high %v5004_v23, %v5004_v23  ;;  %s9975_s0 = smov 18  }
 0x17b   : > { %v7069_v34 = vcombine.low %v8569_v10, %v5226_v42  ;;  %v4954_v42 = vrot.slane %v4949_v2, %v7824_v11 }
 0x17c   : > { %v2689_v31 = vsel %vm622_vm7, %v9888_v39, %v2686_v8  ;;  %v8565_v28 = vpop.permute.xlu1 %1780  ;;  %v4928_v8 = vpack.i.b16 %v7046_v19, %v7046_v19  ;;  %v7054_v19 = vcombine.low %v5004_v23, %v5004_v23  ;;  %v4947_v39 = vrot.slane %v4942_v21, %v7824_v11  ;;  %v4736_v23 = vld [vmem:[#allocation6 + $0x18] sm:$0x22] }
 0x17d   : > { %v2690_v43 = vsel %vm9902_vm9, %v8555_v50, %v2689_v31  ;;  %v8574_v63 = vpop.permute.xlu0 %2012  ;;  %v7053_v31 = vcombine.high %v5003_v53, %v5003_v53  ;;  %v5040_v49 = vshrl.u32 %v7055_v47, 16 }
 0x17e   : > { %2694 = vst [vmem:[#allocation3 + $0x98] sm:$0xcc] %v2690_v43  ;;  %v9891_v33 = vrot.slane %v8574_v63, 4  ;;  %v4933_v58 = vrot.slane %v4928_v8, %v7824_v11  ;;  %v4735_v8 = vld [vmem:[#allocation6 + $0x10] sm:$0x22]  ;;  %5237 = vrot.lane.b32.xlu1 %v7068_v41, %s9969_s1 }
 0x17f   : > { %v5024_v20 = vshrl.u32 %v7053_v31, 16  ;;  %v7034_v31 = vcombine.low %v4735_v8, %v4735_v8 }
 0x180   : > { %v2015_v7 = vpop.permute.xlu1 %2014  ;;  %v7050_v53 = vcombine.low %v4933_v58, %v4940_v48  ;;  %v5032_v58 = vshrl.u32 %v7054_v19, 16 }
 0x181   : > { %v2018_v43 = vrot.slane %v2015_v7, 4  ;;  %v8582_v13 = vpop.permute.xlu0 %2245  ;;  %v5017_v7 = vpack.i.b16 %v5016_v29, %v5016_v29  ;;  %v5025_v57 = vpack.i.b16 %v5024_v20, %v5024_v20 }
 0x182   : > { %v2250_v9 = vrot.slane %v8582_v13, 4  ;;  %4965 = vrot.lane.b32.xlu0 %v7050_v53, %s9970_s15  ;;  %v5033_v41 = vpack.i.b16 %v5032_v58, %v5032_v58  ;;  %v7035_v53 = vcombine.high %v4735_v8, %v4735_v8  ;;  %5239 = vrot.lane.b32.xlu1 %v7069_v34, %s9969_s1  ;;  %s9985_s1 = smov 16  }
 0x183   : > { %v2022_v10 = vsel %vm622_vm7, %v9891_v33, %v2018_v43  ;;  %v7051_v43 = vcombine.low %v4947_v39, %v4954_v42  ;;  %v5022_v20 = vrot.slane %v5017_v7, %v7824_v11  ;;  %v5030_v2 = vrot.slane %v5025_v57, %v7824_v11 }
 0x184   : > { %v2248_v22 = vpop.permute.xlu1 %2247  ;;  %v2023_v36 = vsel %vm2020_vm5, %v8574_v63, %v2022_v10  ;;  %v5041_v10 = vpack.i.b16 %v5040_v49, %v5040_v49  ;;  %v7036_v33 = vcombine.low %v4736_v23, %v4736_v23  ;;  %v5038_v42 = vrot.slane %v5033_v41, %v7824_v11 }
 0x185   : > { %v2251_v48 = vrot.slane %v2248_v22, 4  ;;  %v8594_v21 = vpop.permute.xlu0 %1427  ;;  %2027 = vst [vmem:[#allocation3 + $0x68] sm:$0xcc] %v2023_v36  ;;  %v7056_v47 = vcombine.low %v5022_v20, %v5030_v2  ;;  %v4748_v22 = vpack.i.b16 %v7034_v31, %v7034_v31  ;;  %v4755_v57 = vpack.i.b16 %v7035_v53, %v7035_v53 }
 0x186   : > { %v1433_v29 = vrot.slane %v8594_v21, 4  ;;  %v5046_v7 = vrot.slane %v5041_v10, %v7824_v11  ;;  %v7037_v31 = vcombine.high %v4736_v23, %v4736_v23  ;;  %v7040_v41 = vcombine.low %v4823_v24, %v4823_v24  ;;  %v4555_v23 = vld [vmem:[#allocation6 + $0x10] sm:$0x11]  ;;  %4967 = vrot.lane.b32.xlu1 %v7051_v43, %s9970_s15  ;;  %s9987_s15 = smov 17  }
 0x187   : > { %v2255_v19 = vsel %vm622_vm7, %v2250_v9, %v2251_v48  ;;  %5057 = vrot.lane.b32.xlu0 %v7056_v47, %s9971_s19  ;;  %v4753_v49 = vrot.slane %v4748_v22, %v7818_v5  ;;  %v4762_v48 = vpack.i.b16 %v7036_v33, %v7036_v33  ;;  %v4760_v34 = vrot.slane %v4755_v57, %v7818_v5 }
 0x188   : > { %v3251_v36 = vpop.permute.xlu1 %3250  ;;  %v2256_v39 = vsel %vm2253_vm0, %v8582_v13, %v2255_v19  ;;  %v7057_v2 = vcombine.low %v5038_v42, %v5046_v7  ;;  %v4824_v19 = vld [vmem:[#allocation6 + $0x18] sm:$0x22]  ;;  %v4769_v22 = vpack.i.b16 %v7037_v31, %v7037_v31  ;;  %v7041_v57 = vcombine.high %v4823_v24, %v4823_v24 }
 0x189   : > { %v3255_v8 = vrot.slane %v3251_v36, 4  ;;  %v8607_v58 = vpop.permute.xlu0 %1659  ;;  %2260 = vst [vmem:[#allocation3 + $0x78] sm:$0xcc] %v2256_v39  ;;  %v4767_v47 = vrot.slane %v4762_v48, %v7818_v5  ;;  %v7038_v7 = vcombine.low %v4753_v49, %v4760_v34  ;;  %v7042_v31 = vcombine.low %v4824_v19, %v4824_v19 }
 0x18a   : > { %v1665_v20 = vrot.slane %v8607_v58, 4  ;;  %5059 = vrot.lane.b32.xlu1 %v7057_v2, %s9971_s19 }
 0x18b   : > { %v3257_v10 = vsel %vm622_vm7, %v3254_v15, %v3255_v8  ;;  %v3259_v53 = vsel %vm622_vm7, %v3255_v8, %v3256_v54  ;;  %v4774_v54 = vrot.slane %v4769_v22, %v7818_v5  ;;  %v4836_v8 = vshrl.u32 %v7040_v41, 16  ;;  %4785 = vrot.lane.b32.xlu0 %v7038_v7, %s9972_s22 }
 0x18c   : > { %v3258_v33 = vsel %vm9912_vm10, %v8498_v27, %v3257_v10  ;;  %v3260_v39 = vsel %vm9912_vm10, %v3251_v36, %v3259_v53  ;;  %v3480_v42 = vpop.permute.xlu1 %3479  ;;  %v4844_v27 = vshrl.u32 %v7041_v57, 16  ;;  %v7043_v10 = vcombine.high %v4824_v19, %v4824_v19 }
 0x18d   : > { %3263 = vst [vmem:[#allocation3 + $0xc0] sm:$0x33] %v3258_v33  ;;  %3264 = vst [vmem:[#allocation3 + $0xc8] sm:$0x33] %v3260_v39  ;;  %v3484_v15 = vrot.slane %v3480_v42, 4  ;;  %v2481_v14 = vpop.permute.xlu0 %2480  ;;  %v7022_v36 = vcombine.low %v4555_v23, %v4555_v23  ;;  %v7039_v49 = vcombine.low %v4767_v47, %v4774_v54  ;;  %v4837_v34 = vpack.i.b16 %v4836_v8, %v4836_v8 }
 0x18e   : > { %v2484_v48 = vrot.slane %v2481_v14, 4  ;;  %v4860_v7 = vshrl.u32 %v7043_v10, 16  ;;  %v7023_v57 = vcombine.high %v4555_v23, %v4555_v23  ;;  %v4556_v8 = vld [vmem:[#allocation6 + $0x18] sm:$0x11] }
 0x18f   : > { %v3486_v43 = vsel %vm622_vm7, %v3483_v30, %v3484_v15  ;;  %v3488_v24 = vsel %vm622_vm7, %v3484_v15, %v3485_v32  ;;  %v4845_v30 = vpack.i.b16 %v4844_v27, %v4844_v27  ;;  %v4842_v33 = vrot.slane %v4837_v34, %v7818_v5  ;;  %4787 = vrot.lane.b32.xlu1 %v7039_v49, %s9972_s22  ;;  %s9988_s22 = smov 9  }
 0x190   : > { %v3487_v41 = vsel %vm9913_vm3, %v8508_v51, %v3486_v43  ;;  %v3489_v53 = vsel %vm9913_vm3, %v3480_v42, %v3488_v24  ;;  %v2488_v19 = vsel %vm622_vm7, %v2483_v38, %v2484_v48  ;;  %v2793_v22 = vpop.permute.xlu1 %2792  ;;  %v4852_v51 = vshrl.u32 %v7042_v31, 16 }
 0x191   : > { %3492 = vst [vmem:[#allocation3 + $0xd0] sm:$0x33] %v3487_v41  ;;  %3493 = vst [vmem:[#allocation3 + $0xd8] sm:$0x33] %v3489_v53  ;;  %v2797_v60 = vrot.slane %v2793_v22, 4  ;;  %v3366_v32 = vpop.permute.xlu0 %3365  ;;  %v2489_v47 = vsel %vm9898_vm15, %v8547_v37, %v2488_v19  ;;  %v4850_v42 = vrot.slane %v4845_v30, %v7818_v5  ;;  %v4568_v54 = vpack.i.b16 %v7022_v36, %v7022_v36 }
 0x192   : > { %v3371_v39 = vrot.slane %v3366_v32, 4  ;;  %2493 = vst [vmem:[#allocation3 + $0x88] sm:$0xcc] %v2489_v47  ;;  %v4853_v14 = vpack.i.b16 %v4852_v51, %v4852_v51  ;;  %v4861_v43 = vpack.i.b16 %v4860_v7, %v4860_v7  ;;  %v7024_v24 = vcombine.low %v4556_v8, %v4556_v8  ;;  %v4643_v19 = vld [vmem:[#allocation6 + $0x10] sm:$0x11] }
 0x193   : > { %v2799_v2 = vsel %vm622_vm7, %v2796_v46, %v2797_v60  ;;  %v2801_v15 = vsel %vm622_vm7, %v2797_v60, %v2798_v0  ;;  %v7044_v46 = vcombine.low %v4842_v33, %v4850_v42  ;;  %v4573_v62 = vrot.slane %v4568_v54, %v7820_v6 }
 0x194   : > { %v2800_v31 = vsel %vm9906_vm8, %v8515_v52, %v2799_v2  ;;  %v2802_v48 = vsel %vm9906_vm8, %v2793_v22, %v2801_v15  ;;  %v3374_v23 = vsel %vm622_vm7, %v3371_v39, %v3372_v1  ;;  %v3022_v27 = vpop.permute.xlu1 %3021  ;;  %v4858_v36 = vrot.slane %v4853_v14, %v7818_v5 }
 0x195   : > { %2805 = vst [vmem:[#allocation3 + $0xa0] sm:$0x33] %v2800_v31  ;;  %2806 = vst [vmem:[#allocation3 + $0xa8] sm:$0x33] %v2802_v48  ;;  %v3375_v55 = vsel %vm9911_vm11, %v3366_v32, %v3374_v23  ;;  %v3026_v0 = vrot.slane %v3022_v27, 4  ;;  %v2908_v10 = vpop.permute.xlu0 %2907  ;;  %4877 = vrot.lane.b32.xlu0 %v7044_v46, %s9973_s24  ;;  %v4575_v1 = vpack.i.b16 %v7023_v57, %v7023_v57  ;;  %v9974_v31 = vrot.slane %v8485_v40, 4 }
 0x196   : > { %3380 = vst [vmem:[#allocation3 + $0xc0] sm:$0xcc] %v3375_v55  ;;  %v2913_v52 = vrot.slane %v2908_v10, 4  ;;  %v4866_v41 = vrot.slane %v4861_v43, %v7818_v5  ;;  %v7025_v53 = vcombine.high %v4556_v8, %v4556_v8  ;;  %v4582_v42 = vpack.i.b16 %v7024_v24, %v7024_v24  ;;  %v4644_v57 = vld [vmem:[#allocation6 + $0x18] sm:$0x11] }
 0x197   : > { %v3028_v49 = vsel %vm622_vm7, %v3025_v35, %v3026_v0  ;;  %v3030_v34 = vsel %vm622_vm7, %v3026_v0, %v3027_v18  ;;  %v4580_v35 = vrot.slane %v4575_v1, %v7820_v6  ;;  %v7028_v7 = vcombine.low %v4643_v19, %v4643_v19 }
 0x198   : > { %v3029_v22 = vsel %vm9907_vm12, %v8529_v3, %v3028_v49  ;;  %v3031_v30 = vsel %vm9907_vm12, %v3022_v27, %v3030_v34  ;;  %v2916_v60 = vsel %vm622_vm7, %v2913_v52, %v2914_v25  ;;  %v2477_v32 = vpop.permute.xlu1 %2476  ;;  %v7398_v47 = vld [vmem:[#allocation3 + $0xcc] ss:$16 sps:$4 sm:$0x3f]   ;;  %v7400_v51 = vld [vmem:[#allocation3 + $0xc8] ss:$16 sps:$4 sm:$0x3f]   ;;  %v7045_v39 = vcombine.low %v4858_v36, %v4866_v41 }
 0x199   : > { %3034 = vst [vmem:[#allocation3 + $0xb0] sm:$0x33] %v3029_v22  ;;  %3035 = vst [vmem:[#allocation3 + $0xb8] sm:$0x33] %v3031_v30  ;;  %v2917_v45 = vsel %vm9903_vm14, %v2908_v10, %v2916_v60  ;;  %v2482_v18 = vrot.slane %v2477_v32, 4  ;;  %v3137_v33 = vpop.permute.xlu0 %3136  ;;  %6970 = vmatprep.subr.msk.bf16.mxu1 %vm3669_vm2, %v7398_v47  ;;  %v7026_v26 = vcombine.low %v4573_v62, %v4580_v35  ;;  %v3677_v15 = vsel %vm3669_vm2, %v7400_v51, 0 }
 0x19a   : > { %2922 = vst [vmem:[#allocation3 + $0xa0] sm:$0xcc] %v2917_v45  ;;  %v3142_v3 = vrot.slane %v3137_v33, 4  ;;  %v4589_v25 = vpack.i.b16 %v7025_v53, %v7025_v53  ;;  %4879 = vrot.lane.b32.xlu1 %v7045_v39, %s9973_s24  ;;  %v4587_v14 = vrot.slane %v4582_v42, %v7820_v6  ;;  %v7029_v54 = vcombine.high %v4643_v19, %v4643_v19  ;;  %v4375_v27 = vld [vmem:[#allocation6] sm:$0x88]  ;;  %s9989_s24 = smov 10  }
 0x19b   : > { %v2485_v2 = vsel %vm622_vm7, %v2482_v18, %v2483_v38  ;;  %3726 = vmatpush1.bf16.msra.mxu1 %v3677_v15  ;;  %4605 = vrot.lane.b32.xlu0 %v7026_v26, %s9975_s0  ;;  %v4656_v38 = vshrl.u32 %v7028_v7, 16  ;;  %v7030_v43 = vcombine.low %v4644_v57, %v4644_v57  ;;  %v7031_v24 = vcombine.high %v4644_v57, %v4644_v57  ;;  %v4376_v22 = vld [vmem:[#allocation6 + $0x8] sm:$0x88] }
 0x19c   : > { %v2487_v8 = vsel %vm9898_vm15, %v2477_v32, %v2485_v2  ;;  %v3145_v48 = vsel %vm622_vm7, %v3142_v3, %v9974_v31  ;;  %v2679_v23 = vpop.permute.xlu1 %2678  ;;  %v4594_v37 = vrot.slane %v4589_v25, %v7820_v6  ;;  %v4664_v36 = vshrl.u32 %v7029_v54, 16 }
 0x19d   : > { %2492 = vst [vmem:[#allocation3 + $0x80] sm:$0xcc] %v2487_v8  ;;  %v3146_v46 = vsel %vm9901_vm1, %v3137_v33, %v3145_v48  ;;  %v2684_v55 = vrot.slane %v2679_v23, 4  ;;  %v2360_v0 = vpop.permute.xlu0 %2359  ;;  %v7401_v10 = vld [vmem:[#allocation3 + $0xc4] ss:$16 sps:$4 sm:$0x3f]   ;;  %v4657_v1 = vpack.i.b16 %v4656_v38, %v4656_v38  ;;  %v7010_v19 = vcombine.low %v4375_v27, %v4375_v27 }
 0x19e   : > { %3151 = vst [vmem:[#allocation3 + $0xb0] sm:$0xcc] %v3146_v46  ;;  %v2364_v40 = vrot.slane %v2360_v0, 4  ;;  %v7403_v52 = vld [vmem:[#allocation3 + $0xc0] ss:$16 sps:$4 sm:$0x3f]   ;;  %v7027_v62 = vcombine.low %v4587_v14, %v4594_v37  ;;  %6968 = vmatprep.subr.msk.bf16.mxu0 %vm3669_vm2, %v7401_v10  ;;  %v4665_v41 = vpack.i.b16 %v4664_v36, %v4664_v36  ;;  %v7012_v54 = vcombine.low %v4376_v22, %v4376_v22 }
 0x19f   : > { %vm2134_vm15 = vcmask 441344   ;;  %v9976_v49 = vrot.slane %v8555_v50, 4  ;;  %v4672_v53 = vshrl.u32 %v7030_v43, 16  ;;  %v9977_v60 = vrot.slane %v8503_v56, 4 }
 0x1a0   : > { %v9978_v47 = vrot.slane %v8427_v4, 4  ;;  %v2011_v45 = vpop.permute.xlu1 %2010  ;;  %v3671_v50 = vsel %vm3669_vm2, %v7403_v52, 0  ;;  %v7404_v18 = vld [vmem:[#allocation3 + $0xac] ss:$16 sps:$4 sm:$0xff]   ;;  %v7406_v33 = vld [vmem:[#allocation3 + $0xa8] ss:$16 sps:$4 sm:$0xff]   ;;  %4607 = vrot.lane.b32.xlu1 %v7027_v62, %s9975_s0  ;;  %v4662_v4 = vrot.slane %v4657_v1, %v7820_v6  ;;  %v4670_v25 = vrot.slane %v4665_v41, %v7820_v6 }
 0x1a1   : > { %v2687_v34 = vsel %vm622_vm7, %v2684_v55, %v9976_v49  ;;  %v2366_v32 = vsel %vm622_vm7, %v9977_v60, %v2364_v40  ;;  %v2016_v42 = vrot.slane %v2011_v45, 4  ;;  %3685 = vmatpush1.bf16.msra.mxu0 %v3671_v50  ;;  %v1895_v3 = vpop.permute.xlu0 %1894  ;;  %3727 = vmatprep.subr.bf16.mxu1 %v7404_v18  ;;  %v4673_v7 = vpack.i.b16 %v4672_v53, %v4672_v53  ;;  %v8717_v55 = vld [vmem:[#allocation6] sm:$0x88] }
 0x1a2   : > { %v2688_v30 = vsel %vm9902_vm9, %v2679_v23, %v2687_v34  ;;  %v2369_v35 = vsel %vm622_vm7, %v2364_v40, %v9978_v47  ;;  %v2368_v51 = vsel %vm9899_vm13, %v8503_v56, %v2366_v32  ;;  %v1899_v26 = vrot.slane %v1895_v3, 4  ;;  %3728 = vmatpush1.bf16.msra.mxu1 %v7406_v33 }
 0x1a3   : > { %2693 = vst [vmem:[#allocation3 + $0x90] sm:$0xcc] %v2688_v30  ;;  %v2370_v39 = vsel %vm9899_vm13, %v2360_v0, %v2369_v35  ;;  %2373 = vst [vmem:[#allocation3 + $0x80] sm:$0x33] %v2368_v51  ;;  %v4680_v57 = vshrl.u32 %v7031_v24, 16  ;;  %v9979_v2 = vrot.slane %v8574_v63, 4  ;;  %v7011_v56 = vcombine.high %v4375_v27, %v4375_v27 }
 0x1a4   : > { %2374 = vst [vmem:[#allocation3 + $0x88] sm:$0x33] %v2370_v39  ;;  %v4388_v14 = vpack.i.b16 %v7010_v19, %v7010_v19  ;;  %v9980_v31 = vrot.slane %v8511_v61, 4  ;;  %v9981_v23 = vrot.slane %v8454_v17, 4  ;;  %v2244_v38 = vpop.permute.xlu1 %2243  ;;  %v7032_v46 = vcombine.low %v4662_v4, %v4670_v25 }
 0x1a5   : > { %v2019_v15 = vsel %vm622_vm7, %v2016_v42, %v9979_v2  ;;  %v2249_v0 = vrot.slane %v2244_v38, 4  ;;  %v2127_v10 = vpop.permute.xlu0 %2126  ;;  %v7407_v36 = vld [vmem:[#allocation3 + $0xa4] ss:$16 sps:$4 sm:$0xff]   ;;  %v7409_v43 = vld [vmem:[#allocation3 + $0xa0] ss:$16 sps:$4 sm:$0xff]   ;;  %vm1669_vm2 = vcmask 515072   ;;  %v4678_v40 = vrot.slane %v4673_v7, %v7820_v6 }
 0x1a6   : > { %v2021_v8 = vsel %vm2020_vm5, %v2011_v45, %v2019_v15  ;;  %v1901_v48 = vsel %vm622_vm7, %v9980_v31, %v1899_v26  ;;  %v1904_v37 = vsel %vm622_vm7, %v1899_v26, %v9981_v23  ;;  %v2131_v17 = vrot.slane %v2127_v10, 4  ;;  %4697 = vrot.lane.b32.xlu0 %v7032_v46, %s9958_s12  ;;  %3686 = vmatprep.subr.bf16.mxu0 %v7407_v36 }
 0x1a7   : > { %2026 = vst [vmem:[#allocation3 + $0x60] sm:$0xcc] %v2021_v8  ;;  %v1903_v63 = vsel %vm1902_vm4, %v8511_v61, %v1901_v48  ;;  %v1905_v27 = vsel %vm1902_vm4, %v1895_v3, %v1904_v37  ;;  %vm1788_vm13 = vcmask 506880   ;;  %v4681_v52 = vpack.i.b16 %v4680_v57, %v4680_v57  ;;  %3687 = vmatpush1.bf16.msra.mxu0 %v7409_v43 }
 0x1a8   : > { %1908 = vst [vmem:[#allocation3 + $0x60] sm:$0x33] %v1903_v63  ;;  %1909 = vst [vmem:[#allocation3 + $0x68] sm:$0x33] %v1905_v27  ;;  %v4393_v62 = vrot.slane %v4388_v14, %v7826_v12  ;;  %v4395_v1 = vpack.i.b16 %v7011_v56, %v7011_v56  ;;  %v2252_v61 = vsel %vm622_vm7, %v2249_v0, %v2250_v9  ;;  %v9982_v53 = vrot.slane %v8518_v59, 4  ;;  %v8737_v32 = vpop.permute.xlu1 %1429 }
 0x1a9   : > { %v7013_v24 = vcombine.high %v4376_v22, %v4376_v22  ;;  %v4402_v49 = vpack.i.b16 %v7012_v54, %v7012_v54  ;;  %v7016_v34 = vcombine.low %v8717_v55, %v8717_v55  ;;  %v2254_v41 = vsel %vm2253_vm0, %v2244_v38, %v2252_v61  ;;  %v4464_v22 = vld [vmem:[#allocation6 + $0x8] sm:$0x88]  ;;  %v1547_v50 = vpop.permute.xlu0 %1546  ;;  %v4196_v61 = vld [vmem:[#allocation6 + $0x8] sm:$0x44] }
 0x1aa   : > { %v2133_v19 = vsel %vm622_vm7, %v9982_v53, %v2131_v17  ;;  %v9983_v30 = vrot.slane %v8480_v16, 4  ;;  %v3513_v13 = vld [vmem:[#allocation3 + $0x90] sm:$0xff]  ;;  %v4686_v9 = vrot.slane %v4681_v52, %v7820_v6  ;;  %2259 = vst [vmem:[#allocation3 + $0x70] sm:$0xcc] %v2254_v41  ;;  %v1434_v45 = vrot.slane %v8737_v32, 4  ;;  %v3511_v18 = vld [vmem:[#allocation3 + $0x80] sm:$0xff] }
 0x1ab   : > { %v2135_v47 = vsel %vm2134_vm15, %v8518_v59, %v2133_v19  ;;  %v7414_v16 = vld [vmem:[#allocation3 + $0x84] ss:$16 sps:$4 sm:$0xff]   ;;  %v4400_v33 = vrot.slane %v4395_v1, %v7826_v12  ;;  %v1552_v51 = vrot.slane %v1547_v50, 4  ;;  %v7416_v39 = vld [vmem:[#allocation3 + $0x8c] ss:$16 sps:$4 sm:$0xff]   ;;  %v6956_v42 = vcombine.low %v3511_v18, %v3513_v13 }
 0x1ac   : > { %v2136_v60 = vsel %vm622_vm7, %v2131_v17, %v9983_v30  ;;  %2140 = vst [vmem:[#allocation3 + $0x70] sm:$0x33] %v2135_v47  ;;  %v7418_v3 = vld [vmem:[#allocation3 + $0x88] ss:$16 sps:$4 sm:$0xff]   ;;  %v7033_v4 = vcombine.low %v4678_v40, %v4686_v9  ;;  %v4407_v26 = vrot.slane %v4402_v49, %v7826_v12  ;;  %v1436_v59 = vsel %vm622_vm7, %v1433_v29, %v1434_v45  ;;  %v8758_v14 = vpop.permute.xlu1 %1661 }
 0x1ad   : > { %v2137_v35 = vsel %vm2134_vm15, %v2127_v10, %v2136_v60  ;;  %3688 = vmatprep.subr.bf16.mxu0 %v7414_v16  ;;  %v7014_v25 = vcombine.low %v4393_v62, %v4400_v33  ;;  %v4409_v7 = vpack.i.b16 %v7013_v24, %v7013_v24  ;;  %v7017_v57 = vcombine.high %v8717_v55, %v8717_v55  ;;  %v4195_v29 = vld [vmem:[#allocation6] sm:$0x44]  ;;  %v1779_v23 = vpop.permute.xlu0 %1778  ;;  %v4284_v16 = vld [vmem:[#allocation6 + $0x8] sm:$0x44] }
 0x1ae   : > { %2141 = vst [vmem:[#allocation3 + $0x78] sm:$0x33] %v2137_v35  ;;  %v1438_v2 = vsel %vm9913_vm3, %v8594_v21, %v1436_v59  ;;  %v9984_v15 = vrot.slane %v8535_v44, 4  ;;  %3729 = vmatprep.subr.bf16.mxu1 %v7416_v39  ;;  %3689 = vmatpush1.bf16.msra.mxu0 %v6956_v42  ;;  %v4476_v54 = vshrl.u32 %v7016_v34, 16  ;;  %v7018_v8 = vcombine.low %v4464_v22, %v4464_v22 }
 0x1af   : > { %1443 = vst [vmem:[#allocation3 + $0x40] sm:$0x33] %v1438_v2  ;;  %v1666_v48 = vrot.slane %v8758_v14, 4  ;;  %3730 = vmatpush1.bf16.msra.mxu1 %v7418_v3  ;;  %4699 = vrot.lane.b32.xlu1 %v7033_v4, %s9958_s12  ;;  %v4414_v21 = vrot.slane %v4409_v7, %v7826_v12  ;;  %v4484_v37 = vshrl.u32 %v7017_v57, 16  ;;  %v1784_v38 = vrot.slane %v1779_v23, 4 }
 0x1b0   : > { %v1555_v56 = vsel %vm622_vm7, %v1552_v51, %v9984_v15  ;;  %4425 = vrot.lane.b32.xlu0 %v7014_v25, %s9985_s1  ;;  %v4477_v46 = vpack.i.b16 %v4476_v54, %v4476_v54  ;;  %v7019_v55 = vcombine.high %v4464_v22, %v4464_v22  ;;  %v4492_v63 = vshrl.u32 %v7018_v8, 16  ;;  %v8775_v52 = vpop.permute.xlu1 %963  ;;  %v4016_v3 = vld [vmem:[#allocation6 + $0x8] sm:$0x22] }
 0x1b1   : > { %v1556_v31 = vsel %vm1515_vm6, %v1547_v50, %v1555_v56  ;;  %v1668_v27 = vsel %vm622_vm7, %v1665_v20, %v1666_v48  ;;  %v7015_v0 = vcombine.low %v4407_v26, %v4414_v21  ;;  %v4485_v10 = vpack.i.b16 %v4484_v37, %v4484_v37  ;;  %v962_v49 = vpop.permute.xlu0 %961 }
 0x1b2   : > { %1561 = vst [vmem:[#allocation3 + $0x40] sm:$0xcc] %v1556_v31  ;;  %v6998_v36 = vcombine.low %v4195_v29, %v4195_v29  ;;  %v1670_v43 = vsel %vm1669_vm2, %v8607_v58, %v1668_v27  ;;  %v9986_v40 = vrot.slane %v8565_v28, 4  ;;  %v4482_v62 = vrot.slane %v4477_v46, %v7826_v12 }
 0x1b3   : > { %v4493_v1 = vpack.i.b16 %v4492_v63, %v4492_v63  ;;  %1675 = vst [vmem:[#allocation3 + $0x50] sm:$0x33] %v1670_v43  ;;  %v968_v20 = vrot.slane %v8775_v52, 4  ;;  %v7419_v34 = vld [vmem:[#allocation3 + $0x64] ss:$16 sps:$4 sm:$0xff]   ;;  %4427 = vrot.lane.b32.xlu1 %v7015_v0, %s9985_s1  ;;  %v4490_v58 = vrot.slane %v4485_v10, %v7826_v12  ;;  %v4500_v41 = vshrl.u32 %v7019_v55, 16 }
 0x1b4   : > { %v1787_v17 = vsel %vm622_vm7, %v1784_v38, %v9986_v40  ;;  %v967_v53 = vrot.slane %v962_v49, 4  ;;  %v7423_v30 = vld [vmem:[#allocation3 + $0x60] ss:$16 sps:$4 sm:$0xff]   ;;  %v6999_v13 = vcombine.high %v4195_v29, %v4195_v29  ;;  %v4208_v9 = vpack.i.b16 %v6998_v36, %v6998_v36  ;;  %3690 = vmatprep.subr.bf16.mxu0 %v7419_v34  ;;  %v8786_v51 = vpop.permute.xlu1 %1082 }
 0x1b5   : > { %v1789_v24 = vsel %vm1788_vm13, %v1779_v23, %v1787_v17  ;;  %v7421_v19 = vld [vmem:[#allocation3 + $0x6c] ss:$16 sps:$4 sm:$0xff]   ;;  %v4498_v60 = vrot.slane %v4493_v1, %v7826_v12  ;;  %v7424_v22 = vld [vmem:[#allocation3 + $0x68] ss:$16 sps:$4 sm:$0xff]   ;;  %v7020_v47 = vcombine.low %v4482_v62, %v4490_v58  ;;  %v4501_v35 = vpack.i.b16 %v4500_v41, %v4500_v41  ;;  %3691 = vmatpush1.bf16.msra.mxu0 %v7423_v30  ;;  %v1081_v59 = vpop.permute.xlu0 %1080  ;;  %v4104_v55 = vld [vmem:[#allocation6 + $0x8] sm:$0x22] }
 0x1b6   : > { %1794 = vst [vmem:[#allocation3 + $0x50] sm:$0xcc] %v1789_v24  ;;  %v7000_v50 = vcombine.low %v4196_v61, %v4196_v61  ;;  %v7001_v18 = vcombine.high %v4196_v61, %v4196_v61  ;;  %v970_v33 = vsel %vm622_vm7, %v967_v53, %v968_v20  ;;  %3731 = vmatprep.subr.bf16.mxu1 %v7421_v19  ;;  %v1087_v26 = vrot.slane %v8786_v51, 4 }
 0x1b7   : > { %v4213_v39 = vrot.slane %v4208_v9, %v7824_v11  ;;  %v4215_v42 = vpack.i.b16 %v6999_v13, %v6999_v13  ;;  %v972_v4 = vsel %vm9907_vm12, %v962_v49, %v970_v33  ;;  %3732 = vmatpush1.bf16.msra.mxu1 %v7424_v22  ;;  %4517 = vrot.lane.b32.xlu0 %v7020_v47, %s9987_s15  ;;  %v1086_v57 = vrot.slane %v1081_v59, 4 }
 0x1b8   : > { %v4506_v25 = vrot.slane %v4501_v35, %v7826_v12  ;;  %v4222_v7 = vpack.i.b16 %v7000_v50, %v7000_v50  ;;  %977 = vst [vmem:[#allocation3 + $0x20] sm:$0x33] %v972_v4  ;;  %v4229_v15 = vpack.i.b16 %v7001_v18, %v7001_v18  ;;  %v7006_v56 = vcombine.low %v4284_v16, %v4284_v16  ;;  %v8798_v21 = vpop.permute.xlu1 %1196 }
 0x1b9   : > { %v4220_v2 = vrot.slane %v4215_v42, %v7824_v11  ;;  %v7007_v29 = vcombine.high %v4284_v16, %v4284_v16  ;;  %v6988_v31 = vcombine.low %v4016_v3, %v4016_v3  ;;  %v1089_v23 = vsel %vm622_vm7, %v1086_v57, %v1087_v26  ;;  %v1195_v0 = vpop.permute.xlu0 %1194 }
 0x1ba   : > { %v7021_v54 = vcombine.low %v4498_v60, %v4506_v25  ;;  %v4227_v8 = vrot.slane %v4222_v7, %v7824_v11  ;;  %v4234_v38 = vrot.slane %v4229_v15, %v7824_v11  ;;  %v4312_v46 = vshrl.u32 %v7006_v56, 16 }
 0x1bb   : > { %v7002_v37 = vcombine.low %v4213_v39, %v4220_v2  ;;  %v1091_v63 = vsel %vm9901_vm1, %v1081_v59, %v1089_v23  ;;  %v1201_v27 = vrot.slane %v8798_v21, 4  ;;  %v6989_v43 = vcombine.high %v4016_v3, %v4016_v3 }
 0x1bc   : > { %4519 = vrot.lane.b32.xlu1 %v7021_v54, %s9987_s15  ;;  %v4042_v40 = vpack.i.b16 %v6988_v31, %v6988_v31  ;;  %1096 = vst [vmem:[#allocation3 + $0x20] sm:$0xcc] %v1091_v63  ;;  %v1200_v17 = vrot.slane %v1195_v0, 4  ;;  %v7003_v62 = vcombine.low %v4227_v8, %v4234_v38  ;;  %v4313_v1 = vpack.i.b16 %v4312_v46, %v4312_v46  ;;  %v8808_v41 = vpop.permute.xlu1 %1315 }
 0x1bd   : > { %v7425_v10 = vld [vmem:[#allocation3 + $0x44] ss:$16 sps:$4 sm:$0xff]   ;;  %v7427_v36 = vld [vmem:[#allocation3 + $0x40] ss:$16 sps:$4 sm:$0xff]   ;;  %4245 = vrot.lane.b32.xlu0 %v7002_v37, %s9988_s22  ;;  %v4320_v61 = vshrl.u32 %v7007_v29, 16  ;;  %v4049_v24 = vpack.i.b16 %v6989_v43, %v6989_v43  ;;  %v6994_v49 = vcombine.low %v4104_v55, %v4104_v55  ;;  %v6995_v34 = vcombine.high %v4104_v55, %v4104_v55  ;;  %v1314_v13 = vpop.permute.xlu0 %1313 }
 0x1be   : > { %3692 = vmatprep.subr.bf16.mxu0 %v7425_v10  ;;  %v1203_v58 = vsel %vm622_vm7, %v1200_v17, %v1201_v27  ;;  %v4318_v53 = vrot.slane %v4313_v1, %v7824_v11  ;;  %v1320_v60 = vrot.slane %v8808_v41, 4  ;;  %v4047_v9 = vrot.slane %v4042_v40, %v7818_v5 }
 0x1bf   : > { %3693 = vmatpush1.bf16.msra.mxu0 %v7427_v36  ;;  %v4321_v19 = vpack.i.b16 %v4320_v61, %v4320_v61  ;;  %v1205_v30 = vsel %vm9912_vm10, %v1195_v0, %v1203_v58  ;;  %v4132_v22 = vshrl.u32 %v6994_v49, 16  ;;  %v1319_v47 = vrot.slane %v1314_v13, 4 }
 0x1c0   : > { %4247 = vrot.lane.b32.xlu1 %v7003_v62, %s9988_s22  ;;  %1210 = vst [vmem:[#allocation3 + $0x30] sm:$0x33] %v1205_v30  ;;  %v4054_v50 = vrot.slane %v4049_v24, %v7818_v5  ;;  %v4140_v18 = vshrl.u32 %v6995_v34, 16  ;;  %v1551_v39 = vpop.permute.xlu1 %1550  ;;  %v9990_v56 = vrot.slane %v8535_v44, 4  ;;  %v9992_v63 = vrot.slane %v8565_v28, 4 }
 0x1c1   : > { %v4326_v35 = vrot.slane %v4321_v19, %v7824_v11  ;;  %v4133_v16 = vpack.i.b16 %v4132_v22, %v4132_v22  ;;  %v1322_v33 = vsel %vm622_vm7, %v1319_v47, %v1320_v60  ;;  %v1554_v59 = vrot.slane %v1551_v39, 4  ;;  %v1432_v25 = vpop.permute.xlu0 %1431 }
 0x1c2   : > { %v4141_v3 = vpack.i.b16 %v4140_v18, %v4140_v18  ;;  %v1324_v4 = vsel %vm9911_vm11, %v1314_v13, %v1322_v33  ;;  %v1435_v7 = vrot.slane %v1432_v25, 4  ;;  %v6991_v57 = vcombine.low %v4047_v9, %v4054_v50 }
 0x1c3   : > { %v7009_v42 = vcombine.low %v4318_v53, %v4326_v35  ;;  %1329 = vst [vmem:[#allocation3 + $0x30] sm:$0xcc] %v1324_v4  ;;  %v4138_v2 = vrot.slane %v4133_v16, %v7818_v5  ;;  %v1557_v54 = vsel %vm622_vm7, %v9990_v56, %v1554_v59 }
 0x1c4   : > { %v4146_v15 = vrot.slane %v4141_v3, %v7818_v5  ;;  %v1558_v8 = vsel %vm1515_vm6, %v8535_v44, %v1557_v54  ;;  %v1439_v29 = vsel %vm622_vm7, %v1434_v45, %v1435_v7  ;;  %v1783_v31 = vpop.permute.xlu1 %1782 }
 0x1c5   : > { %4339 = vrot.lane.b32.xlu1 %v7009_v42, %s9989_s24  ;;  %1562 = vst [vmem:[#allocation3 + $0x48] sm:$0xcc] %v1558_v8  ;;  %v1440_v23 = vsel %vm9913_vm3, %v8737_v32, %v1439_v29  ;;  %v1786_v37 = vrot.slane %v1783_v31, 4  ;;  %v1664_v38 = vpop.permute.xlu0 %1663  ;;  %vm10001_vm3 = vcmask 80896  }
 0x1c6   : > { %1444 = vst [vmem:[#allocation3 + $0x48] sm:$0x33] %v1440_v23  ;;  %v1667_v46 = vrot.slane %v1664_v38, 4  ;;  %v6997_v55 = vcombine.low %v4138_v2, %v4146_v15 }
 0x1c7   : > { %v1790_v44 = vsel %vm622_vm7, %v9992_v63, %v1786_v37 }
 0x1c8   : > { %v1791_v0 = vsel %vm1788_vm13, %v8565_v28, %v1790_v44  ;;  %v1671_v45 = vsel %vm622_vm7, %v1666_v48, %v1667_v46  ;;  %v8843_v10 = vpop.permute.xlu1 %615 }
 0x1c9   : > { %4067 = vrot.lane.b32.xlu1 %v6991_v57, %s9991_s3  ;;  %1795 = vst [vmem:[#allocation3 + $0x58] sm:$0xcc] %v1791_v0  ;;  %v1672_v32 = vsel %vm1669_vm2, %v8758_v14, %v1671_v45  ;;  %v614_v36 = vpop.permute.xlu0 %613  ;;  %v620_v17 = vrot.slane %v8843_v10, 4 }
 0x1ca   : > { %v7428_v43 = vld [vmem:[#allocation3 + $0x24] ss:$16 sps:$4 sm:$0xff]   ;;  %v7430_v40 = vld [vmem:[#allocation3 + $0x20] ss:$16 sps:$4 sm:$0xff]   ;;  %1676 = vst [vmem:[#allocation3 + $0x58] sm:$0x33] %v1672_v32 }
 0x1cb   : > { %v619_v62 = vrot.slane %v614_v36, 4  ;;  %3694 = vmatprep.subr.bf16.mxu0 %v7428_v43 }
 0x1cc   : > { %v731_v1 = vpop.permute.xlu1 %730  ;;  %3695 = vmatpush1.bf16.msra.mxu0 %v7430_v40 }
 0x1cd   : > { %4159 = vrot.lane.b32.xlu1 %v6997_v55, %s9993_s4  ;;  %v623_v28 = vsel %vm622_vm7, %v619_v62, %v620_v17  ;;  %v729_v61 = vpop.permute.xlu0 %728  ;;  %v735_v24 = vrot.slane %v731_v1, 4 }
 0x1ce   : > { %v625_v48 = vsel %vm9902_vm9, %v614_v36, %v623_v28  ;;  %v734_v14 = vrot.slane %v729_v61, 4 }
 0x1cf   : > { %630 = vst [vmem:[#allocation3] sm:$0xcc] %v625_v48 }
 0x1d0   : > { %v737_v49 = vsel %vm622_vm7, %v734_v14, %v735_v24  ;;  %v850_v34 = vpop.permute.xlu1 %849 }
 0x1d1   : > { %v739_v58 = vsel %vm9906_vm8, %v729_v61, %v737_v49  ;;  %v848_v53 = vpop.permute.xlu0 %847  ;;  %v7431_v19 = vld [vmem:[#allocation3 + $0x4c] ss:$16 sps:$4 sm:$0xff]   ;;  %v7433_v30 = vld [vmem:[#allocation3 + $0x48] ss:$16 sps:$4 sm:$0xff]   ;;  %v854_v13 = vrot.slane %v850_v34, 4 }
 0x1d2   : > { %744 = vst [vmem:[#allocation3 + $0x10] sm:$0x33] %v739_v58  ;;  %v853_v9 = vrot.slane %v848_v53, 4  ;;  %3733 = vmatprep.subr.bf16.mxu1 %v7431_v19  ;;  %v3924_v58 = vld [vmem:[#allocation6 + $0x8] sm:$0x11] }
 0x1d3   : > { %3734 = vmatpush1.bf16.msra.mxu1 %v7433_v30 }
 0x1d4   : > { %v856_v22 = vsel %vm622_vm7, %v853_v9, %v854_v13  ;;  %v1085_v47 = vpop.permute.xlu1 %1084  ;;  %v4283_v9 = vld [vmem:[#allocation6] sm:$0x44] }
 0x1d5   : > { %v858_v35 = vsel %vm9903_vm14, %v848_v53, %v856_v22  ;;  %v1088_v50 = vrot.slane %v1085_v47, 4  ;;  %v966_v18 = vpop.permute.xlu0 %965  ;;  %v6982_v47 = vcombine.low %v3924_v58, %v3924_v58 }
 0x1d6   : > { %863 = vst [vmem:[#allocation3 + $0x10] sm:$0xcc] %v858_v35  ;;  %v969_v16 = vrot.slane %v966_v18, 4  ;;  %v6983_v35 = vcombine.high %v3924_v58, %v3924_v58  ;;  %v7004_v18 = vcombine.low %v4283_v9, %v4283_v9 }
 0x1d7   : > { %v1092_v33 = vsel %vm622_vm7, %v1087_v26, %v1088_v50 }
 0x1d8   : > { %v1093_v39 = vsel %vm9901_vm1, %v8786_v51, %v1092_v33  ;;  %v973_v42 = vsel %vm622_vm7, %v968_v20, %v969_v16  ;;  %v1318_v3 = vpop.permute.xlu1 %1317  ;;  %vm3665_vm1 = vcmask 883712   ;;  %v7005_v16 = vcombine.high %v4283_v9, %v4283_v9  ;;  %v4103_v33 = vld [vmem:[#allocation6] sm:$0x22] }
 0x1d9   : > { %1097 = vst [vmem:[#allocation3 + $0x28] sm:$0xcc] %v1093_v39  ;;  %v974_v4 = vsel %vm9907_vm12, %v8775_v52, %v973_v42  ;;  %v1321_v59 = vrot.slane %v1318_v3, 4  ;;  %v1199_v25 = vpop.permute.xlu0 %1198  ;;  %v3952_v39 = vshrl.u32 %v6982_v47, 16  ;;  %v3960_v42 = vshrl.u32 %v6983_v35, 16 }
 0x1da   : > { %978 = vst [vmem:[#allocation3 + $0x28] sm:$0x33] %v974_v4  ;;  %v1202_v7 = vrot.slane %v1199_v25, 4  ;;  %v4015_v3 = vld [vmem:[#allocation6] sm:$0x22]  ;;  %v6993_v25 = vcombine.high %v4103_v33, %v4103_v33  ;;  %vm10000_vm12 = vcmask 72704  }
 0x1db   : > { %v1325_v26 = vsel %vm622_vm7, %v1320_v60, %v1321_v59  ;;  %v6146_v4 = vld [vmem:[#allocation6 + $0x38] sm:$0x22]  ;;  %v6992_v59 = vcombine.low %v4103_v33, %v4103_v33 }
 0x1dc   : > { %v1326_v51 = vsel %vm9911_vm11, %v8808_v41, %v1325_v26  ;;  %v1206_v20 = vsel %vm622_vm7, %v1201_v27, %v1202_v7  ;;  %v733_v57 = vpop.permute.xlu1 %732  ;;  %v3494_v27 = vld [vmem:[%s9798_s2] sm:$0xf]  ;;  %v4296_v7 = vshrl.u32 %v7004_v18, 16  ;;  %v4304_v26 = vshrl.u32 %v7005_v16, 16  ;;  %v5874_v18 = vld [vmem:[#allocation6 + $0x28] sm:$0x88] }
 0x1dd   : > { %1330 = vst [vmem:[#allocation3 + $0x38] sm:$0xcc] %v1326_v51  ;;  %v1207_v52 = vsel %vm9912_vm10, %v8798_v21, %v1206_v20  ;;  %v736_v2 = vrot.slane %v733_v57, 4  ;;  %v618_v15 = vpop.permute.xlu0 %617  ;;  %v7438_v56 = vld [vmem:[#allocation3 + $0x4] ss:$16 sps:$4 sm:$0xff]   ;;  %v6986_v20 = vcombine.low %v4015_v3, %v4015_v3  ;;  %v6987_v57 = vcombine.high %v4015_v3, %v4015_v3 }
 0x1de   : > { %v7440_v54 = vld [vmem:[#allocation3] ss:$16 sps:$4 sm:$0xff]   ;;  %1211 = vst [vmem:[#allocation3 + $0x38] sm:$0x33] %v1207_v52  ;;  %v621_v8 = vrot.slane %v618_v15, 4  ;;  %3696 = vmatprep.subr.bf16.mxu0 %v7438_v56  ;;  %v3961_v15 = vpack.i.b16 %v3960_v42, %v3960_v42  ;;  %v7132_v56 = vcombine.low %v6146_v4, %v6146_v4 }
 0x1df   : > { %v740_v60 = vsel %vm622_vm7, %v735_v24, %v736_v2  ;;  %3697 = vmatpush1.bf16.msra.mxu0 %v7440_v54  ;;  %v5966_v51 = vld [vmem:[#allocation6 + $0x38] sm:$0x11]  ;;  %v3923_v52 = vld [vmem:[#allocation6] sm:$0x11]  ;;  %v3953_v2 = vpack.i.b16 %v3952_v39, %v3952_v39  ;;  %v7133_v54 = vcombine.high %v6146_v4, %v6146_v4  ;;  %v6145_v39 = vld [vmem:[#allocation6 + $0x30] sm:$0x22] }
 0x1e0   : > { %v741_v41 = vsel %vm9906_vm8, %v731_v1, %v740_v60  ;;  %v626_v29 = vsel %vm622_vm7, %v620_v17, %v621_v8  ;;  %v6054_v8 = vld [vmem:[#allocation6 + $0x38] sm:$0x11]  ;;  %v4116_v60 = vshrl.u32 %v6992_v59, 16 }
 0x1e1   : > { %745 = vst [vmem:[#allocation3 + $0x18] sm:$0x33] %v741_v41  ;;  %v627_v21 = vsel %vm9902_vm9, %v8843_v10, %v626_v29  ;;  %v852_v31 = vpop.permute.xlu0 %851  ;;  %v4124_v41 = vshrl.u32 %v6993_v25, 16  ;;  %v7120_v29 = vcombine.low %v5966_v51, %v5966_v51  ;;  %vm3828_vm9 = vcmask 146436  }
 0x1e2   : > { %631 = vst [vmem:[#allocation3 + $0x8] sm:$0xcc] %v627_v21  ;;  %v855_v23 = vrot.slane %v852_v31, 4  ;;  %6969 = vmatmul.mubr.msk.bf16.vlgmr.msra.gmra.mxu0 %vm3665_vm1, %v3494_v27  ;;  %v4297_v21 = vpack.i.b16 %v4296_v7, %v4296_v7  ;;  %v4305_v31 = vpack.i.b16 %v4304_v26, %v4304_v26 }
 0x1e4   : > { %v859_v37 = vsel %vm622_vm7, %v854_v13, %v855_v23  ;;  %v6980_v23 = vcombine.low %v3923_v52, %v3923_v52 }
 0x1e5   : > { %v860_v38 = vsel %vm9903_vm14, %v850_v34, %v859_v37  ;;  %v7441_v46 = vld [vmem:[#allocation3 + $0x2c] ss:$16 sps:$4 sm:$0xff]   ;;  %v7443_v55 = vld [vmem:[#allocation3 + $0x28] ss:$16 sps:$4 sm:$0xff]   ;;  %v6981_v37 = vcombine.high %v3923_v52, %v3923_v52 }
 0x1e6   : > { %864 = vst [vmem:[#allocation3 + $0x18] sm:$0xcc] %v860_v38  ;;  %3735 = vmatprep.subr.bf16.mxu1 %v7441_v46  ;;  %v4028_v38 = vpack.i.b16 %v6986_v20, %v6986_v20  ;;  %v4035_v46 = vpack.i.b16 %v6987_v57, %v6987_v57  ;;  %v7114_v20 = vcombine.low %v5874_v18, %v5874_v18 }
 0x1e7   : > { %3736 = vmatpush1.bf16.msra.mxu1 %v7443_v55  ;;  %v7126_v55 = vcombine.low %v6054_v8, %v6054_v8  ;;  %v7115_v57 = vcombine.high %v5874_v18, %v5874_v18  ;;  %v5785_v18 = vld [vmem:[#allocation6 + $0x20] sm:$0x88] }
 0x1e9   : > { %v3527_v36 = vpop.permute.xlu1 %3526 }
 0x1ed   : > { %v7444_v63 = vld [vmem:[#allocation3 + $0xc] ss:$16 sps:$4 sm:$0xff]   ;;  %v7446_v44 = vld [vmem:[#allocation3 + $0x8] ss:$16 sps:$4 sm:$0xff]  }
 0x1ee   : > { %3737 = vmatprep.subr.bf16.mxu1 %v7444_v63  ;;  %v7127_v63 = vcombine.high %v6054_v8, %v6054_v8 }
 0x1ef   : > { %3738 = vmatpush1.bf16.msra.mxu1 %v7446_v44  ;;  %v3958_v44 = vrot.slane %v3953_v2, %v7820_v6 }
 0x1f0   : > { %v6090_v58 = vshrl.u32 %v7127_v63, 16 }
 0x1f2   : > { %6971 = vmatmul.mubr.msk.bf16.vlgmr.msra.gmra.mxu1 %vm3665_vm1, %v3494_v27  ;;  %v7121_v27 = vcombine.high %v5966_v51, %v5966_v51  ;;  %v6091_v25 = vpack.i.b16 %v6090_v58, %v6090_v58  ;;  %v5965_v51 = vld [vmem:[#allocation6 + $0x30] sm:$0x11]  ;;  %vm3827_vm1 = vcmask 1044040  }
 0x1f3   : > { %vm3829_vm14 = vmor %vm3828_vm9, %vm3827_vm1 }
 0x2a2   : > { %v3716_v0 = vpop.f32.mrf.mxu0 }
 0x2a3   : > { %v8887_v43 = vadd.f32 %v3716_v0, %v3527_v36  ;;  %v3966_v0 = vrot.slane %v3961_v15, %v7820_v6  ;;  %v7130_v15 = vcombine.low %v6145_v39, %v6145_v39 }
 0x2a4   : > { %v3718_v45 = vpop.f32.mrf.mxu0 }
 0x2a5   : > { %v8889_v40 = vadd.f32 %v3718_v45, %v3527_v36  ;;  %v3770_v17 = vmul.f32 %v8887_v43, %v8887_v43  ;;  %v6172_v45 = vpack.i.b16 %v7132_v56, %v7132_v56  ;;  %v7131_v56 = vcombine.high %v6145_v39, %v6145_v39 }
 0x2a6   : > { %v3720_v10 = vpop.f32.mrf.mxu0  ;;  %v6158_v63 = vpack.i.b16 %v7130_v15, %v7130_v15 }
 0x2a7   : > { %v3771_v62 = vmul.f32 %v8889_v40, %v8889_v40  ;;  %v3764_v48 = vadd.f32 %v8889_v40, %v8887_v43  ;;  %v6179_v10 = vpack.i.b16 %v7133_v54, %v7133_v54 }
 0x2a8   : > { %v3721_v32 = vpop.f32.mrf.mxu0 }
 0x2a9   : > { %v3774_v34 = vadd.f32 %v3771_v62, %v3770_v17  ;;  %v4117_v32 = vpack.i.b16 %v4116_v60, %v4116_v60  ;;  %v5992_v17 = vpack.i.b16 %v7120_v29, %v7120_v29  ;;  %v5999_v62 = vpack.i.b16 %v7121_v27, %v7121_v27  ;;  %v6053_v29 = vld [vmem:[#allocation6 + $0x30] sm:$0x11] }
 0x2aa   : > { %v6184_v9 = vrot.slane %v6179_v10, %v7818_v5 }
 0x2ab   : > { %v5997_v35 = vrot.slane %v5992_v17, %v7820_v6 }
 0x2b2   : > { %v3757_v28 = vpop.f32.mrf.mxu1 }
 0x2b3   : > { %v8895_v1 = vadd.f32 %v3757_v28, %v3527_v36  ;;  %v4302_v28 = vrot.slane %v4297_v21, %v7824_v11  ;;  %v6096_v21 = vrot.slane %v6091_v25, %v7820_v6 }
 0x2b4   : > { %v3759_v61 = vpop.f32.mrf.mxu1 }
 0x2b5   : > { %v3765_v24 = vadd.f32 %v3764_v48, %v8895_v1  ;;  %v3772_v14 = vmul.f32 %v8895_v1, %v8895_v1  ;;  %v8902_v49 = vadd.f32 %v3759_v61, %v3527_v36  ;;  %v4125_v36 = vpack.i.b16 %v4124_v41, %v4124_v41 }
 0x2b6   : > { %v3761_v53 = vpop.f32.mrf.mxu1  ;;  %v3936_v48 = vshrl.u32 %v6980_v23, 16  ;;  %v3944_v61 = vshrl.u32 %v6981_v37, 16  ;;  %v7119_v23 = vcombine.high %v5965_v51, %v5965_v51  ;;  %v5606_v37 = vld [vmem:[#allocation6 + $0x28] sm:$0x44] }
 0x2b7   : > { %v3773_v19 = vmul.f32 %v8902_v49, %v8902_v49  ;;  %v3766_v30 = vadd.f32 %v3765_v24, %v8902_v49  ;;  %v3775_v13 = vadd.f32 %v3774_v34, %v3772_v14  ;;  %v4310_v24 = vrot.slane %v4305_v31, %v7824_v11  ;;  %v5786_v53 = vld [vmem:[#allocation6 + $0x28] sm:$0x88] }
 0x2b8   : > { %v3762_v22 = vpop.f32.mrf.mxu1  ;;  %v4033_v14 = vrot.slane %v4028_v38, %v7818_v5  ;;  %v6082_v34 = vshrl.u32 %v7126_v55, 16  ;;  %v8919_v47 = vrot.slane %v4125_v36, %v7818_v5  ;;  %v3937_v16 = vpack.i.b16 %v3936_v48, %v3936_v48  ;;  %v5694_v55 = vld [vmem:[#allocation6 + $0x28] sm:$0x44] }
 0x2b9   : > { %3767 = vadd.xlane.f32.xlu0 %v3766_v30  ;;  %v3776_v50 = vadd.f32 %v3775_v13, %v3773_v19  ;;  %v6985_v19 = vcombine.low %v3958_v44, %v3966_v0  ;;  %v4040_v30 = vrot.slane %v4035_v46, %v7818_v5  ;;  %v6177_v13 = vrot.slane %v6172_v45, %v7818_v5 }
 0x2ba   : > { %v8916_v22 = vrot.slane %v4117_v32, %v7818_v5  ;;  %v3945_v33 = vpack.i.b16 %v3944_v61, %v3944_v61  ;;  %v7108_v42 = vcombine.low %v5786_v53, %v5786_v53  ;;  %v7109_v3 = vcombine.high %v5786_v53, %v5786_v53 }
 0x2bb   : > { %3777 = vadd.xlane.f32.xlu1 %v3776_v50  ;;  %v6004_v50 = vrot.slane %v5999_v62, %v7820_v6  ;;  %v7008_v4 = vcombine.low %v4302_v28, %v4310_v24  ;;  %v6083_v59 = vpack.i.b16 %v6082_v34, %v6082_v34  ;;  %v6990_v7 = vcombine.low %v4033_v14, %v4040_v30 }
 0x2bc   : > { %v7135_v26 = vcombine.low %v6177_v13, %v6184_v9  ;;  %v6996_v52 = vcombine.low %v8916_v22, %v8919_v47  ;;  %v8927_v54 = vrot.slane %v3937_v16, %v7820_v6  ;;  %v8930_v8 = vrot.slane %v3945_v33, %v7820_v6  ;;  %v5514_v9 = vld [vmem:[#allocation6 + $0x28] sm:$0x22] }
 0x2bd   : > { %v7123_v2 = vcombine.low %v5997_v35, %v6004_v50  ;;  %v5812_v60 = vpack.i.b16 %v7108_v42, %v7108_v42  ;;  %v5819_v41 = vpack.i.b16 %v7109_v3, %v7109_v3  ;;  %v6088_v27 = vrot.slane %v6083_v59, %v7820_v6  ;;  %v5873_v3 = vld [vmem:[#allocation6 + $0x20] sm:$0x88] }
 0x2be   : > { %v7118_v31 = vcombine.low %v5965_v51, %v5965_v51  ;;  %v5902_v38 = vshrl.u32 %v7114_v20, 16  ;;  %v5910_v46 = vshrl.u32 %v7115_v57, 16  ;;  %v6165_v44 = vpack.i.b16 %v7131_v56, %v7131_v56 }
 0x2bf   : > { %v7124_v0 = vcombine.low %v6053_v29, %v6053_v29  ;;  %v7125_v45 = vcombine.high %v6053_v29, %v6053_v29  ;;  %v5817_v10 = vrot.slane %v5812_v60, %v7826_v12  ;;  %v5824_v32 = vrot.slane %v5819_v41, %v7826_v12 }
 0x2c0   : > { %v7096_v36 = vcombine.low %v5606_v37, %v5606_v37  ;;  %v7097_v17 = vcombine.high %v5606_v37, %v5606_v37  ;;  %v9995_v62 = vmov 0   ;;  %v5978_v28 = vpack.i.b16 %v7118_v31, %v7118_v31 }
 0x2c1   : > { %3830 = vst.msk [vmem:[#allocation4 + $0x10] sm:$0xff] %vm3829_vm14, %v9995_v62  ;;  %v5985_v48 = vpack.i.b16 %v7119_v23, %v7119_v23  ;;  %v7102_v61 = vcombine.low %v5694_v55, %v5694_v55  ;;  %v7103_v24 = vcombine.high %v5694_v55, %v5694_v55  ;;  %v7129_v14 = vcombine.low %v6088_v27, %v6096_v21  ;;  %v5276_v21 = vld [vmem:[#allocation6 + $0x28] sm:$0x11] }
 0x2c2   : > { %v5903_v34 = vpack.i.b16 %v5902_v38, %v5902_v38  ;;  %v5911_v58 = vpack.i.b16 %v5910_v46, %v5910_v46  ;;  %v6984_v53 = vcombine.low %v8927_v54, %v8930_v8  ;;  %v6066_v30 = vshrl.u32 %v7124_v0, 16  ;;  %v5364_v46 = vld [vmem:[#allocation6 + $0x28] sm:$0x11] }
 0x2c3   : > { %v6074_v13 = vshrl.u32 %v7125_v45, 16  ;;  %v6170_v22 = vrot.slane %v6165_v44, %v7818_v5  ;;  %v7111_v47 = vcombine.low %v5817_v10, %v5824_v32  ;;  %v5632_v35 = vpack.i.b16 %v7096_v36, %v7096_v36  ;;  %v5605_v45 = vld [vmem:[#allocation6 + $0x20] sm:$0x44] }
 0x2c4   : > { %v5639_v50 = vpack.i.b16 %v7097_v17, %v7097_v17  ;;  %v5983_v16 = vrot.slane %v5978_v28, %v7820_v6  ;;  %v5990_v33 = vrot.slane %v5985_v48, %v7820_v6  ;;  %v5722_v39 = vshrl.u32 %v7102_v61, 16  ;;  %v5693_v36 = vld [vmem:[#allocation6 + $0x20] sm:$0x44] }
 0x2c5   : > { %v5730_v42 = vshrl.u32 %v7103_v24, 16  ;;  %v5916_v59 = vrot.slane %v5911_v58, %v7826_v12  ;;  %v7090_v25 = vcombine.low %v5514_v9, %v5514_v9  ;;  %v6075_v51 = vpack.i.b16 %v6074_v13, %v6074_v13 }
 0x2c6   : > { %v7106_v20 = vcombine.low %v5785_v18, %v5785_v18  ;;  %v7107_v57 = vcombine.high %v5785_v18, %v5785_v18  ;;  %v7112_v15 = vcombine.low %v5873_v3, %v5873_v3  ;;  %v7113_v56 = vcombine.high %v5873_v3, %v5873_v3 }
 0x2c7   : > { %v5723_v8 = vpack.i.b16 %v5722_v39, %v5722_v39  ;;  %v5731_v60 = vpack.i.b16 %v5730_v42, %v5730_v42  ;;  %v5542_v29 = vshrl.u32 %v7090_v25, 16  ;;  %v7122_v31 = vcombine.low %v5983_v16, %v5990_v33  ;;  %v5513_v16 = vld [vmem:[#allocation6 + $0x20] sm:$0x22]  ;;  %v8965_v33 = vpop.permute.xlu1 %3806 }
 0x2c8   : > { %v6080_v37 = vrot.slane %v6075_v51, %v7820_v6  ;;  %v5798_v38 = vpack.i.b16 %v7106_v20, %v7106_v20  ;;  %v5886_v44 = vshrl.u32 %v7112_v15, 16  ;;  %v5894_v0 = vshrl.u32 %v7113_v56, 16 }
 0x2c9   : > { %v5728_v10 = vrot.slane %v5723_v8, %v7824_v11  ;;  %v5736_v32 = vrot.slane %v5731_v60, %v7824_v11  ;;  %v7072_v17 = vcombine.low %v5276_v21, %v5276_v21  ;;  %v7073_v28 = vcombine.high %v5276_v21, %v5276_v21 }
 0x2ca   : > { %v5543_v48 = vpack.i.b16 %v5542_v29, %v5542_v29  ;;  %v7078_v24 = vcombine.low %v5364_v46, %v5364_v46  ;;  %v5803_v58 = vrot.slane %v5798_v38, %v7826_v12  ;;  %v5887_v13 = vpack.i.b16 %v5886_v44, %v5886_v44  ;;  %v5363_v44 = vld [vmem:[#allocation6 + $0x20] sm:$0x11] }
 0x2cb   : > { %v5309_v18 = vpack.i.b16 %v7073_v28, %v7073_v28  ;;  %v7088_v51 = vcombine.low %v5513_v16, %v5513_v16  ;;  %v7089_v20 = vcombine.high %v5513_v16, %v5513_v16  ;;  %v8974_v56 = vpop.permute.xlu1 %5145  ;;  %vm3825_vm14 = vcmask 592896  }
 0x2cc   : > { %3979 = vrot.lane.b32.xlu1 %v6985_v19, %s9994_s5  ;;  %v6163_v19 = vrot.slane %v6158_v63, %v7818_v5  ;;  %v5805_v63 = vpack.i.b16 %v7107_v57, %v7107_v57  ;;  %v5548_v39 = vrot.slane %v5543_v48, %v7818_v5  ;;  %v5392_v3 = vshrl.u32 %v7078_v24, 16  ;;  %3826 = vst.msk [vmem:[#allocation4] sm:$0xf] %vm3825_vm14, %v9995_v62  ;;  %v5692_v62 = vld [vmem:[#allocation4 + $0x14] sm:$0xf] }
 0x2cd   : > { %v5314_v8 = vrot.slane %v5309_v18, %v7820_v6  ;;  %v7077_v24 = vcombine.high %v5363_v44, %v5363_v44 }
 0x2ce   : > { %v7134_v54 = vcombine.low %v6163_v19, %v6170_v22  ;;  %v7095_v19 = vcombine.high %v5605_v45, %v5605_v45  ;;  %v7101_v22 = vcombine.high %v5693_v36, %v5693_v36  ;;  %v5393_v60 = vpack.i.b16 %v5392_v3, %v5392_v3 }
 0x2cf   : > { %4337 = vrot.lane.b32.xlu0 %v7008_v4, %s9989_s24  ;;  %v5908_v4 = vrot.slane %v5903_v34, %v7826_v12 }
 0x2d0   : > { %6197 = vrot.lane.b32.xlu1 %v7135_v26, %s9975_s0  ;;  %v6067_v26 = vpack.i.b16 %v6066_v30, %v6066_v30  ;;  %v5810_v30 = vrot.slane %v5805_v63, %v7826_v12  ;;  %v5625_v25 = vpack.i.b16 %v7095_v19, %v7095_v19  ;;  %v5275_v63 = vld [vmem:[#allocation6 + $0x20] sm:$0x11] }
 0x2d1   : > { %v7117_v41 = vcombine.low %v5908_v4, %v5916_v59  ;;  %v7070_v28 = vcombine.low %v5275_v63, %v5275_v63  ;;  %v7071_v48 = vcombine.high %v5275_v63, %v5275_v63 }
 0x2d2   : > { %v6072_v23 = vrot.slane %v6067_v26, %v7820_v6  ;;  %v5714_v26 = vshrl.u32 %v7101_v22, 16  ;;  %v7110_v57 = vcombine.low %v5803_v58, %v5810_v30 }
 0x2d3   : > { %4065 = vrot.lane.b32.xlu0 %v6990_v7, %s9991_s3  ;;  %v7091_v7 = vcombine.high %v5514_v9, %v5514_v9  ;;  %v7100_v9 = vcombine.low %v5693_v36, %v5693_v36  ;;  %v5288_v19 = vpack.i.b16 %v7070_v28, %v7070_v28 }
 0x2d4   : > { %6017 = vrot.lane.b32.xlu1 %v7123_v2, %s9985_s1  ;;  %v5644_v2 = vrot.slane %v5639_v50, %v7824_v11  ;;  %v7128_v34 = vcombine.low %v6072_v23, %v6080_v37  ;;  %v5302_v50 = vpack.i.b16 %v7072_v17, %v7072_v17  ;;  %v5526_v23 = vshrl.u32 %v7088_v51, 16 }
 0x2d5   : > { %v5550_v27 = vshrl.u32 %v7091_v7, 16  ;;  %v5706_v7 = vshrl.u32 %v7100_v9, 16  ;;  %v5534_v37 = vshrl.u32 %v7089_v20, 16 }
 0x2d6   : > { %v5307_v15 = vrot.slane %v5302_v50, %v7820_v6  ;;  %v5527_v36 = vpack.i.b16 %v5526_v23, %v5526_v23 }
 0x2d7   : > { %4157 = vrot.lane.b32.xlu0 %v6996_v52, %s9993_s4  ;;  %v5637_v52 = vrot.slane %v5632_v35, %v7824_v11  ;;  %v5551_v61 = vpack.i.b16 %v5550_v27, %v5550_v27  ;;  %v5895_v35 = vpack.i.b16 %v5894_v0, %v5894_v0  ;;  %v5630_v27 = vrot.slane %v5625_v25, %v7824_v11 }
 0x2d8   : > { %6109 = vrot.lane.b32.xlu1 %v7129_v14, %s9987_s15  ;;  %v7079_v14 = vcombine.high %v5364_v46, %v5364_v46  ;;  %v5707_v21 = vpack.i.b16 %v5706_v7, %v5706_v7  ;;  %v7075_v38 = vcombine.low %v5307_v15, %v5314_v8  ;;  %v5398_v46 = vrot.slane %v5393_v60, %v7820_v6  ;;  %v9010_v7 = vpop.permute.xlu0 %3796 }
 0x2d9   : > { %v7099_v55 = vcombine.low %v5637_v52, %v5644_v2  ;;  %v5556_v42 = vrot.slane %v5551_v61, %v7818_v5  ;;  %v5892_v52 = vrot.slane %v5887_v13, %v7826_v12  ;;  %v5900_v2 = vrot.slane %v5895_v35, %v7826_v12 }
 0x2da   : > { %v5400_v4 = vshrl.u32 %v7079_v14, 16  ;;  %v5535_v17 = vpack.i.b16 %v5534_v37, %v5534_v37  ;;  %v7076_v61 = vcombine.low %v5363_v44, %v5363_v44  ;;  %v5532_v58 = vrot.slane %v5527_v36, %v7818_v5 }
 0x2db   : > { %3977 = vrot.lane.b32.xlu0 %v6984_v53, %s9994_s5  ;;  %v7094_v53 = vcombine.low %v5605_v45, %v5605_v45  ;;  %v7116_v12 = vcombine.low %v5892_v52, %v5900_v2  ;;  %v8984_v45 = vpop.permute.xlu1 %5147  ;;  %v5384_v13 = vshrl.u32 %v7077_v24, 16 }
 0x2dc   : > { %5837 = vrot.lane.b32.xlu1 %v7111_v47, %s9988_s22  ;;  %v7105_v47 = vcombine.low %v5728_v10, %v5736_v32  ;;  %v5712_v10 = vrot.slane %v5707_v21, %v7824_v11  ;;  %v5376_v30 = vshrl.u32 %v7076_v61, 16  ;;  %v9014_v51 = vpop.permute.xlu0 %4965  ;;  %v6144_v61 = vld [vmem:[#allocation4 + $0x14] sm:$0xf] }
 0x2dd   : > { %v5618_v59 = vpack.i.b16 %v7094_v53, %v7094_v53  ;;  %v5540_v53 = vrot.slane %v5535_v17, %v7818_v5  ;;  %v5385_v18 = vpack.i.b16 %v5384_v13, %v5384_v13 }
 0x2de   : > { %v5377_v50 = vpack.i.b16 %v5376_v30, %v5376_v30 }
 0x2df   : > { %6195 = vrot.lane.b32.xlu0 %v7134_v54, %s9975_s0  ;;  %v7093_v54 = vcombine.low %v5548_v39, %v5556_v42  ;;  %v5623_v29 = vrot.slane %v5618_v59, %v7824_v11  ;;  %v8993_v9 = vpop.permute.xlu1 %5237  ;;  %s9997_s0 = smov 82   ;;  %v7092_v22 = vcombine.low %v5532_v58, %v5540_v53  ;;  %v5390_v3 = vrot.slane %v5385_v18, %v7820_v6  ;;  %v5964_v53 = vld [vmem:[#allocation4 + $0x14] sm:$0xf] }
 0x2e0   : > { %5929 = vrot.lane.b32.xlu1 %v7117_v41, %s9989_s24  ;;  %v5401_v41 = vpack.i.b16 %v5400_v4, %v5400_v4  ;;  %v5382_v42 = vrot.slane %v5377_v50, %v7820_v6 }
 0x2e1   : > { %v7098_v0 = vcombine.low %v5623_v29, %v5630_v27 }
 0x2e2   : > { %v7080_v4 = vcombine.low %v5382_v42, %v5390_v3 }
 0x2e3   : > { %6015 = vrot.lane.b32.xlu0 %v7122_v31, %s9985_s1  ;;  %v5715_v31 = vpack.i.b16 %v5714_v26, %v5714_v26  ;;  %v8999_v16 = vpop.permute.xlu1 %5239  ;;  %s10013_s1 = smov 63  }
 0x2e4   : > { %5657 = vrot.lane.b32.xlu1 %v7099_v55, %s9991_s3  ;;  %v5406_v55 = vrot.slane %v5401_v41, %v7820_v6 }
 0x2e5   : > { %v5720_v32 = vrot.slane %v5715_v31, %v7824_v11  ;;  %v5295_v11 = vpack.i.b16 %v7071_v48, %v7071_v48 }
 0x2e6   : > { %v7081_v14 = vcombine.low %v5398_v46, %v5406_v55 }
 0x2e7   : > { %6107 = vrot.lane.b32.xlu0 %v7128_v34, %s9987_s15  ;;  %v7104_v34 = vcombine.low %v5712_v10, %v5720_v32  ;;  %v5300_v35 = vrot.slane %v5295_v11, %v7820_v6  ;;  %v9005_v59 = vpop.permute.xlu1 %4967 }
 0x2e8   : > { %5749 = vrot.lane.b32.xlu1 %v7105_v47, %s9993_s4  ;;  %v5293_v47 = vrot.slane %v5288_v19, %v7820_v6 }
 0x2ea   : > { %v7074_v39 = vcombine.low %v5293_v47, %v5300_v35 }
 0x2eb   : > { %5835 = vrot.lane.b32.xlu0 %v7110_v57, %s9988_s22  ;;  %v9008_v25 = vpop.permute.xlu1 %5059  ;;  %v9018_v57 = vpop.permute.xlu0 %5057  ;;  %s7206_s22 = sshll.u32 %s7768_s17, 9 }
 0x2ec   : > { %5569 = vrot.lane.b32.xlu1 %v7093_v54, %s9994_s5 }
 0x2ef   : > { %5927 = vrot.lane.b32.xlu0 %v7116_v12, %s9989_s24  ;;  %v9012_v26 = vpop.permute.xlu1 %4787  ;;  %v9022_v2 = vpop.permute.xlu0 %4785 }
 0x2f0   : > { %5327 = vrot.lane.b32.xlu1 %v7075_v38, %s9996_s13 }
 0x2f3   : > { %5655 = vrot.lane.b32.xlu0 %v7098_v0, %s9991_s3  ;;  %v9016_v20 = vpop.permute.xlu1 %4879  ;;  %v9026_v54 = vpop.permute.xlu0 %4877  ;;  %s9998_s3 = smov 110  }
 0x2f4   : > { %5419 = vrot.lane.b32.xlu1 %v7081_v14, %s9997_s0 }
 0x2f7   : > { %5747 = vrot.lane.b32.xlu0 %v7104_v34, %s9993_s4  ;;  %v9020_v52 = vpop.permute.xlu1 %4607  ;;  %v9030_v60 = vpop.permute.xlu0 %4605  ;;  %s9999_s4 = smov 118  }
 0x2fb   : > { %5567 = vrot.lane.b32.xlu0 %v7092_v22, %s9994_s5  ;;  %v9024_v15 = vpop.permute.xlu1 %4699  ;;  %v9034_v29 = vpop.permute.xlu0 %4697  ;;  %v6052_v22 = vld [vmem:[#allocation4 + $0x14] sm:$0xf] }
 0x2ff   : > { %5325 = vrot.lane.b32.xlu0 %v7074_v39, %s9996_s13  ;;  %v9028_v8 = vpop.permute.xlu1 %4427  ;;  %v9038_v21 = vpop.permute.xlu0 %4425  ;;  %v5784_v39 = vld [vmem:[#allocation4 + $0x14] sm:$0xf] }
 0x303   : > { %5417 = vrot.lane.b32.xlu0 %v7080_v4, %s9997_s0  ;;  %v9032_v41 = vpop.permute.xlu1 %4519  ;;  %v9042_v23 = vpop.permute.xlu0 %4517 }
 0x307   : > { %v9036_v27 = vpop.permute.xlu1 %4247  ;;  %v9046_v12 = vpop.permute.xlu0 %4245 }
 0x30b   : > { %v9040_v31 = vpop.permute.xlu1 %4339 }
 0x30f   : > { %v9044_v37 = vpop.permute.xlu1 %4067 }
 0x313   : > { %v9048_v38 = vpop.permute.xlu1 %4159 }
 0x342   : > { %v3768_v46 = vpop.xlane.xlu0 %3767 }
 0x343   : > { %v3769_v55 = vmul.f32 0.001953125, %v3768_v46 }
 0x344   : > { %v3778_v63 = vpop.xlane.xlu1 %3777 }
 0x345   : > { %v3779_v44 = vmul.f32 0.001953125, %v3778_v63  ;;  %v3780_v0 = vmul.f32 %v3769_v55, %v3769_v55  ;;  %v3783_v4 = vsub.f32 %v8887_v43, %v3769_v55  ;;  %v3784_v46 = vsub.f32 %v8889_v40, %v3769_v55 }
 0x346   : > { %v9050_v10 = vpop.permute.xlu0 %4337  ;;  %v3785_v63 = vsub.f32 %v8895_v1, %v3769_v55 }
 0x347   : > { %v3781_v32 = vsub.f32 %v3779_v44, %v3780_v0  ;;  %v3786_v44 = vsub.f32 %v8902_v49, %v3769_v55  ;;  %v5604_v55 = vld [vmem:[#allocation4 + $0x14] sm:$0xf] }
 0x348   : > { %v9052_v36 = vpop.permute.xlu1 %3979 }
 0x349   : > { %v3782_v17 = vmax.f32 %v3781_v32, 0.0 }
 0x34a   : > { %v9054_v28 = vpop.permute.xlu0 %4065 }
 0x34b   : > { %v3787_v48 = vadd.f32 1e-05, %v3782_v17 }
 0x34c   : > { %v9056_v24 = vpop.permute.xlu1 %6197 }
 0x34d   : > { %v9908_v14 = vrot.slane %v9056_v24, 4  ;;  %7557 = vrsqrt.f32 %v3787_v48  ;;  %v5872_v48 = vld [vmem:[#allocation4 + $0x14] sm:$0xf] }
 0x34e   : > { %v9059_v34 = vpop.permute.xlu0 %4157 }
 0x34f   : > { %v6209_v58 = vmul.bf16 %v9908_v14, %v6144_v61 }
 0x350   : > { %v9063_v19 = vpop.permute.xlu1 %6017 }
 0x351   : > { %v9905_v11 = vrot.slane %v9063_v19, 4  ;;  %6217 = vrot.lane.b32.xlu1 %v6209_v58, %s9998_s3 }
 0x352   : > { %v9067_v30 = vpop.permute.xlu0 %3977 }
 0x353   : > { %v6029_v13 = vmul.bf16 %v9905_v11, %v5964_v53 }
 0x354   : > { %v9071_v47 = vpop.permute.xlu1 %6109 }
 0x355   : > { %v9904_v35 = vrot.slane %v9071_v47, 4  ;;  %6037 = vrot.lane.b32.xlu0 %v6029_v13, %s9960_s26 }
 0x356   : > { %v9075_v50 = vpop.permute.xlu0 %6195 }
 0x357   : > { %v6121_v18 = vmul.bf16 %v9904_v35, %v6052_v22 }
 0x358   : > { %v5838_v42 = vpop.permute.xlu1 %5837 }
 0x359   : > { %v5840_v3 = vrot.slane %v5838_v42, 4  ;;  %6129 = vrot.lane.b32.xlu1 %v6121_v18, %s9964_s30 }
 0x35a   : > { %v9084_v0 = vpop.permute.xlu0 %6015  ;;  %v7558_v32 = vpop.eup %7557 }
 0x35b   : > { %v5849_v17 = vmul.bf16 %v5840_v3, %v5784_v39  ;;  %v3789_v58 = vmul.f32 %v7558_v32, %v3783_v4  ;;  %v3790_v53 = vmul.f32 %v7558_v32, %v3784_v46  ;;  %v3791_v13 = vmul.f32 %v7558_v32, %v3785_v63 }
 0x35c   : > { %v5930_v61 = vpop.permute.xlu1 %5929  ;;  %v3792_v22 = vmul.f32 %v7558_v32, %v3786_v44 }
 0x35d   : > { %v5932_v35 = vrot.slane %v5930_v61, 4  ;;  %5857 = vrot.lane.b32.xlu0 %v5849_v17, %s9963_s18  ;;  %v3799_v40 = vmul.f32 %v9010_v7, %v3789_v58  ;;  %v3800_v1 = vmul.f32 %v9010_v7, %v3790_v53  ;;  %v3801_v46 = vmul.f32 %v9010_v7, %v3791_v13 }
 0x35e   : > { %v9087_v43 = vpop.permute.xlu0 %6107  ;;  %v3802_v63 = vmul.f32 %v9010_v7, %v3792_v22 }
 0x35f   : > { %v5941_v49 = vmul.bf16 %v5932_v35, %v5872_v48  ;;  %v3809_v39 = vadd.f32 %v8965_v33, %v3799_v40  ;;  %v3810_v4 = vadd.f32 %v8965_v33, %v3800_v1  ;;  %v3811_v40 = vadd.f32 %v8965_v33, %v3801_v46 }
 0x360   : > { %v5658_v18 = vpop.permute.xlu1 %5657  ;;  %v3812_v1 = vadd.f32 %v8965_v33, %v3802_v63 }
 0x361   : > { %v5660_v44 = vrot.slane %v5658_v18, 4  ;;  %5949 = vrot.lane.b32.xlu1 %v5941_v49, %s9999_s4  ;;  %v3817_v53 = vmul.f32 0.01, %v3809_v39  ;;  %v3818_v11 = vmul.f32 0.01, %v3810_v4  ;;  %vm3813_vm9 = vcmp.ge.f32.partialorder %v3809_v39, 0.0 }
 0x362   : > { %v9098_v32 = vpop.permute.xlu0 %5835  ;;  %vm3814_vm8 = vcmp.ge.f32.partialorder %v3810_v4, 0.0  ;;  %v3819_v33 = vmul.f32 0.01, %v3811_v40  ;;  %v3820_v63 = vmul.f32 0.01, %v3812_v1  ;;  %vm3815_vm11 = vcmp.ge.f32.partialorder %v3811_v40, 0.0 }
 0x363   : > { %v5669_v17 = vmul.bf16 %v5660_v44, %v5604_v55  ;;  %v9917_v58 = vrot.slane %v9098_v32, 4  ;;  %v3821_v46 = vsel %vm3813_vm9, %v3809_v39, %v3817_v53  ;;  %v3822_v5 = vsel %vm3814_vm8, %v3810_v4, %v3818_v11 }
 0x364   : > { %v5750_v48 = vpop.permute.xlu1 %5749  ;;  %vm3816_vm10 = vcmp.ge.f32.partialorder %v3812_v1, 0.0  ;;  %v3823_v39 = vsel %vm3815_vm11, %v3811_v40, %v3819_v33  ;;  %vm10003_vm8 = vcmask 15360   ;;  %vm10004_vm11 = vcmask 64512  }
 0x365   : > { %v5842_v7 = vsel %vm622_vm7, %v9917_v58, %v5840_v3  ;;  %v5752_v13 = vrot.slane %v5750_v48, 4  ;;  %5677 = vrot.lane.b32.xlu0 %v5669_v17, %s9962_s27  ;;  %v3824_v11 = vsel %vm3816_vm10, %v3812_v1, %v3820_v63  ;;  %vm10009_vm10 = vcmask 596992  }
 0x366   : > { %v9107_v22 = vpop.permute.xlu0 %5927  ;;  %v9110_v49 = vsel %vm10000_vm12, %v5842_v7, %v5838_v42  ;;  %v7204_v7 = vpack.c.bf16 %v3822_v5, %v3821_v46  ;;  %vm3857_vm12 = vcmask 1047556   ;;  %vm10010_vm9 = vmmov %vm10009_vm10 }
 0x367   : > { %v5761_v55 = vmul.bf16 %v5752_v13, %v5692_v62  ;;  %v9916_v14 = vrot.slane %v9107_v22, 4 }
 0x369   : > { %v5934_v3 = vsel %vm622_vm7, %v9916_v14, %v5932_v35  ;;  %5769 = vrot.lane.b32.xlu1 %v5761_v55, %s9954_s25 }
 0x36a   : > { %v9117_v17 = vpop.permute.xlu0 %5655  ;;  %v9120_v42 = vsel %vm10001_vm3, %v5934_v3, %v5930_v61  ;;  %v7205_v61 = vpack.c.bf16 %v3824_v11, %v3823_v39  ;;  %vm3858_vm3 = vmor %vm3857_vm12, %vm3827_vm1  ;;  %vm10012_vm1 = vcmask 662528  }
 0x36b   : > { %v9915_v62 = vrot.slane %v9117_v17, 4 }
 0x36d   : > { %v5662_v4 = vsel %vm622_vm7, %v9915_v62, %v5660_v44  ;;  %3845 = vrot.lane.b32.xlu1 %v7204_v7, %s9971_s19  ;;  %v9140_v44 = vpop.permute.xlu1 %5569  ;;  %v9918_v62 = vrot.slane %v8999_v16, 4 }
 0x36e   : > { %v9127_v35 = vpop.permute.xlu0 %5747  ;;  %v9130_v53 = vsel %vm10003_vm8, %v5662_v4, %v5658_v18 }
 0x36f   : > { %10002 = vst [vmem:[#allocation19_spill] sm:$0xff] %v9127_v35  ;;  %v9914_v55 = vrot.slane %v9127_v35, 4  ;;  %v9932_v35 = vrot.slane %v9012_v26, 4 }
 0x371   : > { %v5754_v5 = vsel %vm622_vm7, %v9914_v55, %v5752_v13  ;;  %3847 = vrot.lane.b32.xlu1 %v7205_v61, %s9971_s19  ;;  %v9142_v1 = vpop.permute.xlu1 %5327  ;;  %v5150_v55 = vrot.slane %v8984_v45, 4  ;;  %s10011_s19 = smov 48  }
 0x372   : > { %v9138_v40 = vsel %vm10004_vm11, %v5754_v5, %v5750_v48  ;;  %v9161_v5 = vpop.permute.xlu0 %5567  ;;  %vm10017_vm11 = vcmask 654336  }
 0x373   : > { %vm10019_vm12 = vmmov %vm10017_vm11 }
 0x375   : > { %v9144_v46 = vpop.permute.xlu1 %5419 }
 0x3c3   : > { %v9146_v18 = vpop.permute.xlu1 %6217 }
 0x3c4   : > { %10005 = vst [vmem:[#allocation20_spill] sm:$0xff] %v9146_v18 }
 0x3cb   : > { %v9148_v33 = vpop.permute.xlu1 %6129 }
 0x3cc   : > { %10006 = vst [vmem:[#allocation21_spill] sm:$0xff] %v9148_v33  ;;  %v9926_v33 = vrot.slane %v9005_v59, 4 }
 0x3d3   : > { %v9150_v63 = vpop.permute.xlu1 %5949 }
 0x3d4   : > { %10007 = vst [vmem:[#allocation22_spill] sm:$0xff] %v9150_v63  ;;  %v9925_v63 = vrot.slane %v9008_v25, 4 }
 0x3db   : > { %v9152_v3 = vpop.permute.xlu1 %5769 }
 0x3dc   : > { %10008 = vst [vmem:[#allocation23_spill] sm:$0xff] %v9152_v3 }
 0x3df   : > { %v3846_v13 = vpop.permute.xlu1 %3845 }
 0x3e0   : > { %v3849_v48 = vrot.slane %v3846_v13, 4 }
 0x3e2   : > { %v3851_v7 = vsel %vm10009_vm10, %v3849_v48, %v3846_v13 }
 0x3e3   : > { %3859 = vst.msk [vmem:[#allocation4] sm:$0xff] %vm3858_vm3, %v3851_v7  ;;  %v3848_v39 = vpop.permute.xlu1 %3847  ;;  %v9166_v7 = vpop.permute.xlu0 %5325  ;;  %vm10020_vm3 = vcmask 588800  }
 0x3e4   : > { %v3850_v11 = vrot.slane %v3848_v39, 4  ;;  %vm10022_vm10 = vmmov %vm10020_vm3 }
 0x3e6   : > { %v3852_v4 = vsel %vm622_vm7, %v3849_v48, %v3850_v11  ;;  %3861 = vst.msk [vmem:[#allocation4 + $0x10] sm:$0xf] %vm3825_vm14, %v3850_v11  ;;  %v9923_v11 = vrot.slane %v9142_v1, 4  ;;  %vm10014_vm14 = vcmask 605184  }
 0x3e7   : > { %v9159_v61 = vsel %vm10010_vm9, %v3852_v4, %v3848_v39  ;;  %v9924_v39 = vrot.slane %v9166_v7, 4  ;;  %vm10016_vm8 = vmmov %vm10014_vm14 }
 0x3e8   : > { %3860 = vst [vmem:[#allocation4 + $0x8] sm:$0xff] %v9159_v61 }
 0x3ed   : > { %v5182_v14 = vld [vmem:[#allocation4 + $0x10] sm:$0xf] }
 0x3ee   : > { %v5094_v13 = vld [vmem:[#allocation4 + $0x10] sm:$0xf]  ;;  %v5251_v48 = vmul.bf16 %v9918_v62, %v5182_v14 }
 0x3ef   : > { %v5159_v58 = vmul.bf16 %v5150_v55, %v5094_v13  ;;  %v5002_v4 = vld [vmem:[#allocation4 + $0x10] sm:$0xf]  ;;  %v5332_v13 = vsel %vm622_vm7, %v9924_v39, %v9923_v11 }
 0x3f0   : > { %v4914_v3 = vld [vmem:[#allocation4 + $0x10] sm:$0xf]  ;;  %5259 = vrot.lane.b32.xlu1 %v5251_v48, %s10011_s19  ;;  %v5071_v18 = vmul.bf16 %v9925_v63, %v5002_v4  ;;  %v9927_v48 = vrot.slane %v9016_v20, 4  ;;  %v9195_v4 = vsel %vm10012_vm1, %v5332_v13, %v9142_v1  ;;  %v9930_v63 = vrot.slane %v9032_v41, 4  ;;  %vm10024_vm1 = vmmov %vm10010_vm9 }
 0x3f1   : > { %5167 = vrot.lane.b32.xlu0 %v5159_v58, %s9957_s29  ;;  %v4979_v14 = vmul.bf16 %v9926_v33, %v4914_v3  ;;  %v4822_v62 = vld [vmem:[#allocation4 + $0x10] sm:$0xf]  ;;  %v9929_v33 = vrot.slane %v9020_v52, 4 }
 0x3f2   : > { %v4734_v6 = vld [vmem:[#allocation4 + $0x10] sm:$0xf]  ;;  %v4891_v58 = vmul.bf16 %v9927_v48, %v4822_v62  ;;  %v9931_v48 = vrot.slane %v9028_v8, 4 }
 0x3f3   : > { %v4799_v3 = vmul.bf16 %v9932_v35, %v4734_v6  ;;  %v4642_v11 = vld [vmem:[#allocation4 + $0x10] sm:$0xf]  ;;  %v9935_v35 = vrot.slane %v9048_v38, 4 }
 0x3f4   : > { %5079 = vrot.lane.b32.xlu1 %v5071_v18, %s9955_s28  ;;  %v4554_v39 = vld [vmem:[#allocation4 + $0x10] sm:$0xf]  ;;  %v9928_v18 = vrot.slane %v9024_v15, 4 }
 0x3f5   : > { %4987 = vrot.lane.b32.xlu0 %v4979_v14, %s9956_s11  ;;  %v4619_v62 = vmul.bf16 %v9929_v33, %v4554_v39  ;;  %v4462_v14 = vld [vmem:[#allocation4 + $0x10] sm:$0xf]  ;;  %v9934_v39 = vrot.slane %v9036_v27, 4  ;;  %v9933_v33 = vrot.slane %v9040_v31, 4 }
 0x3f6   : > { %v4711_v6 = vmul.bf16 %v9928_v18, %v4642_v11  ;;  %v4374_v13 = vld [vmem:[#allocation4 + $0x10] sm:$0xf] }
 0x3f7   : > { %v4282_v11 = vld [vmem:[#allocation4 + $0x10] sm:$0xf] }
 0x3f8   : > { %4899 = vrot.lane.b32.xlu1 %v4891_v58, %s9959_s21  ;;  %v4531_v58 = vmul.bf16 %v9930_v63, %v4462_v14  ;;  %v4194_v18 = vld [vmem:[#allocation4 + $0x10] sm:$0xf] }
 0x3f9   : > { %4807 = vrot.lane.b32.xlu0 %v4799_v3, %s10013_s1  ;;  %v4439_v3 = vmul.bf16 %v9931_v48, %v4374_v13  ;;  %v4102_v14 = vld [vmem:[#allocation4 + $0x10] sm:$0xf]  ;;  %v5149_v13 = vrot.slane %v8974_v56, 4  ;;  %v9936_v48 = vrot.slane %v9044_v37, 4 }
 0x3fa   : > { %v4014_v63 = vld [vmem:[#allocation4 + $0x10] sm:$0xf] }
 0x3fc   : > { %4719 = vrot.lane.b32.xlu1 %v4711_v6, %s9958_s12  ;;  %v4351_v6 = vmul.bf16 %v9933_v33, %v4282_v11  ;;  %v3922_v11 = vld [vmem:[#allocation4 + $0x10] sm:$0xf]  ;;  %v5241_v33 = vrot.slane %v8993_v9, 4 }
 0x3fd   : > { %4627 = vrot.lane.b32.xlu0 %v4619_v62, %s9998_s3  ;;  %v4259_v62 = vmul.bf16 %v9934_v39, %v4194_v18  ;;  %v4079_v18 = vmul.bf16 %v9936_v48, %v4014_v63  ;;  %v3982_v39 = vrot.slane %v9052_v36, 4  ;;  %v9246_v48 = vld [vmem:[#allocation4] sm:$0xff] }
 0x400   : > { %4539 = vrot.lane.b32.xlu1 %v4531_v58, %s9964_s30  ;;  %v5152_v58 = vsel %vm622_vm7, %v5149_v13, %v5150_v55  ;;  %v10015_v55 = vrot.slane %v8999_v16, 4 }
 0x401   : > { %4447 = vrot.lane.b32.xlu0 %v4439_v3, %s9960_s26  ;;  %v4171_v3 = vmul.bf16 %v9935_v35, %v4102_v14  ;;  %v4969_v14 = vrot.slane %v9014_v51, 4  ;;  %v3991_v35 = vmul.bf16 %v3982_v39, %v3922_v11 }
 0x404   : > { %4359 = vrot.lane.b32.xlu1 %v4351_v6, %s9999_s4  ;;  %v5153_v6 = vsel %vm10014_vm14, %v5152_v58, %v8984_v45  ;;  %v5151_v45 = vsel %vm10016_vm8, %v5149_v13, %v8974_v56  ;;  %v5243_v56 = vsel %vm10019_vm12, %v5241_v33, %v8993_v9  ;;  %v4971_v9 = vsel %vm10022_vm10, %v4969_v14, %v9014_v51 }
 0x405   : > { %4267 = vrot.lane.b32.xlu0 %v4259_v62, %s9963_s18  ;;  %v5244_v62 = vsel %vm622_vm7, %v5241_v33, %v10015_v55  ;;  %v5158_v63 = vmul.bf16 %v5153_v6, %v9159_v61  ;;  %v5061_v6 = vrot.slane %v9018_v57, 4  ;;  %v5157_v55 = vmul.bf16 %v5151_v45, %v9246_v48 }
 0x406   : > { %v5245_v58 = vsel %vm10017_vm11, %v5244_v62, %v8999_v16  ;;  %v4789_v62 = vrot.slane %v9022_v2, 4  ;;  %v10023_v33 = vrot.slane %v9012_v26, 4  ;;  %vm10025_vm14 = vcmask 531456  }
 0x407   : > { %v5250_v11 = vmul.bf16 %v5245_v58, %v9159_v61  ;;  %v5063_v51 = vsel %vm10024_vm1, %v5061_v6, %v9018_v57  ;;  %vm10027_vm8 = vmmov %vm10025_vm14  ;;  %vm10028_vm11 = vcmask 539648  }
 0x408   : > { %4179 = vrot.lane.b32.xlu1 %v4171_v3, %s9954_s25  ;;  %v10018_v3 = vrot.slane %v9005_v59, 4  ;;  %v4792_v58 = vsel %vm622_vm7, %v4789_v62, %v10023_v33  ;;  %v4791_v57 = vsel %vm10027_vm8, %v4789_v62, %v9022_v2  ;;  %vm10030_vm12 = vmmov %vm10028_vm11  ;;  %v10032_v62 = vrot.slane %v9024_v15, 4 }
 0x409   : > { %4087 = vrot.lane.b32.xlu0 %v4079_v18, %s9962_s27  ;;  %v4429_v33 = vrot.slane %v9038_v21, 4 }
 0x40a   : > { %v4972_v18 = vsel %vm622_vm7, %v4969_v14, %v10018_v3  ;;  %v4881_v3 = vrot.slane %v9026_v54, 4  ;;  %v10026_v14 = vrot.slane %v9016_v20, 4 }
 0x40b   : > { %v4973_v16 = vsel %vm10020_vm3, %v4972_v18, %v9005_v59  ;;  %v4977_v18 = vmul.bf16 %v9246_v48, %v4971_v9  ;;  %vm10031_vm3 = vcmask 146432  }
 0x40c   : > { %5165 = vrot.lane.b32.xlu1 %v5158_v63, %s9957_s29  ;;  %v5249_v63 = vmul.bf16 %v5243_v56, %v9246_v48  ;;  %v4978_v45 = vmul.bf16 %v4973_v16, %v9159_v61  ;;  %v4609_v56 = vrot.slane %v9030_v60, 4  ;;  %v5069_v16 = vmul.bf16 %v9246_v48, %v5063_v51  ;;  %vm10033_vm10 = vmmov %vm10031_vm3 }
 0x40d   : > { %3999 = vrot.lane.b32.xlu0 %v3991_v35, %s9961_s20  ;;  %v10021_v35 = vrot.slane %v9008_v25, 4  ;;  %v4883_v2 = vsel %vm10030_vm12, %v4881_v3, %v9026_v54  ;;  %v4521_v51 = vrot.slane %v9042_v23, 4 }
 0x40e   : > { %v4611_v54 = vsel %vm10033_vm10, %v4609_v56, %v9030_v60 }
 0x40f   : > { %v5064_v13 = vsel %vm622_vm7, %v5061_v6, %v10021_v35  ;;  %v10029_v6 = vrot.slane %v9020_v52, 4 }
 0x410   : > { %5257 = vrot.lane.b32.xlu1 %v5250_v11, %s10011_s19  ;;  %v5065_v59 = vsel %vm10010_vm9, %v5064_v13, %v9008_v25  ;;  %v4793_v25 = vsel %vm10025_vm14, %v4792_v58, %v9012_v26  ;;  %v4889_v58 = vmul.bf16 %v9246_v48, %v4883_v2  ;;  %vm10035_vm9 = vcmask 130048  }
 0x411   : > { %5163 = vrot.lane.b32.xlu0 %v5157_v55, %s9957_s29  ;;  %v5070_v11 = vmul.bf16 %v5065_v59, %v9159_v61  ;;  %v4884_v55 = vsel %vm622_vm7, %v4881_v3, %v10026_v14  ;;  %v4798_v35 = vmul.bf16 %v4793_v25, %v9159_v61  ;;  %v4612_v13 = vsel %vm622_vm7, %v4609_v56, %v10029_v6  ;;  %vm10037_vm1 = vmmov %vm10035_vm9  ;;  %s10062_s29 = smov 46  }
 0x412   : > { %v4885_v26 = vsel %vm10028_vm11, %v4884_v55, %v9016_v20  ;;  %v4613_v20 = vsel %vm10031_vm3, %v4612_v13, %v9020_v52  ;;  %v10034_v3 = vrot.slane %v9028_v8, 4  ;;  %v4617_v25 = vmul.bf16 %v9246_v48, %v4611_v54 }
 0x413   : > { %v4890_v9 = vmul.bf16 %v4885_v26, %v9159_v61  ;;  %v10036_v55 = vrot.slane %v9032_v41, 4  ;;  %vm10038_vm14 = vcmask 138240   ;;  %v10039_v26 = vrot.slane %v9036_v27, 4 }
 0x414   : > { %4985 = vrot.lane.b32.xlu1 %v4978_v45, %s9956_s11  ;;  %v4797_v45 = vmul.bf16 %v9246_v48, %v4791_v57  ;;  %v4341_v13 = vrot.slane %v9050_v10, 4  ;;  %vm10040_vm8 = vmmov %vm10038_vm14  ;;  %vm10041_vm11 = vcmask 72704   ;;  %vm10044_vm3 = vcmask 80896  }
 0x415   : > { %5255 = vrot.lane.b32.xlu0 %v5249_v63, %s10011_s19  ;;  %v4701_v63 = vrot.slane %v9034_v29, 4  ;;  %v4524_v56 = vsel %vm622_vm7, %v4521_v51, %v10036_v55  ;;  %vm10043_vm12 = vmmov %vm10041_vm11  ;;  %s7691_s19 = smov [#allocation9]  }
 0x416   : > { %vm10046_vm10 = vmmov %vm10044_vm3 }
 0x417   : > { %v4704_v59 = vsel %vm622_vm7, %v4701_v63, %v10032_v62  ;;  %v4703_v60 = vsel %vm1515_vm6, %v4701_v63, %v9034_v29  ;;  %v4431_v29 = vsel %vm10037_vm1, %v4429_v33, %v9038_v21  ;;  %v4523_v21 = vsel %vm10040_vm8, %v4521_v51, %v9042_v23 }
 0x418   : > { %5077 = vrot.lane.b32.xlu1 %v5070_v11, %s9955_s28  ;;  %v4705_v52 = vsel %vm1515_vm6, %v4704_v59, %v9024_v15  ;;  %v4432_v11 = vsel %vm622_vm7, %v4429_v33, %v10034_v3  ;;  %v4437_v63 = vmul.bf16 %v9246_v48, %v4431_v29  ;;  %v4529_v62 = vmul.bf16 %v9246_v48, %v4523_v21 }
 0x419   : > { %4983 = vrot.lane.b32.xlu0 %v4977_v18, %s9956_s11  ;;  %v4618_v18 = vmul.bf16 %v4613_v20, %v9159_v61  ;;  %v4710_v14 = vmul.bf16 %v4705_v52, %v9159_v61  ;;  %v4433_v15 = vsel %vm10035_vm9, %v4432_v11, %v9028_v8  ;;  %v4525_v8 = vsel %vm10038_vm14, %v4524_v56, %v9032_v41 }
 0x41a   : > { %v4438_v57 = vmul.bf16 %v4433_v15, %v9159_v61  ;;  %v4069_v20 = vrot.slane %v9054_v28, 4  ;;  %v10045_v33 = vrot.slane %v9044_v37, 4  ;;  %v4343_v3 = vsel %vm10046_vm10, %v4341_v13, %v9050_v10 }
 0x41b   : > { %vm10047_vm9 = vcmask 15360   ;;  %v3981_v51 = vrot.slane %v9067_v30, 4  ;;  %vm10050_vm14 = vcmask 64512   ;;  %v6019_v29 = vrot.slane %v9084_v0, 4 }
 0x41c   : > { %4805 = vrot.lane.b32.xlu1 %v4798_v35, %s10013_s1  ;;  %v4709_v35 = vmul.bf16 %v9246_v48, %v4703_v60  ;;  %vm10049_vm1 = vmmov %vm10047_vm9  ;;  %vm10055_vm10 = vcmask 130048  }
 0x41d   : > { %5075 = vrot.lane.b32.xlu0 %v5069_v16, %s9955_s28  ;;  %v4249_v16 = vrot.slane %v9046_v12, 4  ;;  %v4071_v10 = vsel %vm10049_vm1, %v4069_v20, %v9054_v28  ;;  %v3984_v60 = vsel %vm622_vm7, %v3981_v51, %v3982_v39  ;;  %vm10051_vm8 = vmmov %vm10050_vm14  ;;  %v6199_v28 = vrot.slane %v9075_v50, 4  ;;  %s10060_s28 = smov 47  }
 0x41e   : > { %v4077_v15 = vmul.bf16 %v9246_v48, %v4071_v10  ;;  %vm10058_vm1 = vcmask 138240  }
 0x41f   : > { %v4252_v6 = vsel %vm622_vm7, %v4249_v16, %v10039_v26  ;;  %v4251_v23 = vsel %vm10043_vm12, %v4249_v16, %v9046_v12  ;;  %v10048_v12 = vrot.slane %v9048_v38, 4  ;;  %v6021_v26 = vsel %vm10055_vm10, %v6019_v29, %v9084_v0 }
 0x420   : > { %4897 = vrot.lane.b32.xlu1 %v4890_v9, %s9959_s21  ;;  %v4253_v41 = vsel %vm10041_vm11, %v4252_v6, %v9036_v27  ;;  %v10042_v9 = vrot.slane %v9040_v31, 4  ;;  %v4257_v54 = vmul.bf16 %v9246_v48, %v4251_v23  ;;  %vm10052_vm11 = vcmask 7168   ;;  %v5418_v6 = vpop.permute.xlu0 %5417 }
 0x421   : > { %4803 = vrot.lane.b32.xlu0 %v4797_v45, %s10013_s1  ;;  %v4530_v45 = vmul.bf16 %v4525_v8, %v9159_v61  ;;  %v4258_v59 = vmul.bf16 %v4253_v41, %v9159_v61  ;;  %vm10053_vm12 = vmmov %vm10052_vm11  ;;  %s7591_s1 = sshll.u32 %s7691_s19, 4  ;;  %s7592_s1 = int_to_ptr.vmem [resolvable:$false] %s7591_s1 }
 0x422   : > { %v4344_v2 = vsel %vm622_vm7, %v4341_v13, %v10042_v9  ;;  %v6111_v13 = vrot.slane %v9087_v43, 4 }
 0x423   : > { %v4345_v27 = vsel %vm10044_vm3, %v4344_v2, %v9040_v31  ;;  %vm10054_vm3 = vcmask 146432  }
 0x424   : > { %4625 = vrot.lane.b32.xlu1 %v4618_v18, %s9998_s3  ;;  %v4161_v18 = vrot.slane %v9059_v34, 4  ;;  %v4350_v52 = vmul.bf16 %v4345_v27, %v9159_v61  ;;  %v6113_v0 = vsel %vm10058_vm1, %v6111_v13, %v9087_v43 }
 0x425   : > { %4895 = vrot.lane.b32.xlu0 %v4889_v58, %s9959_s21  ;;  %v4072_v58 = vsel %vm622_vm7, %v4069_v20, %v10045_v33 }
 0x426   : > { %v4073_v31 = vsel %vm10047_vm9, %v4072_v58, %v9044_v37  ;;  %v4164_v11 = vsel %vm622_vm7, %v4161_v18, %v10048_v12  ;;  %v4163_v56 = vsel %vm10051_vm8, %v4161_v18, %v9059_v34  ;;  %v9416_v34 = vld [vmem:[#allocation4 + $0x4] sm:$0xff]  ;;  %vm10057_vm9 = vcmask 662528   ;;  %vm10063_vm8 = vmmov %vm10054_vm3 }
 0x427   : > { %v4165_v37 = vsel %vm10050_vm14, %v4164_v11, %v9048_v38  ;;  %v3985_v38 = vsel %vm10052_vm11, %v3984_v60, %v9052_v36  ;;  %v4169_v16 = vmul.bf16 %v9246_v48, %v4163_v56  ;;  %vm10059_vm14 = vcmask 670720   ;;  %vm10065_vm11 = vmmov %vm10055_vm10 }
 0x428   : > { %4717 = vrot.lane.b32.xlu1 %v4710_v14, %s9958_s12  ;;  %v4078_v14 = vmul.bf16 %v4073_v31, %v9159_v61  ;;  %v4170_v55 = vmul.bf16 %v4165_v37, %v9159_v61  ;;  %v3990_v39 = vmul.bf16 %v3985_v38, %v9159_v61  ;;  %v6119_v2 = vmul.bf16 %v9416_v34, %v6113_v0 }
 0x429   : > { %4623 = vrot.lane.b32.xlu0 %v4617_v25, %s9998_s3  ;;  %v4349_v25 = vmul.bf16 %v9246_v48, %v4343_v3  ;;  %v10066_v18 = vrot.slane %v9071_v47, 4  ;;  %v5571_v31 = vrot.slane %v9161_v5, 4  ;;  %v10070_v37 = vrot.slane %v9107_v22, 4 }
 0x42a   : > { %vm10071_vm10 = vcmask 80896   ;;  %v10073_v38 = vrot.slane %v9117_v17, 4 }
 0x42b   : > { %v5933_v60 = vsel %vm10071_vm10, %v10070_v37, %v9107_v22 }
 0x42c   : > { %4445 = vrot.lane.b32.xlu1 %v4438_v57, %s9960_s26  ;;  %v6201_v57 = vsel %vm10054_vm3, %v6199_v28, %v9075_v50  ;;  %vm10069_vm3 = vcmask 72704  }
 0x42d   : > { %4715 = vrot.lane.b32.xlu0 %v4709_v35, %s9958_s12  ;;  %v3983_v35 = vsel %vm10053_vm12, %v3981_v51, %v9067_v30  ;;  %v6207_v8 = vmul.bf16 %v6201_v57, %v9416_v34  ;;  %v10056_v30 = vrot.slane %v9166_v7, 4  ;;  %vm10067_vm12 = vmmov %vm10058_vm1  ;;  %v10068_v51 = vrot.slane %v9098_v32, 4  ;;  %v10075_v57 = vld [vmem:[#allocation19_spill] sm:$0xff] }
 0x42e   : > { %v3989_v36 = vmul.bf16 %v9246_v48, %v3983_v35  ;;  %vm10074_vm1 = vcmask 15360  }
 0x42f   : > { %v5331_v50 = vsel %vm10057_vm9, %v10056_v30, %v9166_v7  ;;  %v10061_v7 = vrot.slane %v9056_v24, 4  ;;  %vm10072_vm9 = vcmask 7168   ;;  %v5661_v22 = vsel %vm10074_vm1, %v10073_v38, %v9117_v17 }
 0x430   : > { %4537 = vrot.lane.b32.xlu1 %v4530_v45, %s9964_s30  ;;  %v6027_v45 = vmul.bf16 %v9416_v34, %v6021_v26  ;;  %v5337_v21 = vmul.bf16 %v5331_v50, %v9246_v48  ;;  %v5667_v35 = vmul.bf16 %v9416_v34, %v5661_v22  ;;  %v10078_v17 = vmul.bf16 %v9195_v4, %v9159_v61 }
 0x431   : > { %4443 = vrot.lane.b32.xlu0 %v4437_v63, %s9960_s26  ;;  %v5421_v63 = vrot.slane %v5418_v6, 4  ;;  %v6202_v9 = vsel %vm622_vm7, %v6199_v28, %v10061_v7  ;;  %v5939_v28 = vmul.bf16 %v9416_v34, %v5933_v60  ;;  %v9545_v7 = vld [vmem:[%s9802_s6] sm:$0xff]  ;;  %vm10093_vm1 = vcmask 1031168  }
 0x432   : > { %v6203_v43 = vsel %vm10063_vm8, %v6202_v9, %v9056_v24  ;;  %v6114_v24 = vsel %vm622_vm7, %v6111_v13, %v10066_v18  ;;  %vm10079_vm8 = vcmask 670720  }
 0x433   : > { %v5423_v41 = vsel %vm10059_vm14, %v5421_v63, %v5418_v6  ;;  %v6115_v3 = vsel %vm10067_vm12, %v6114_v24, %v9071_v47  ;;  %vm10077_vm14 = vcmask 64512   ;;  %vm6567_vm12 = vcmask 719872  }
 0x434   : > { %4265 = vrot.lane.b32.xlu1 %v4258_v59, %s9963_s18  ;;  %v5429_v20 = vmul.bf16 %v5423_v41, %v9246_v48  ;;  %v10064_v59 = vrot.slane %v9063_v19, 4  ;;  %v5512_v41 = vld [vmem:[#allocation4 + $0x14] sm:$0xf] }
 0x435   : > { %4535 = vrot.lane.b32.xlu0 %v4529_v62, %s9964_s30  ;;  %v9444_v62 = vld [vmem:[#allocation4 + $0xc] sm:$0xff] }
 0x436   : > { %v6022_v23 = vsel %vm622_vm7, %v6019_v29, %v10064_v59  ;;  %v5848_v27 = vmul.bf16 %v9110_v49, %v9444_v62  ;;  %v6208_v33 = vmul.bf16 %v6203_v43, %v9444_v62  ;;  %v5668_v11 = vmul.bf16 %v9444_v62, %v9130_v53  ;;  %v5362_v43 = vld [vmem:[#allocation4 + $0x10] sm:$0xf] }
 0x437   : > { %v6023_v58 = vsel %vm10065_vm11, %v6022_v23, %v9063_v19  ;;  %v5572_v19 = vrot.slane %v9140_v44, 4  ;;  %v5760_v10 = vmul.bf16 %v9444_v62, %v9138_v40  ;;  %v10076_v29 = vrot.slane %v10075_v57, 4  ;;  %vm10080_vm11 = vmmov %vm10072_vm9 }
 0x438   : > { %4357 = vrot.lane.b32.xlu1 %v4350_v52, %s9999_s4  ;;  %v5940_v52 = vmul.bf16 %v9120_v42, %v9444_v62  ;;  %v6028_v49 = vmul.bf16 %v6023_v58, %v9444_v62  ;;  %v6120_v42 = vmul.bf16 %v6115_v3, %v9444_v62  ;;  %v5573_v13 = vsel %vm10080_vm11, %v5571_v31, %v9161_v5 }
 0x439   : > { %4263 = vrot.lane.b32.xlu0 %v4257_v54, %s9963_s18  ;;  %v9463_v54 = vpop.permute.xlu0 %6037  ;;  %v5574_v47 = vsel %vm622_vm7, %v5571_v31, %v5572_v19  ;;  %v5579_v0 = vmul.bf16 %v9416_v34, %v5573_v13  ;;  %v7137_v5 = vcombine.high %v9545_v7, %v9545_v7  ;;  %v5581_v9 = vmul.bf16 %v5572_v19, %v5512_v41 }
 0x43a   : > { %vm10096_vm11 = vcmask 1039360  }
 0x43b   : > { %7195 = vmatprep.mubr.msk.bf16.mxu0 %vm6567_vm12, %v7137_v5  ;;  %7197 = vmatprep.mubr.msk.bf16.mxu1 %vm6567_vm12, %v7137_v5 }
 0x43c   : > { %4085 = vrot.lane.b32.xlu1 %v4078_v14, %s9962_s27 }
 0x43d   : > { %4355 = vrot.lane.b32.xlu0 %v4349_v25, %s9999_s4  ;;  %v9474_v12 = vpop.permute.xlu0 %5857  ;;  %v5841_v25 = vsel %vm10069_vm3, %v10068_v51, %v9098_v32  ;;  %v5575_v32 = vsel %vm10072_vm9, %v5574_v47, %v9140_v44  ;;  %vm10089_vm3 = vcmask 965632  }
 0x43e   : > { %v5847_v53 = vmul.bf16 %v9416_v34, %v5841_v25  ;;  %v5580_v40 = vmul.bf16 %v9444_v62, %v5575_v32  ;;  %vm10092_vm9 = vmmov %vm10089_vm3 }
 0x440   : > { %4177 = vrot.lane.b32.xlu1 %v4170_v55, %s9954_s25 }
 0x441   : > { %4083 = vrot.lane.b32.xlu0 %v4077_v15, %s9962_s27  ;;  %v9486_v14 = vpop.permute.xlu0 %5677  ;;  %v5422_v15 = vrot.slane %v9144_v46, 4 }
 0x444   : > { %3997 = vrot.lane.b32.xlu1 %v3990_v39, %s9961_s20 }
 0x445   : > { %4175 = vrot.lane.b32.xlu0 %v4169_v16, %s9954_s25  ;;  %v5424_v16 = vsel %vm622_vm7, %v5421_v63, %v5422_v15  ;;  %v5274_v63 = vld [vmem:[#allocation4 + $0x10] sm:$0xf] }
 0x448   : > { %6213 = vrot.lane.b32.xlu1 %v6207_v8, %s9998_s3  ;;  %v5425_v8 = vsel %vm10079_vm8, %v5424_v16, %v9144_v46  ;;  %v10081_v46 = vrot.slane %v9142_v1, 4  ;;  %v6285_v1 = vld [vmem:[%s9803_s7] sm:$0xff]  ;;  %vm10095_vm8 = vmmov %vm10093_vm1 }
 0x449   : > { %3995 = vrot.lane.b32.xlu0 %v3989_v36, %s9961_s20  ;;  %v5753_v36 = vsel %vm10077_vm14, %v10076_v29, %v10075_v57  ;;  %v5430_v50 = vmul.bf16 %v5425_v8, %v9159_v61  ;;  %vm10094_vm14 = vcmask 982016  }
 0x44a   : > { %v5759_v6 = vmul.bf16 %v9416_v34, %v5753_v36  ;;  %vm10097_vm12 = vmmov %vm10094_vm14 }
 0x44c   : > { %6033 = vrot.lane.b32.xlu1 %v6027_v45, %s9960_s26 }
 0x44d   : > { %5343 = vrot.lane.b32.xlu0 %v5337_v21, %s10060_s28  ;;  %v5339_v21 = vmul.bf16 %v10081_v46, %v5274_v63 }
 0x450   : > { %6125 = vrot.lane.b32.xlu1 %v6119_v2, %s9964_s30 }
 0x451   : > { %5435 = vrot.lane.b32.xlu0 %v5429_v20, %s10062_s29 }
 0x454   : > { %5855 = vrot.lane.b32.xlu1 %v5848_v27, %s9963_s18  ;;  %v5431_v27 = vmul.bf16 %v5422_v15, %v5362_v43 }
 0x455   : > { %6215 = vrot.lane.b32.xlu0 %v6208_v33, %s9998_s3  ;;  %s9753_s3 = scalar_lea.hbm %s9806_s10, %s7206_s22 }
 0x458   : > { %5947 = vrot.lane.b32.xlu1 %v5940_v52, %s9999_s4 }
 0x459   : > { %6035 = vrot.lane.b32.xlu0 %v6028_v49, %s9960_s26 }
 0x45c   : > { %5675 = vrot.lane.b32.xlu1 %v5668_v11, %s9962_s27 }
 0x45d   : > { %6127 = vrot.lane.b32.xlu0 %v6120_v42, %s9964_s30 }
 0x460   : > { %5767 = vrot.lane.b32.xlu1 %v5760_v10, %s9954_s25 }
 0x461   : > { %5853 = vrot.lane.b32.xlu0 %v5847_v53, %s9963_s18 }
 0x462   : > { %v5260_v55 = vpop.permute.xlu1 %5259 }
 0x463   : > { %v5168_v56 = vpop.permute.xlu0 %5167  ;;  %v5263_v31 = vrot.slane %v5260_v55, 4 }
 0x464   : > { %5587 = vrot.lane.b32.xlu1 %v5580_v40, %s9961_s20  ;;  %v5171_v49 = vrot.slane %v5168_v56, 4 }
 0x465   : > { %5945 = vrot.lane.b32.xlu0 %v5939_v28, %s9999_s4 }
 0x466   : > { %v9509_v44 = vpop.permute.xlu1 %5079 }
 0x467   : > { %v9511_v39 = vpop.permute.xlu0 %4987  ;;  %v5083_v38 = vrot.slane %v9509_v44, 4 }
 0x468   : > { %5345 = vrot.lane.b32.xlu1 %v10078_v17, %s10060_s28  ;;  %v4991_v55 = vrot.slane %v9511_v39, 4 }
 0x469   : > { %5673 = vrot.lane.b32.xlu0 %v5667_v35, %s9962_s27 }
 0x46a   : > { %v9525_v26 = vpop.permute.xlu1 %4899 }
 0x46b   : > { %v9527_v30 = vpop.permute.xlu0 %4807  ;;  %v4903_v43 = vrot.slane %v9525_v26, 4 }
 0x46c   : > { %5437 = vrot.lane.b32.xlu1 %v5430_v50, %s10062_s29 }
 0x46d   : > { %5765 = vrot.lane.b32.xlu0 %v5759_v6, %s9954_s25  ;;  %s365_s25 = sand.u32 1, %s7643_s14  }
 0x46e   : > { %v9535_v4 = vpop.permute.xlu1 %4719  ;;  %s6823_s15 = sshll.u32 %s365_s25, 5  ;;  %s6732_s17 = scalar_lea.sflag [#allocation8], %s365_s25 }
 0x46f   : > { %v9537_v45 = vpop.permute.xlu0 %4627  ;;  %s367_s24 = scalar_lea.vmem [#allocation9], %s6823_s15 }
 0x470   : > { %5347 = vrot.lane.b32.xlu1 %v5339_v21, %s10060_s28  ;;  %s6746_s5 = sshll.u32 %s367_s24, 4  ;;  %s7593_s28 = scalar_lea.vmem %s7592_s1, 1024  ;;  %s9755_s5 = int_to_ptr.vmem [resolvable:$true] %s6746_s5 }
 0x471   : > { %5585 = vrot.lane.b32.xlu0 %v5579_v0, %s9961_s20  ;;  %s7587_s4 = scalar_lea.vmem %s9755_s5, 512  ;;  %p7594_p11 = scmp.lt.s32.totalorder %s9755_s5, %s7592_s1 }
 0x472   : > { %v9554_v2 = vpop.permute.xlu1 %4539  ;;  %p7588_p6 = scmp.ne.s32.totalorder %s9755_s5, %s7587_s4  ;;  %p7595_p12 = scmp.lt.s32.totalorder %s7593_s28, %s7587_s4 }
 0x473   : > { %v9556_v20 = vpop.permute.xlu0 %4447 }
 0x474   : > { %6288 = vperm.xlu1 %7294, %v6285_v1   ;;  %v4811_v1 = vrot.slane %v9527_v30, 4  ;;  %p7589_p9 = pnand %p7588_p6, %p7785_p5  ;;  %p7596_p13 = por %p7595_p12, %p7594_p11 }
 0x475   : > { %5589 = vrot.lane.b32.xlu0 %v5581_v9, %s9961_s20 }
 0x476   : > { %v9559_v59 = vpop.permute.xlu1 %4359  ;;  %p7590_p10 = pneg %p7589_p9 }
 0x477   : > { %v9561_v23 = vpop.permute.xlu0 %4267 }
 0x478   : > { %p7597_p0 = pnand %p7596_p13, %p7590_p10 }
 0x479   : > { %5439 = vrot.lane.b32.xlu0 %v5431_v27, %s10062_s29 }
 0x47a   : > { %v9564_v33 = vpop.permute.xlu1 %4179 }
 0x47b   : > { %v9566_v58 = vpop.permute.xlu0 %4087 }
 0x47e   : > { %v5166_v18 = vpop.permute.xlu1 %5165 }
 0x47f   : > { %v9568_v24 = vpop.permute.xlu0 %3999  ;;  %v5170_v52 = vrot.slane %v5166_v18, 4 }
 0x481   : > { %v5174_v11 = vsel %vm622_vm7, %v5170_v52, %v5171_v49 }
 0x482   : > { %v5258_v3 = vpop.permute.xlu1 %5257  ;;  %v5175_v47 = vsel %vm2134_vm15, %v5166_v18, %v5174_v11 }
 0x483   : > { %v5164_v19 = vpop.permute.xlu0 %5163  ;;  %v5262_v42 = vrot.slane %v5258_v3, 4 }
 0x484   : > { %v5169_v51 = vrot.slane %v5164_v19, 4 }
 0x485   : > { %v5266_v25 = vsel %vm622_vm7, %v5262_v42, %v5263_v31 }
 0x486   : > { %v5267_v10 = vsel %vm2253_vm0, %v5258_v3, %v5266_v25  ;;  %v5172_v53 = vsel %vm622_vm7, %v5169_v51, %v5170_v52  ;;  %v4986_v37 = vpop.permute.xlu1 %4985 }
 0x487   : > { %v5256_v60 = vpop.permute.xlu0 %5255  ;;  %v7168_v32 = vcombine.low %v5175_v47, %v5267_v10  ;;  %v7169_v15 = vcombine.high %v5175_v47, %v5267_v10  ;;  %v4990_v56 = vrot.slane %v4986_v37, 4  ;;  %v5173_v22 = vsel %vm2134_vm15, %v5164_v19, %v5172_v53 }
 0x488   : > { %v5261_v40 = vrot.slane %v5256_v60, 4  ;;  %vm10082_vm15 = vcmask 900096  }
 0x489   : > { %6625 = vmatprep.subr.bf16.mxu1 %v7169_v15  ;;  %v4994_v16 = vsel %vm622_vm7, %v4990_v56, %v4991_v55  ;;  %v4631_v15 = vrot.slane %v9537_v45, 4 }
 0x48a   : > { %v5264_v28 = vsel %vm622_vm7, %v5261_v40, %v5262_v42  ;;  %v5078_v57 = vpop.permute.xlu1 %5077  ;;  %6626 = vmatpush1.bf16.msra.mxu1 %v7168_v32  ;;  %v4995_v6 = vsel %vm1902_vm4, %v4986_v37, %v4994_v16  ;;  %v4723_v40 = vrot.slane %v9535_v4, 4 }
 0x48b   : > { %v5265_v35 = vsel %vm2253_vm0, %v5256_v60, %v5264_v28  ;;  %v4984_v29 = vpop.permute.xlu0 %4983  ;;  %v5082_v8 = vrot.slane %v5078_v57, 4  ;;  %vm10084_vm0 = vcmask 916480  }
 0x48c   : > { %v7166_v36 = vcombine.low %v5173_v22, %v5265_v35  ;;  %v7167_v17 = vcombine.high %v5173_v22, %v5265_v35  ;;  %v4989_v50 = vrot.slane %v4984_v29, 4 }
 0x48d   : > { %v5086_v39 = vsel %vm622_vm7, %v5082_v8, %v5083_v38 }
 0x48e   : > { %6584 = vmatprep.subr.bf16.mxu0 %v7167_v17  ;;  %v5087_v44 = vsel %vm2020_vm5, %v5078_v57, %v5086_v39  ;;  %v4992_v13 = vsel %vm622_vm7, %v4989_v50, %v4990_v56  ;;  %v4806_v63 = vpop.permute.xlu1 %4805 }
 0x48f   : > { %6585 = vmatpush1.bf16.msra.mxu0 %v7166_v36  ;;  %v5076_v46 = vpop.permute.xlu0 %5075  ;;  %v7164_v21 = vcombine.low %v4995_v6, %v5087_v44  ;;  %v7165_v0 = vcombine.high %v4995_v6, %v5087_v44  ;;  %v4810_v41 = vrot.slane %v4806_v63, 4  ;;  %v4993_v27 = vsel %vm1902_vm4, %v4984_v29, %v4992_v13 }
 0x490   : > { %v5081_v5 = vrot.slane %v5076_v46, 4  ;;  %vm10085_vm4 = vcmask 908288  }
 0x491   : > { %6627 = vmatprep.subr.bf16.mxu1 %v7165_v0  ;;  %v4814_v18 = vsel %vm622_vm7, %v4810_v41, %v4811_v1  ;;  %v4543_v0 = vrot.slane %v9554_v2, 4 }
 0x492   : > { %v5084_v9 = vsel %vm622_vm7, %v5081_v5, %v5082_v8  ;;  %v4898_v49 = vpop.permute.xlu1 %4897  ;;  %6628 = vmatpush1.bf16.msra.mxu1 %v7164_v21  ;;  %v4815_v51 = vsel %vm1669_vm2, %v4806_v63, %v4814_v18 }
 0x493   : > { %v5085_v52 = vsel %vm2020_vm5, %v5076_v46, %v5084_v9  ;;  %v4804_v3 = vpop.permute.xlu0 %4803  ;;  %v4902_v11 = vrot.slane %v4898_v49, 4  ;;  %v4451_v46 = vrot.slane %v9556_v20, 4  ;;  %vm10086_vm5 = vmmov %vm10084_vm0 }
 0x494   : > { %v7162_v19 = vcombine.low %v4993_v27, %v5085_v52  ;;  %v7163_v31 = vcombine.high %v4993_v27, %v5085_v52  ;;  %v4809_v42 = vrot.slane %v4804_v3, 4 }
 0x495   : > { %v4906_v30 = vsel %vm622_vm7, %v4902_v11, %v4903_v43 }
 0x496   : > { %6586 = vmatprep.subr.bf16.mxu0 %v7163_v31  ;;  %v4907_v26 = vsel %vm1788_vm13, %v4898_v49, %v4906_v30  ;;  %v4812_v25 = vsel %vm622_vm7, %v4809_v42, %v4810_v41  ;;  %v4626_v47 = vpop.permute.xlu1 %4625 }
 0x497   : > { %6587 = vmatpush1.bf16.msra.mxu0 %v7162_v19  ;;  %v4896_v10 = vpop.permute.xlu0 %4895  ;;  %v7160_v53 = vcombine.low %v4815_v51, %v4907_v26  ;;  %v7161_v37 = vcombine.high %v4815_v51, %v4907_v26  ;;  %v4630_v60 = vrot.slane %v4626_v47, 4  ;;  %v4813_v55 = vsel %vm1669_vm2, %v4804_v3, %v4812_v25  ;;  %v3865_v3 = vld [vmem:[#allocation6 + $0x8] sm:$0x11] }
 0x498   : > { %v4901_v32 = vrot.slane %v4896_v10, 4  ;;  %vm10088_vm2 = vcmask 973824  }
 0x499   : > { %6629 = vmatprep.subr.bf16.mxu1 %v7161_v37  ;;  %v4634_v28 = vsel %vm622_vm7, %v4630_v60, %v4631_v15  ;;  %v6977_v37 = vcombine.high %v3865_v3, %v3865_v3  ;;  %vm10091_vm10 = vmmov %vm10088_vm2 }
 0x49a   : > { %v4904_v56 = vsel %vm622_vm7, %v4901_v32, %v4902_v11  ;;  %v4718_v22 = vpop.permute.xlu1 %4717  ;;  %6630 = vmatpush1.bf16.msra.mxu1 %v7160_v53  ;;  %v4635_v17 = vsel %vm10082_vm15, %v4626_v47, %v4634_v28  ;;  %v4271_v47 = vrot.slane %v9561_v23, 4  ;;  %v3864_v28 = vld [vmem:[#allocation6] sm:$0x11] }
 0x49b   : > { %v4905_v38 = vsel %vm1788_vm13, %v4896_v10, %v4904_v56  ;;  %v4624_v16 = vpop.permute.xlu0 %4623  ;;  %v4722_v29 = vrot.slane %v4718_v22, 4  ;;  %vm10083_vm13 = vmmov %vm10082_vm15  ;;  %v6976_v10 = vcombine.low %v3865_v3, %v3865_v3 }
 0x49c   : > { %v7158_v35 = vcombine.low %v4813_v55, %v4905_v38  ;;  %v7159_v57 = vcombine.high %v4813_v55, %v4905_v38  ;;  %v4629_v36 = vrot.slane %v4624_v16, 4  ;;  %vm10098_vm15 = vmmov %vm10096_vm11 }
 0x49d   : > { %v4726_v45 = vsel %vm622_vm7, %v4722_v29, %v4723_v40 }
 0x49e   : > { %6588 = vmatprep.subr.bf16.mxu0 %v7159_v57  ;;  %v4727_v4 = vsel %vm1515_vm6, %v4718_v22, %v4726_v45  ;;  %v4632_v8 = vsel %vm622_vm7, %v4629_v36, %v4630_v60  ;;  %v4446_v50 = vpop.permute.xlu1 %4445  ;;  %v4363_v60 = vrot.slane %v9559_v59, 4  ;;  %v6974_v59 = vcombine.low %v3864_v28, %v3864_v28 }
 0x49f   : > { %6589 = vmatpush1.bf16.msra.mxu0 %v7158_v35  ;;  %v4716_v39 = vpop.permute.xlu0 %4715  ;;  %v7156_v6 = vcombine.low %v4635_v17, %v4727_v4  ;;  %v7157_v44 = vcombine.high %v4635_v17, %v4727_v4  ;;  %v4450_v13 = vrot.slane %v4446_v50, 4  ;;  %v4633_v41 = vsel %vm10083_vm13, %v4624_v16, %v4632_v8 }
 0x4a0   : > { %v4721_v63 = vrot.slane %v4716_v39, 4  ;;  %v3891_v35 = vpack.i.b16 %v6976_v10, %v6976_v10  ;;  %v6975_v36 = vcombine.high %v3864_v28, %v3864_v28 }
 0x4a1   : > { %6631 = vmatprep.subr.bf16.mxu1 %v7157_v44  ;;  %v4454_v5 = vsel %vm622_vm7, %v4450_v13, %v4451_v46  ;;  %v10090_v46 = vld [vmem:[#allocation18_spill] sm:$0xff] }
 0x4a2   : > { %v4724_v21 = vsel %vm622_vm7, %v4721_v63, %v4722_v29  ;;  %v4538_v9 = vpop.permute.xlu1 %4537  ;;  %6632 = vmatpush1.bf16.msra.mxu1 %v7156_v6  ;;  %v4455_v19 = vsel %vm10084_vm0, %v4446_v50, %v4454_v5  ;;  %v3898_v29 = vpack.i.b16 %v6977_v37, %v6977_v37  ;;  %v4091_v63 = vrot.slane %v9566_v58, 4  ;;  %vm10101_vm0 = vmmov %vm10083_vm13 }
 0x4a3   : > { %v4725_v1 = vsel %vm1515_vm6, %v4716_v39, %v4724_v21  ;;  %v4444_v43 = vpop.permute.xlu0 %4443  ;;  %v4542_v52 = vrot.slane %v4538_v9, 4  ;;  %vm10087_vm6 = vmmov %vm10085_vm4  ;;  %v3896_v21 = vrot.slane %v3891_v35, %v10090_v46  ;;  %v3877_v5 = vpack.i.b16 %v6974_v59, %v6974_v59 }
 0x4a4   : > { %v7154_v27 = vcombine.low %v4633_v41, %v4725_v1  ;;  %v7155_v18 = vcombine.high %v4633_v41, %v4725_v1  ;;  %v4449_v49 = vrot.slane %v4444_v43, 4  ;;  %v3903_v41 = vrot.slane %v3898_v29, %v10090_v46 }
 0x4a5   : > { %v4546_v20 = vsel %vm622_vm7, %v4542_v52, %v4543_v0  ;;  %v3884_v1 = vpack.i.b16 %v6975_v36, %v6975_v36 }
 0x4a6   : > { %6590 = vmatprep.subr.bf16.mxu0 %v7155_v18  ;;  %v4547_v2 = vsel %vm10085_vm4, %v4538_v9, %v4546_v20  ;;  %v4452_v31 = vsel %vm622_vm7, %v4449_v49, %v4450_v13  ;;  %v4266_v11 = vpop.permute.xlu1 %4265  ;;  %v4183_v9 = vrot.slane %v9564_v33, 4  ;;  %vm10103_vm4 = vmmov %vm10088_vm2 }
 0x4a7   : > { %6591 = vmatpush1.bf16.msra.mxu0 %v7154_v27  ;;  %v4536_v42 = vpop.permute.xlu0 %4535  ;;  %v7152_v30 = vcombine.low %v4455_v19, %v4547_v2  ;;  %v7153_v51 = vcombine.high %v4455_v19, %v4547_v2  ;;  %v4270_v26 = vrot.slane %v4266_v11, 4  ;;  %v4453_v32 = vsel %vm10086_vm5, %v4444_v43, %v4452_v31  ;;  %vm10104_vm5 = vmmov %vm10089_vm3 }
 0x4a8   : > { %v4541_v25 = vrot.slane %v4536_v42, 4  ;;  %v6979_v31 = vcombine.low %v3896_v21, %v3903_v41  ;;  %v3889_v33 = vrot.slane %v3884_v1, %v10090_v46  ;;  %v10100_v1 = vld [vmem:[#allocation22_spill] sm:$0xff] }
 0x4a9   : > { %6633 = vmatprep.subr.bf16.mxu1 %v7153_v51  ;;  %v4274_v15 = vsel %vm622_vm7, %v4270_v26, %v4271_v47 }
 0x4aa   : > { %v4544_v53 = vsel %vm622_vm7, %v4541_v25, %v4542_v52  ;;  %v4358_v40 = vpop.permute.xlu1 %4357  ;;  %6634 = vmatpush1.bf16.msra.mxu1 %v7152_v30  ;;  %v4275_v45 = vsel %vm10088_vm2, %v4266_v11, %v4274_v15  ;;  %v3882_v11 = vrot.slane %v3877_v5, %v10090_v46  ;;  %vm10107_vm2 = vcmask 908288  }
 0x4ab   : > { %v4545_v56 = vsel %vm10087_vm6, %v4536_v42, %v4544_v53  ;;  %v4264_v55 = vpop.permute.xlu0 %4263  ;;  %v4362_v23 = vrot.slane %v4358_v40, 4  ;;  %v4003_v42 = vrot.slane %v9568_v24, 4  ;;  %vm10106_vm6 = vcmask 916480  }
 0x4ac   : > { %v7150_v38 = vcombine.low %v4453_v32, %v4545_v56  ;;  %v7151_v22 = vcombine.high %v4453_v32, %v4545_v56  ;;  %v4269_v16 = vrot.slane %v4264_v55, 4  ;;  %v3917_v32 = vmul.bf16 %v6979_v31, %v9159_v61 }
 0x4ad   : > { %v4366_v57 = vsel %vm622_vm7, %v4362_v23, %v4363_v60 }
 0x4ae   : > { %6592 = vmatprep.subr.bf16.mxu0 %v7151_v22  ;;  %v4367_v17 = vsel %vm10089_vm3, %v4358_v40, %v4366_v57  ;;  %v4272_v4 = vsel %vm622_vm7, %v4269_v16, %v4270_v26  ;;  %v4086_v8 = vpop.permute.xlu1 %4085  ;;  %vm10108_vm3 = vmmov %vm10106_vm6 }
 0x4af   : > { %6593 = vmatpush1.bf16.msra.mxu0 %v7150_v38  ;;  %v4356_v50 = vpop.permute.xlu0 %4355  ;;  %v7148_v39 = vcombine.low %v4275_v45, %v4367_v17  ;;  %v7149_v6 = vcombine.high %v4275_v45, %v4367_v17  ;;  %v4090_v44 = vrot.slane %v4086_v8, 4  ;;  %v4273_v43 = vsel %vm10091_vm10, %v4264_v55, %v4272_v4  ;;  %vm10109_vm10 = vmmov %vm10107_vm2 }
 0x4b0   : > { %v4361_v13 = vrot.slane %v4356_v50, 4  ;;  %v6978_v38 = vcombine.low %v3882_v11, %v3889_v33  ;;  %v10102_v33 = vld [vmem:[#allocation21_spill] sm:$0xff] }
 0x4b1   : > { %6635 = vmatprep.subr.bf16.mxu1 %v7149_v6  ;;  %v4094_v27 = vsel %vm622_vm7, %v4090_v44, %v4091_v63 }
 0x4b2   : > { %v4364_v0 = vsel %vm622_vm7, %v4361_v13, %v4362_v23  ;;  %v4178_v52 = vpop.permute.xlu1 %4177  ;;  %6636 = vmatpush1.bf16.msra.mxu1 %v7148_v39  ;;  %v4095_v30 = vsel %vm10093_vm1, %v4086_v8, %v4094_v27  ;;  %v3916_v29 = vmul.bf16 %v6978_v38, %v9246_v48  ;;  %v10099_v48 = vld [vmem:[#allocation20_spill] sm:$0xff] }
 0x4b3   : > { %v4365_v18 = vsel %vm10092_vm9, %v4356_v50, %v4364_v0  ;;  %v4084_v58 = vpop.permute.xlu0 %4083  ;;  %v4182_v3 = vrot.slane %v4178_v52, 4  ;;  %v6221_v13 = vrot.slane %v10099_v48, 4  ;;  %v5861_v0 = vrot.slane %v9474_v12, 4  ;;  %vm10110_vm9 = vmmov %vm10097_vm12 }
 0x4b4   : > { %v7146_v49 = vcombine.low %v4273_v43, %v4365_v18  ;;  %v7147_v20 = vcombine.high %v4273_v43, %v4365_v18  ;;  %v4089_v19 = vrot.slane %v4084_v58, 4 }
 0x4b5   : > { %v4186_v2 = vsel %vm622_vm7, %v4182_v3, %v4183_v9  ;;  %v5953_v9 = vrot.slane %v10100_v1, 4 }
 0x4b6   : > { %6594 = vmatprep.subr.bf16.mxu0 %v7147_v20  ;;  %v4187_v51 = vsel %vm10094_vm14, %v4178_v52, %v4186_v2  ;;  %v4092_v26 = vsel %vm622_vm7, %v4089_v19, %v4090_v44  ;;  %v3998_v25 = vpop.permute.xlu1 %3997  ;;  %v6041_v19 = vrot.slane %v9463_v54, 4  ;;  %vm10111_vm14 = vmmov %vm10103_vm4 }
 0x4b7   : > { %6595 = vmatpush1.bf16.msra.mxu0 %v7146_v49  ;;  %v4176_v47 = vpop.permute.xlu0 %4175  ;;  %v7144_v10 = vcombine.low %v4095_v30, %v4187_v51  ;;  %v7145_v53 = vcombine.high %v4095_v30, %v4187_v51  ;;  %v4002_v37 = vrot.slane %v3998_v25, 4  ;;  %v4093_v24 = vsel %vm10095_vm8, %v4084_v58, %v4092_v26  ;;  %vm10112_vm8 = vmmov %vm10104_vm5 }
 0x4b8   : > { %v4181_v60 = vrot.slane %v4176_v47, 4 }
 0x4b9   : > { %v4006_v15 = vsel %vm622_vm7, %v4002_v37, %v4003_v42  ;;  %6637 = vmatprep.subr.bf16.mxu1 %v7145_v53  ;;  %v6133_v42 = vrot.slane %v10102_v33, 4 }
 0x4ba   : > { %v4184_v56 = vsel %vm622_vm7, %v4181_v60, %v4182_v3  ;;  %v4007_v40 = vsel %vm10096_vm11, %v3998_v25, %v4006_v15  ;;  %v6214_v28 = vpop.permute.xlu1 %6213  ;;  %6638 = vmatpush1.bf16.msra.mxu1 %v7144_v10  ;;  %vm10114_vm11 = vmmov %vm10093_vm1 }
 0x4bb   : > { %v4185_v55 = vsel %vm10097_vm12, %v4176_v47, %v4184_v56  ;;  %v3996_v22 = vpop.permute.xlu0 %3995  ;;  %v7140_v23 = vcombine.low %v3917_v32, %v4007_v40  ;;  %v7141_v16 = vcombine.high %v3917_v32, %v4007_v40  ;;  %v6219_v63 = vrot.slane %v6214_v28, 4  ;;  %v10105_v40 = vld [vmem:[#allocation23_spill] sm:$0xff]  ;;  %vm10115_vm12 = vmmov %vm10110_vm9 }
 0x4bc   : > { %v7142_v35 = vcombine.low %v4093_v24, %v4185_v55  ;;  %v7143_v57 = vcombine.high %v4093_v24, %v4185_v55  ;;  %v4001_v61 = vrot.slane %v3996_v22, 4  ;;  %v5681_v24 = vrot.slane %v9486_v14, 4 }
 0x4bd   : > { %6639 = vmatprep.subr.bf16.mxu1 %v7141_v16  ;;  %v5773_v55 = vrot.slane %v10105_v40, 4 }
 0x4be   : > { %6596 = vmatprep.subr.bf16.mxu0 %v7143_v57  ;;  %v4004_v59 = vsel %vm622_vm7, %v4001_v61, %v4002_v37  ;;  %v6034_v36 = vpop.permute.xlu1 %6033  ;;  %6640 = vmatpush1.bf16.msra.mxu1 %v7140_v23 }
 0x4bf   : > { %6597 = vmatpush1.bf16.msra.mxu0 %v7142_v35  ;;  %v9648_v45 = vpop.permute.xlu0 %5343  ;;  %v4005_v17 = vsel %vm10098_vm15, %v3996_v22, %v4004_v59  ;;  %v6039_v2 = vrot.slane %v6034_v36, 4  ;;  %v5454_v59 = vld [vmem:[#allocation6 + $0x20] sm:$0x22] }
 0x4c0   : > { %v7138_v4 = vcombine.low %v3916_v29, %v4005_v17  ;;  %v7139_v8 = vcombine.high %v3916_v29, %v4005_v17  ;;  %v5349_v40 = vrot.slane %v9648_v45, 4 }
 0x4c2   : > { %6598 = vmatprep.subr.bf16.mxu0 %v7139_v8  ;;  %v6126_v50 = vpop.permute.xlu1 %6125 }
 0x4c3   : > { %v9651_v39 = vpop.permute.xlu0 %5435  ;;  %6599 = vmatpush1.bf16.msra.mxu0 %v7138_v4  ;;  %v6131_v30 = vrot.slane %v6126_v50, 4 }
 0x4c6   : > { %v9653_v6 = vpop.permute.xlu1 %5855 }
 0x4c7   : > { %v6216_v44 = vpop.permute.xlu0 %6215  ;;  %v5860_v46 = vrot.slane %v9653_v6, 4 }
 0x4c8   : > { %v6220_v21 = vrot.slane %v6216_v44, 4 }
 0x4c9   : > { %v5864_v43 = vsel %vm622_vm7, %v5860_v46, %v5861_v0  ;;  %v7083_v0 = vcombine.high %v5454_v59, %v5454_v59 }
 0x4ca   : > { %v6222_v41 = vsel %vm622_vm7, %v6219_v63, %v6220_v21  ;;  %v6224_v5 = vsel %vm622_vm7, %v6220_v21, %v6221_v13  ;;  %v9665_v18 = vpop.permute.xlu1 %5947  ;;  %v5865_v25 = vsel %vm10103_vm4, %v9653_v6, %v5864_v43  ;;  %v7082_v21 = vcombine.low %v5454_v59, %v5454_v59  ;;  %vm10118_vm4 = vmmov %vm10098_vm15 }
 0x4cb   : > { %v6225_v27 = vsel %vm10083_vm13, %v6216_v44, %v6224_v5  ;;  %v6036_v52 = vpop.permute.xlu0 %6035  ;;  %v6223_v58 = vsel %vm10101_vm0, %v6214_v28, %v6222_v41  ;;  %v5952_v12 = vrot.slane %v9665_v18, 4  ;;  %v5455_v41 = vld [vmem:[#allocation6 + $0x28] sm:$0x22]  ;;  %vm10116_vm13 = vcmask 375808  }
 0x4cc   : > { %v7192_v49 = vcombine.low %v6225_v27, %v6225_v27  ;;  %v7193_v20 = vcombine.high %v6225_v27, %v6225_v27  ;;  %v6040_v3 = vrot.slane %v6036_v52, 4  ;;  %v7191_v31 = vcombine.high %v6223_v58, %v6223_v58 }
 0x4cd   : > { %v7190_v11 = vcombine.low %v6223_v58, %v6223_v58  ;;  %v5956_v51 = vsel %vm622_vm7, %v5952_v12, %v5953_v9  ;;  %v7084_v27 = vcombine.low %v5455_v41, %v5455_v41  ;;  %vm10117_vm0 = vcmask 384000  }
 0x4ce   : > { %7196 = vmatprep.subr.msk.bf16.mxu1 %vm622_vm7, %v7193_v20  ;;  %v6579_v26 = vsel %vm622_vm7, %v7192_v49, 0  ;;  %v5957_v47 = vsel %vm10104_vm5, %v9665_v18, %v5956_v51  ;;  %v6042_v54 = vsel %vm622_vm7, %v6039_v2, %v6040_v3  ;;  %7194 = vmatprep.subr.msk.bf16.mxu0 %vm622_vm7, %v7191_v31  ;;  %v9680_v10 = vpop.permute.xlu1 %5675  ;;  %v6044_v15 = vsel %vm622_vm7, %v6040_v3, %v6041_v19  ;;  %v10113_v51 = vld [vmem:[#allocation17_spill] sm:$0xff]  ;;  %vm10119_vm5 = vmmov %vm10117_vm0 }
 0x4cf   : > { %v6573_v53 = vsel %vm622_vm7, %v7190_v11, 0  ;;  %6646 = vmatpush2.bf16.msra.mxu1 %v6579_v26  ;;  %v6128_v37 = vpop.permute.xlu0 %6127  ;;  %v7184_v60 = vcombine.low %v5865_v25, %v5957_v47  ;;  %v7185_v32 = vcombine.high %v5865_v25, %v5957_v47  ;;  %v5680_v28 = vrot.slane %v9680_v10, 4 }
 0x4d0   : > { %6605 = vmatpush2.bf16.msra.mxu0 %v6573_v53  ;;  %v6132_v56 = vrot.slane %v6128_v37, 4  ;;  %v6045_v23 = vsel %vm10106_vm6, %v6036_v52, %v6044_v15  ;;  %v6043_v61 = vsel %vm10108_vm3, %v6034_v36, %v6042_v54  ;;  %v7085_v18 = vcombine.high %v5455_v41, %v5455_v41  ;;  %vm10120_vm6 = vmmov %vm10116_vm13 }
 0x4d1   : > { %v5684_v13 = vsel %vm622_vm7, %v5680_v28, %v5681_v24  ;;  %v5467_v49 = vpack.i.b16 %v7082_v21, %v7082_v21  ;;  %v5474_v20 = vpack.i.b16 %v7083_v0, %v7083_v0 }
 0x4d2   : > { %v6134_v38 = vsel %vm622_vm7, %v6131_v30, %v6132_v56  ;;  %v6136_v22 = vsel %vm622_vm7, %v6132_v56, %v6133_v42  ;;  %v5768_v35 = vpop.permute.xlu1 %5767  ;;  %v5685_v43 = vsel %vm10093_vm1, %v9680_v10, %v5684_v13  ;;  %v5481_v42 = vpack.i.b16 %v7084_v27, %v7084_v27 }
 0x4d3   : > { %v6137_v16 = vsel %vm10107_vm2, %v6128_v37, %v6136_v22  ;;  %v5854_v57 = vpop.permute.xlu0 %5853  ;;  %v6135_v29 = vsel %vm10109_vm10, %v6126_v50, %v6134_v38  ;;  %v5772_v4 = vrot.slane %v5768_v35, 4  ;;  %v5488_v30 = vpack.i.b16 %v7085_v18, %v7085_v18 }
 0x4d4   : > { %v7188_v14 = vcombine.low %v6045_v23, %v6137_v16  ;;  %v7189_v17 = vcombine.high %v6045_v23, %v6137_v16  ;;  %v5859_v8 = vrot.slane %v5854_v57, 4  ;;  %v7186_v44 = vcombine.low %v6043_v61, %v6135_v29 }
 0x4d5   : > { %v7187_v48 = vcombine.high %v6043_v61, %v6135_v29  ;;  %v5776_v63 = vsel %vm622_vm7, %v5772_v4, %v5773_v55  ;;  %v5479_v26 = vrot.slane %v5474_v20, %v10113_v51  ;;  %v5486_v37 = vrot.slane %v5481_v42, %v10113_v51 }
 0x4d6   : > { %6647 = vmatprep.subr.bf16.mxu1 %v7189_v17  ;;  %v5777_v5 = vsel %vm10110_vm9, %v5768_v35, %v5776_v63  ;;  %v9696_v36 = vpop.permute.xlu1 %5587  ;;  %v5862_v1 = vsel %vm622_vm7, %v5859_v8, %v5860_v46 }
 0x4d7   : > { %6606 = vmatprep.subr.bf16.mxu0 %v7187_v48  ;;  %6648 = vmatpush2.bf16.msra.mxu1 %v7188_v14  ;;  %v5946_v50 = vpop.permute.xlu0 %5945  ;;  %v7181_v52 = vcombine.high %v5685_v43, %v5777_v5  ;;  %v5863_v3 = vsel %vm10111_vm14, %v5854_v57, %v5862_v1  ;;  %v7180_v33 = vcombine.low %v5685_v43, %v5777_v5  ;;  %v5592_v55 = vrot.slane %v9696_v36, 4 }
 0x4d8   : > { %6607 = vmatpush2.bf16.msra.mxu0 %v7186_v44  ;;  %v5951_v9 = vrot.slane %v5946_v50, 4  ;;  %6649 = vmatprep.subr.bf16.mxu1 %v7185_v32  ;;  %v5441_v32 = vrot.slane %v9651_v39, 4 }
 0x4da   : > { %v5954_v58 = vsel %vm622_vm7, %v5951_v9, %v5952_v12  ;;  %v9706_v6 = vpop.permute.xlu1 %5345  ;;  %v5472_v12 = vrot.slane %v5467_v49, %v10113_v51 }
 0x4db   : > { %v5955_v19 = vsel %vm10112_vm8, %v5946_v50, %v5954_v58  ;;  %6650 = vmatpush2.bf16.msra.mxu1 %v7184_v60  ;;  %v5674_v46 = vpop.permute.xlu0 %5673  ;;  %v5493_v60 = vrot.slane %v5488_v30, %v10113_v51  ;;  %v5350_v15 = vrot.slane %v9706_v6, 4 }
 0x4dc   : > { %v7182_v2 = vcombine.low %v5863_v3, %v5955_v19  ;;  %v7183_v31 = vcombine.high %v5863_v3, %v5955_v19  ;;  %v5679_v11 = vrot.slane %v5674_v46, 4  ;;  %6651 = vmatprep.subr.bf16.mxu1 %v7181_v52  ;;  %v7086_v24 = vcombine.low %v5472_v12, %v5479_v26 }
 0x4dd   : > { %v5352_v29 = vsel %vm622_vm7, %v5349_v40, %v5350_v15  ;;  %v7087_v17 = vcombine.low %v5486_v37, %v5493_v60  ;;  %v7136_v52 = vcombine.low %v9545_v7, %v9545_v7 }
 0x4de   : > { %6608 = vmatprep.subr.bf16.mxu0 %v7183_v31  ;;  %v5438_v25 = vpop.permute.xlu1 %5437  ;;  %v5682_v54 = vsel %vm622_vm7, %v5679_v11, %v5680_v28  ;;  %v5506_v59 = vmul.bf16 %v7086_v24, %v9416_v34  ;;  %v5353_v0 = vsel %vm10117_vm0, %v9648_v45, %v5352_v29 }
 0x4df   : > { %6609 = vmatpush2.bf16.msra.mxu0 %v7182_v2  ;;  %6652 = vmatpush2.bf16.msra.mxu1 %v7180_v33  ;;  %v5766_v47 = vpop.permute.xlu0 %5765  ;;  %v5442_v10 = vrot.slane %v5438_v25, 4  ;;  %v5683_v38 = vsel %vm10114_vm11, %v5674_v46, %v5682_v54  ;;  %v5507_v5 = vmul.bf16 %v7087_v17, %v9444_v62 }
 0x4e0   : > { %v5771_v53 = vrot.slane %v5766_v47, 4 }
 0x4e1   : > { %v5444_v23 = vsel %vm622_vm7, %v5441_v32, %v5442_v10 }
 0x4e2   : > { %v5774_v56 = vsel %vm622_vm7, %v5771_v53, %v5772_v4  ;;  %v5348_v61 = vpop.permute.xlu1 %5347  ;;  %v5445_v44 = vsel %vm10116_vm13, %v9651_v39, %v5444_v23 }
 0x4e3   : > { %v5775_v28 = vsel %vm10115_vm12, %v5766_v47, %v5774_v56  ;;  %v5586_v22 = vpop.permute.xlu0 %5585  ;;  %v5351_v48 = vrot.slane %v5348_v61, 4  ;;  %v7171_v41 = vcombine.high %v5353_v0, %v5445_v44  ;;  %v7170_v18 = vcombine.low %v5353_v0, %v5445_v44  ;;  %v6695_v56 = vld [vmem:[%s9804_s8] sm:$0xff] }
 0x4e4   : > { %v7178_v16 = vcombine.low %v5683_v38, %v5775_v28  ;;  %v7179_v35 = vcombine.high %v5683_v38, %v5775_v28  ;;  %v5591_v57 = vrot.slane %v5586_v22, 4 }
 0x4e5   : > { %v5354_v39 = vsel %vm622_vm7, %v5350_v15, %v5351_v48  ;;  %v6705_v15 = vld [vmem:[%s9805_s9] sm:$0xff] }
 0x4e6   : > { %v5594_v14 = vsel %vm622_vm7, %v5591_v57, %v5592_v55  ;;  %6610 = vmatprep.subr.bf16.mxu0 %v7179_v35  ;;  %v5355_v62 = vsel %vm10119_vm5, %v9706_v6, %v5354_v39 }
 0x4e7   : > { %v5595_v4 = vsel %vm10098_vm15, %v5586_v22, %v5594_v14  ;;  %6611 = vmatpush2.bf16.msra.mxu0 %v7178_v16  ;;  %v5590_v8 = vpop.permute.xlu0 %5589 }
 0x4e8   : > { %v7174_v13 = vcombine.low %v5506_v59, %v5595_v4  ;;  %v7175_v63 = vcombine.high %v5506_v59, %v5595_v4  ;;  %v5593_v21 = vrot.slane %v5590_v8, 4 }
 0x4ea   : > { %v5596_v34 = vsel %vm622_vm7, %v5592_v55, %v5593_v21  ;;  %6612 = vmatprep.subr.bf16.mxu0 %v7175_v63 }
 0x4eb   : > { %6613 = vmatpush2.bf16.msra.mxu0 %v7174_v13  ;;  %v5440_v50 = vpop.permute.xlu0 %5439  ;;  %v5597_v1 = vsel %vm10118_vm4, %v9696_v36, %v5596_v34 }
 0x4ec   : > { %v5443_v9 = vrot.slane %v5440_v50, 4  ;;  %6614 = vmatprep.subr.bf16.mxu0 %v7171_v41  ;;  %v7176_v43 = vcombine.low %v5507_v5, %v5597_v1  ;;  %v7177_v27 = vcombine.high %v5507_v5, %v5597_v1 }
 0x4ee   : > { %v5446_v45 = vsel %vm622_vm7, %v5442_v10, %v5443_v9  ;;  %6653 = vmatprep.subr.bf16.mxu1 %v7177_v27 }
 0x4ef   : > { %6615 = vmatpush2.bf16.msra.mxu0 %v7170_v18  ;;  %6654 = vmatpush2.bf16.msra.mxu1 %v7176_v43  ;;  %v5447_v36 = vsel %vm10120_vm6, %v5438_v25, %v5446_v45  ;;  %v6289_v20 = vpop.permute.xlu1 %6288 }
 0x4f0   : > { %v7172_v58 = vcombine.low %v5355_v62, %v5447_v36  ;;  %v7173_v49 = vcombine.high %v5355_v62, %v5447_v36 }
 0x4f2   : > { %6617 = vmatmul.mubr.bf16.vlgmr.msra.gmra.mxu0 %v7136_v52  ;;  %6655 = vmatprep.subr.bf16.mxu1 %v7173_v49 }
 0x4f3   : > { %6656 = vmatpush2.bf16.msra.mxu1 %v7172_v58 }
 0x4f6   : > { %6658 = vmatmul.mubr.bf16.vlgmr.msra.gmra.mxu1 %v7136_v52 }
 0x5b2   : > { %v6618_v3 = vpop.f32.mrf.mxu0 }
 0x5b3   : > { %v6619_v19 = vadd.f32 %v6618_v3, %v6289_v20 }
 0x5b4   : > { %v6620_v46 = vpop.f32.mrf.mxu0 }
 0x5b5   : > { %v6621_v2 = vadd.f32 %v6620_v46, %v6289_v20  ;;  %v6672_v11 = vmul.f32 %v6619_v19, %v6619_v19 }
 0x5b6   : > { %v6622_v31 = vpop.f32.mrf.mxu0  ;;  %v6659_v7 = vpop.f32.mrf.mxu1 }
 0x5b7   : > { %v6666_v33 = vadd.f32 %v6621_v2, %v6619_v19  ;;  %v6673_v42 = vmul.f32 %v6621_v2, %v6621_v2  ;;  %v6660_v30 = vadd.f32 %v6659_v7, %v6289_v20 }
 0x5b8   : > { %v6623_v6 = vpop.f32.mrf.mxu0  ;;  %v6661_v51 = vpop.f32.mrf.mxu1 }
 0x5b9   : > { %v6676_v12 = vadd.f32 %v6673_v42, %v6672_v11  ;;  %v6667_v26 = vadd.f32 %v6666_v33, %v6660_v30  ;;  %v6674_v25 = vmul.f32 %v6660_v30, %v6660_v30  ;;  %v6662_v47 = vadd.f32 %v6661_v51, %v6289_v20 }
 0x5ba   : > { %v6663_v54 = vpop.f32.mrf.mxu1 }
 0x5bb   : > { %v6675_v10 = vmul.f32 %v6662_v47, %v6662_v47  ;;  %v6668_v53 = vadd.f32 %v6667_v26, %v6662_v47  ;;  %v6677_v37 = vadd.f32 %v6676_v12, %v6674_v25 }
 0x5bc   : > { %v6664_v60 = vpop.f32.mrf.mxu1 }
 0x5bd   : > { %6669 = vadd.xlane.f32.xlu0 %v6668_v53  ;;  %v6678_v32 = vadd.f32 %v6677_v37, %v6675_v10 }
 0x5bf   : > { %6679 = vadd.xlane.f32.xlu1 %v6678_v32 }
 0x5d0   : > { %6708 = vperm.xlu1 %7294, %v6705_v15  }
 0x5d3   : > { %6698 = vperm.xlu0 %7295, %v6695_v56  }
 0x646   : > { %v6670_v24 = vpop.xlane.xlu0 %6669 }
 0x647   : > { %v6671_v40 = vmul.f32 0.001953125, %v6670_v24 }
 0x648   : > { %v6680_v55 = vpop.xlane.xlu1 %6679 }
 0x649   : > { %v6681_v38 = vmul.f32 0.001953125, %v6680_v55  ;;  %v6682_v28 = vmul.f32 %v6671_v40, %v6671_v40  ;;  %v6685_v35 = vsub.f32 %v6619_v19, %v6671_v40  ;;  %v6686_v57 = vsub.f32 %v6621_v2, %v6671_v40 }
 0x64a   : > { %v6687_v61 = vsub.f32 %v6660_v30, %v6671_v40  ;;  %v6688_v29 = vsub.f32 %v6662_v47, %v6671_v40 }
 0x64b   : > { %v6683_v22 = vsub.f32 %v6681_v38, %v6682_v28 }
 0x64c   : > { %v6709_v0 = vpop.permute.xlu1 %6708 }
 0x64d   : > { %v6684_v23 = vmax.f32 %v6683_v22, 0.0 }
 0x64e   : > { %v6699_v44 = vpop.permute.xlu0 %6698 }
 0x64f   : > { %v6689_v16 = vadd.f32 1e-05, %v6684_v23 }
 0x651   : > { %7559 = vrsqrt.f32 %v6689_v16 }
 0x65e   : > { %v7560_v59 = vpop.eup %7559 }
 0x65f   : > { %v6691_v14 = vmul.f32 %v7560_v59, %v6685_v35  ;;  %v6692_v17 = vmul.f32 %v7560_v59, %v6686_v57  ;;  %v6693_v4 = vmul.f32 %v7560_v59, %v6687_v61  ;;  %v6694_v8 = vmul.f32 %v7560_v59, %v6688_v29 }
 0x661   : > { %v6701_v48 = vmul.f32 %v6699_v44, %v6691_v14  ;;  %v6702_v13 = vmul.f32 %v6699_v44, %v6692_v17  ;;  %v6703_v63 = vmul.f32 %v6699_v44, %v6693_v4  ;;  %v6704_v21 = vmul.f32 %v6699_v44, %v6694_v8 }
 0x663   : > { %v6711_v34 = vadd.f32 %v6709_v0, %v6701_v48  ;;  %v6712_v41 = vadd.f32 %v6709_v0, %v6702_v13  ;;  %v6713_v5 = vadd.f32 %v6709_v0, %v6703_v63  ;;  %v6714_v50 = vadd.f32 %v6709_v0, %v6704_v21 }
 0x665   : > { %vm6715_vm7 = vcmp.ge.f32.partialorder %v6711_v34, 0.0  ;;  %vm6716_vm2 = vcmp.ge.f32.partialorder %v6712_v41, 0.0  ;;  %vm6717_vm3 = vcmp.ge.f32.partialorder %v6713_v5, 0.0  ;;  %vm6718_vm10 = vcmp.ge.f32.partialorder %v6714_v50, 0.0 }
 0x666   : > { %v6719_v1 = vmul.f32 0.01, %v6711_v34  ;;  %v6720_v39 = vmul.f32 0.01, %v6712_v41  ;;  %v6721_v9 = vmul.f32 0.01, %v6713_v5 }
 0x667   : > { %v6722_v43 = vmul.f32 0.01, %v6714_v50 }
 0x668   : > { %v6723_v27 = vsel %vm6715_vm7, %v6711_v34, %v6719_v1  ;;  %v6724_v18 = vsel %vm6716_vm2, %v6712_v41, %v6720_v39  ;;  %v6725_v45 = vsel %vm6717_vm3, %v6713_v5, %v6721_v9 }
 0x669   : > { %v6726_v52 = vsel %vm6718_vm10, %v6714_v50, %v6722_v43  ;;  %6727 = vst [vmem:[%s367_s24] sm:$0xff] %v6723_v27  ;;  %6728 = vst [vmem:[%s367_s24 + $0x8] sm:$0xff] %v6724_v18 }
 0x66a   : > { %6729 = vst [vmem:[%s367_s24 + $0x10] sm:$0xff] %v6725_v45  ;;  %6730 = vst [vmem:[%s367_s24 + $0x18] sm:$0xff] %v6726_v52 }
 0x66b   : > { %7600 = shalt.err (!%p7597_p0)
}
 0x66c   : > { %s7601_s29 = scalar_lea.hbm %s9753_s3, 512  ;;  %s7605_s11 = scalar_lea.hbm %s9806_s10, 1024 }
 0x66d   : > { %p7602_p1 = scmp.ne.s32.totalorder %s9753_s3, %s7601_s29  ;;  %p7606_p4 = scmp.lt.s32.totalorder %s9753_s3, %s9806_s10 }
 0x66e   : > { %p7607_p7 = scmp.lt.s32.totalorder %s7605_s11, %s7601_s29 }
 0x66f   : > { %p7603_p2 = pnand %p7602_p1, %p7785_p5 }
 0x670   : > { %p7608_p8 = por %p7607_p7, %p7606_p4 }
 0x671   : > { %p7604_p3 = pneg %p7603_p2 }
 0x673   : > { %p7609_p6 = pnand %p7608_p8, %p7604_p3 }
 0x675   : > { %7612 = shalt.err (!%p7609_p6)
}
 0x676   : > { %7211 = dma.vmem_to_hbm [thread:$0]  (%p7785_p5), %s9755_s5, 512, %s9753_s3, %s6732_s17  }
 0x677 PF: > { %s10121_s20 = sld [smem:[#allocation12_spill]]  ;;  %p7223_p9 = scmp.ge.s32.totalorder %s7651_s16, 2 }
 0x678   : > { %s10122_s21 = sld [smem:[#allocation16_spill]] }
 0x67d   : > { %s6758_s26 = sand.u32 1, %s10121_s20  }
 0x67e   : > { %p10123_p10 = scmp.ne.s32.totalorder %s10122_s21, 0  ;;  %s6759_s25 = scalar_lea.sflag [#allocation8], %s6758_s26 }
 0x680   : > { %p7218_p11 = pnand %p7223_p9, %p10123_p10 }
 0x682   : > { %p7219_p12 = pneg %p7218_p11 }
 0x684   : > { %7634 = dma.done.wait (%p7219_p12), %s6759_s25, 512  }
 0x685   : > { %7636 = vsyncadd (%p7219_p12), %s6759_s25, 4294966784  ;;  %s10124_s16 = sld [smem:[#allocation14_spill]]  ;;  %s10127_s13 = smov %s7643_s14 }
 0x686   : > { %s10125_s15 = sld [smem:[#allocation13_spill]] }
 0x687   : > { %s10126_s22 = sld [smem:[#allocation15_spill]] }
 0x68b   : > { %p21_p13 = scmp.ge.s32.totalorder %s10124_s16, 4  }
 0x68c   : > { %s10128_s14 = smov %s10125_s15 }
 0x68d   : > { %s10129_s15 = smov %s10126_s22  ;;  %23 = sbr.rel (!%p21_p13) target bundleno = 10 (0xa), region = 100 }
 0x692   :  { %6764 = vsyncpa [#allocation7], 1 }
 0x693   :  { %6766 = vsyncpa [#allocation7 + $0x1], 1 }
 0x694   :  { %6767 = vsyncpa [#allocation8], 1 }
 0x695   :  { %6769 = vsyncpa [#allocation8 + $0x1], 1 }

</bundles_post_ra>
